<compile_context>
chip_gen: v7x
topology: tpu7x:2x2x1
jax: 0.10.0
libtpu: 0.0.40
codegen_flags: <defaults>
</compile_context>

<pallas_src>
import functools

import jax
import jax.numpy as jnp
from jax import lax
from jax.experimental import pallas as pl
from jax.experimental.pallas import tpu as pltpu

BN_EPS = 1e-5   # PyTorch BatchNorm2d default eps
LANE = 128


def _round_up(x, m):
  return (x + m - 1) // m * m


def _pick_row_tile(ho, wo, cp, budget_bytes=2 << 20):
  """Largest divisor of ho whose f32 output tile stays under ~2 MiB."""
  max_rows = max(1, budget_bytes // (wo * cp * 4))
  th = 1
  for d in range(1, ho + 1):
    if ho % d == 0 and d <= max_rows:
      th = d
  return th


def _partial_stats(y):
  """(8, C) tile: row 0 = sum over rows of y, row 1 = sum of squares."""
  cp = y.shape[-1]
  s1 = jnp.sum(y, axis=0, keepdims=True)
  s2 = jnp.sum(y * y, axis=0, keepdims=True)
  row = lax.broadcasted_iota(jnp.int32, (8, cp), 0)
  zeros = jnp.zeros((8, cp), jnp.float32)
  return jnp.where(row == 0, jnp.broadcast_to(s1, (8, cp)),
                   jnp.where(row == 1, jnp.broadcast_to(s2, (8, cp)), zeros))


# ----------------------------- conv kernels ---------------------------------
def _make_conv3x3_kernel(stride):
  """3x3 conv (padding=1, given stride) as 9 accumulated bf16 MXU matmuls.

  Inputs are stride-phase planes so every tap is a contiguous window read.
  Also emits per-tile BN partial statistics.
  """
  s = stride

  def kernel(xph_ref, w_ref, y_ref, stats_ref):
    _, th, wo, cout_p = y_ref.shape
    cin_p = xph_ref.shape[-1]
    h0 = pl.program_id(1) * th
    acc = jnp.zeros((th * wo, cout_p), jnp.float32)
    for kh in range(3):
      for kw in range(3):
        pidx = (kh % s) * s + (kw % s)       # which phase plane
        ah, aw = kh // s, kw // s            # offset inside the phase plane
        patch = xph_ref[0, pidx, pl.ds(h0 + ah, th), pl.ds(aw, wo), :]
        acc = acc + jnp.dot(patch.reshape(th * wo, cin_p),
                            w_ref[kh * 3 + kw],
                            preferred_element_type=jnp.float32)
    y_ref[...] = acc.reshape(1, th, wo, cout_p)
    stats_ref[0, 0] = _partial_stats(acc)

  return kernel


def _conv3x3(xph, w9, stride, ho, wo):
  """xph: (N, s*s, Hph, Wph, Cin_p) bf16 phase planes; w9: (9, Cin_p, Cout_p) bf16."""
  n = xph.shape[0]
  cout_p = w9.shape[-1]
  th = _pick_row_tile(ho, wo, cout_p)
  ht = ho // th
  y, stats = pl.pallas_call(
      _make_conv3x3_kernel(stride),
      out_shape=(jax.ShapeDtypeStruct((n, ho, wo, cout_p), jnp.float32),
                 jax.ShapeDtypeStruct((n, ht, 8, cout_p), jnp.float32)),
      grid=(n, ht),
      in_specs=[
          # whole (padded) image resident across row tiles of the same image
          pl.BlockSpec((1,) + xph.shape[1:], lambda i, r: (i, 0, 0, 0, 0)),
          pl.BlockSpec(w9.shape, lambda i, r: (0, 0, 0)),
      ],
      out_specs=(
          pl.BlockSpec((1, th, wo, cout_p), lambda i, r: (i, r, 0, 0)),
          pl.BlockSpec((1, 1, 8, cout_p), lambda i, r: (i, r, 0, 0)),
      ),
      compiler_params=pltpu.CompilerParams(
          dimension_semantics=("parallel", "arbitrary")),
  )(xph, w9)
  return (y,
          stats[:, :, 0, :].sum(axis=(0, 1)),
          stats[:, :, 1, :].sum(axis=(0, 1)))


def _conv1x1_kernel(x_ref, w_ref, y_ref, stats_ref):
  _, ho, wo, cin_p = x_ref.shape
  cout_p = w_ref.shape[-1]
  xm = x_ref[0].reshape(ho * wo, cin_p)
  y = jnp.dot(xm, w_ref[...], preferred_element_type=jnp.float32)
  y_ref[...] = y.reshape(1, ho, wo, cout_p)
  stats_ref[0] = _partial_stats(y)


def _conv1x1(xs, w):
  """1x1 projection conv (stride already applied in the wrapper slice)."""
  n, ho, wo, cin_p = xs.shape
  cout_p = w.shape[-1]
  y, stats = pl.pallas_call(
      _conv1x1_kernel,
      out_shape=(jax.ShapeDtypeStruct((n, ho, wo, cout_p), jnp.float32),
                 jax.ShapeDtypeStruct((n, 8, cout_p), jnp.float32)),
      grid=(n,),
      in_specs=[pl.BlockSpec((1, ho, wo, cin_p), lambda i: (i, 0, 0, 0)),
                pl.BlockSpec(w.shape, lambda i: (0, 0))],
      out_specs=(pl.BlockSpec((1, ho, wo, cout_p), lambda i: (i, 0, 0, 0)),
                 pl.BlockSpec((1, 8, cout_p), lambda i: (i, 0, 0))),
      compiler_params=pltpu.CompilerParams(dimension_semantics=("parallel",)),
  )(xs, w)
  return y, stats[:, 0, :].sum(axis=0), stats[:, 1, :].sum(axis=0)


# ----------------------- fused BN / residual / ReLU --------------------------
def _bn_relu_kernel(y_ref, sc_ref, sh_ref, o_ref):
  v = jnp.maximum(y_ref[...] * sc_ref[...] + sh_ref[...], 0.0)
  o_ref[...] = v.astype(o_ref.dtype)


def _bn_relu(y, scale, shift):
  n, ho, wo, cp = y.shape
  img = pl.BlockSpec((1, ho, wo, cp), lambda i: (i, 0, 0, 0))
  vec = pl.BlockSpec((1, cp), lambda i: (0, 0))
  return pl.pallas_call(
      _bn_relu_kernel,
      out_shape=jax.ShapeDtypeStruct((n, ho, wo, cp), jnp.bfloat16),
      grid=(n,),
      in_specs=[img, vec, vec],
      out_specs=img,
      compiler_params=pltpu.CompilerParams(dimension_semantics=("parallel",)),
  )(y, scale, shift)


def _bn_add_relu_kernel(y_ref, r_ref, sc_ref, sh_ref, scr_ref, shr_ref, o_ref):
  out = (y_ref[...] * sc_ref[...] + sh_ref[...]
         + r_ref[...].astype(jnp.float32) * scr_ref[...] + shr_ref[...])
  o_ref[...] = jnp.maximum(out, 0.0)


def _bn_add_relu(y, r, sc, sh, scr, shr):
  n, ho, wo, cp = y.shape
  img = pl.BlockSpec((1, ho, wo, cp), lambda i: (i, 0, 0, 0))
  vec = pl.BlockSpec((1, cp), lambda i: (0, 0))
  return pl.pallas_call(
      _bn_add_relu_kernel,
      out_shape=jax.ShapeDtypeStruct((n, ho, wo, cp), jnp.float32),
      grid=(n,),
      in_specs=[img, img, vec, vec, vec, vec],
      out_specs=img,
      compiler_params=pltpu.CompilerParams(dimension_semantics=("parallel",)),
  )(y, r, sc, sh, scr, shr)


# ----------------------------- host-side glue --------------------------------
def _bn_coeffs(ssum, ssq, count, gamma, beta, cout, cout_p):
  """Combine partial sums into per-channel scale/shift (biased batch variance)."""
  mean = ssum[:cout] / count
  var = jnp.maximum(ssq[:cout] / count - mean * mean, 0.0)
  scale = gamma * lax.rsqrt(var + BN_EPS)
  shift = beta - mean * scale
  pad = cout_p - cout
  return (jnp.pad(scale, (0, pad)).reshape(1, cout_p),
          jnp.pad(shift, (0, pad)).reshape(1, cout_p))


def _phase_split(x, stride):
  """Pad spatially by 1 and split into stride x stride phase planes.

  Returns (N, s*s, Hph, Wph, C) so every 3x3/stride tap inside the kernel is a
  contiguous window read of one phase plane.
  """
  n, h, w, c = x.shape
  s = stride
  ho = (h + 2 - 3) // s + 1
  wo = (w + 2 - 3) // s + 1
  a = 2 // s                       # max tap offset inside a phase plane
  hph, wph = ho + a, wo + a
  xp = jnp.pad(x, ((0, 0), (1, s * hph - h - 1), (1, s * wph - w - 1), (0, 0)))
  phases = [xp[:, p::s, q::s, :] for p in range(s) for q in range(s)]
  return jnp.stack(phases, axis=1), ho, wo


def _pad_w3x3(w, cin_p, cout_p):
  cin, cout = w.shape[2], w.shape[3]
  wp = jnp.pad(w, ((0, 0), (0, 0), (0, cin_p - cin), (0, cout_p - cout)))
  return wp.reshape(9, cin_p, cout_p).astype(jnp.bfloat16)


def _pad_w1x1(w, cin_p, cout_p):
  cin, cout = w.shape[2], w.shape[3]
  wp = jnp.pad(w.reshape(cin, cout), ((0, cin_p - cin), (0, cout_p - cout)))
  return wp.astype(jnp.bfloat16)


def basic_block_nhwc(x, params, stride):
  """NHWC-native BasicBlock forward (training-mode BN batch statistics)."""
  n, h, w, cin = x.shape
  cout = params['w1'].shape[-1]
  cin_p = _round_up(cin, LANE)
  cout_p = _round_up(cout, LANE)
  xc = jnp.pad(x, ((0, 0), (0, 0), (0, 0), (0, cin_p - cin)))   # lane-dense f32

  # conv1 (3x3, stride) -> batch stats -> bn1+relu
  xph1, ho, wo = _phase_split(xc.astype(jnp.bfloat16), stride)
  w1 = _pad_w3x3(params['w1'], cin_p, cout_p)
  y1, s1, q1 = _conv3x3(xph1, w1, stride, ho, wo)
  cnt = n * ho * wo
  sc1, sh1 = _bn_coeffs(s1, q1, cnt, params['g1'], params['beta1'], cout, cout_p)
  out1 = _bn_relu(y1, sc1, sh1)                                 # bf16, conv2 input

  # conv2 (3x3, stride 1) -> batch stats
  out1p = jnp.pad(out1, ((0, 0), (1, 1), (1, 1), (0, 0)))
  xph2 = out1p.reshape(n, 1, ho + 2, wo + 2, cout_p)
  w2 = _pad_w3x3(params['w2'], cout_p, cout_p)
  y2, s2, q2 = _conv3x3(xph2, w2, 1, ho, wo)
  sc2, sh2 = _bn_coeffs(s2, q2, cnt, params['g2'], params['beta2'], cout, cout_p)

  # shortcut: identity, or 1x1-stride projection conv + its own batch stats
  if stride != 1 or cin != cout:
    xs = xc[:, ::stride, ::stride, :].astype(jnp.bfloat16)      # (n,ho,wo,cin_p)
    ws = _pad_w1x1(params['ws'], cin_p, cout_p)
    resid, ss, qs = _conv1x1(xs, ws)
    scr, shr = _bn_coeffs(ss, qs, cnt, params['gs'], params['betas'], cout, cout_p)
  else:
    resid = xc
    scr = jnp.ones((1, cout_p), jnp.float32)
    shr = jnp.zeros((1, cout_p), jnp.float32)

  # bn2 + (scaled/shifted residual) + relu, fused and tiled
  out = _bn_add_relu(y2, resid, sc2, sh2, scr, shr)
  return out[..., :cout]


def basic_block(x_nchw, params, stride):
  """PyTorch-interface wrapper (NCHW in / NCHW out)."""
  # TODO(synk): when stacking blocks, stay NHWC end-to-end and drop these transposes.
  x = jnp.transpose(x_nchw, (0, 2, 3, 1)).astype(jnp.float32)
  out = basic_block_nhwc(x, params, stride)
  return jnp.transpose(out, (0, 3, 1, 2))


def init_params(key, cin, cout, stride):
  ks = jax.random.split(key, 12)
  params = {
      'w1': 0.1 * jax.random.normal(ks[0], (3, 3, cin, cout), jnp.float32),
      'b1': 0.1 * jax.random.normal(ks[1], (cout,), jnp.float32),
      'g1': 1.0 + 0.1 * jax.random.normal(ks[2], (cout,), jnp.float32),
      'beta1': 0.1 * jax.random.normal(ks[3], (cout,), jnp.float32),
      'w2': 0.1 * jax.random.normal(ks[4], (3, 3, cout, cout), jnp.float32),
      'b2': 0.1 * jax.random.normal(ks[5], (cout,), jnp.float32),
      'g2': 1.0 + 0.1 * jax.random.normal(ks[6], (cout,), jnp.float32),
      'beta2': 0.1 * jax.random.normal(ks[7], (cout,), jnp.float32),
  }
  if stride != 1 or cin != cout:
    params.update({
        'ws': 0.1 * jax.random.normal(ks[8], (1, 1, cin, cout), jnp.float32),
        'bs': 0.1 * jax.random.normal(ks[9], (cout,), jnp.float32),
        'gs': 1.0 + 0.1 * jax.random.normal(ks[10], (cout,), jnp.float32),
        'betas': 0.1 * jax.random.normal(ks[11], (cout,), jnp.float32),
    })
  return params


# ---------------- pure-JAX f32 reference (PyTorch-equivalent forward) --------
def _bn_train_ref(y, gamma, beta):
  mean = jnp.mean(y, axis=(0, 1, 2), keepdims=True)
  var = jnp.mean((y - mean) ** 2, axis=(0, 1, 2), keepdims=True)
  return (y - mean) * lax.rsqrt(var + BN_EPS) * gamma + beta


def ref_basic_block(x_nchw, params, stride):
  x = jnp.transpose(x_nchw, (0, 2, 3, 1)).astype(jnp.float32)
  dn = ('NHWC', 'HWIO', 'NHWC')
  cin = x.shape[-1]
  cout = params['w1'].shape[-1]
  y = lax.conv_general_dilated(x, params['w1'], (stride, stride),
                               ((1, 1), (1, 1)), dimension_numbers=dn)
  y = jax.nn.relu(_bn_train_ref(y + params['b1'], params['g1'], params['beta1']))
  z = lax.conv_general_dilated(y, params['w2'], (1, 1), ((1, 1), (1, 1)),
                               dimension_numbers=dn)
  z = _bn_train_ref(z + params['b2'], params['g2'], params['beta2'])
  if stride != 1 or cin != cout:
    s = lax.conv_general_dilated(x, params['ws'], (stride, stride),
                                 ((0, 0), (0, 0)), dimension_numbers=dn)
    s = _bn_train_ref(s + params['bs'], params['gs'], params['betas'])
  else:
    s = x
  return jnp.transpose(jax.nn.relu(z + s), (0, 3, 1, 2))


if __name__ == "__main__":
  key = jax.random.PRNGKey(0)
  kx1, kp1, kx2, kp2 = jax.random.split(key, 4)

  # Case 1: projection shortcut (stride 2, 4 -> 8 channels).
  N, CIN, H, W, COUT, STRIDE = 2, 4, 16, 16, 8, 2
  x1 = jax.random.normal(kx1, (N, CIN, H, W), jnp.float32)
  p1 = init_params(kp1, CIN, COUT, STRIDE)
  run1 = jax.jit(functools.partial(basic_block, stride=STRIDE))
  out1 = jax.block_until_ready(run1(x1, p1))
  ref1 = jax.block_until_ready(ref_basic_block(x1, p1, STRIDE))
  assert out1.shape == (N, COUT, H // STRIDE, W // STRIDE), out1.shape
  err1 = float(jnp.max(jnp.abs(out1 - ref1)))
  # bf16 MXU operands (f32 accumulation) -> tolerance looser than pure f32.
  assert jnp.allclose(out1, ref1, rtol=3e-2, atol=3e-2), f"max abs err {err1}"

  # Case 2: identity shortcut (stride 1, 8 -> 8 channels).
  x2 = jax.random.normal(kx2, (N, COUT, H, W), jnp.float32)
  p2 = init_params(kp2, COUT, COUT, 1)
  run2 = jax.jit(functools.partial(basic_block, stride=1))
  out2 = jax.block_until_ready(run2(x2, p2))
  ref2 = jax.block_until_ready(ref_basic_block(x2, p2, 1))
  assert out2.shape == (N, COUT, H, W), out2.shape
  err2 = float(jnp.max(jnp.abs(out2 - ref2)))
  assert jnp.allclose(out2, ref2, rtol=3e-2, atol=3e-2), f"max abs err {err2}"

  print("KERNEL_OK")
</pallas_src>

<mosaic_0001>
module attributes {stable_mosaic.version = 11 : i64} {
  func.func @kernel(%arg0: i32, %arg1: i32, %arg2: memref<1x4x9x9x128xbf16, #tpu.memory_space<vmem>>, %arg3: memref<9x128x128xbf16, #tpu.memory_space<vmem>>, %arg4: memref<1x8x8x128xf32, #tpu.memory_space<vmem>>, %arg5: memref<1x1x8x128xf32, #tpu.memory_space<vmem>>) attributes {dimension_semantics = [#tpu.dimension_semantics<parallel>, #tpu.dimension_semantics<arbitrary>], iteration_bounds = array<i64: 2, 1>, scalar_prefetch = 0 : i64, scratch_operands = 0 : i64, tpu.core_type = #tpu.core_type<tc>, window_params = [{transform_indices = @transform_0, window_bounds = array<i64: 1, 4, 9, 9, 128>}, {pipeline_mode = #tpu.pipeline_mode<synchronous>, transform_indices = @transform_1, window_bounds = array<i64: 9, 128, 128>}, {transform_indices = @transform_2, window_bounds = array<i64: 1, 8, 8, 128>}, {transform_indices = @transform_3, window_bounds = array<i64: 1, 1, 8, 128>}]} {
    %c8_i32 = arith.constant 8 : i32
    %0 = arith.muli %arg1, %c8_i32 : i32
    %cst = arith.constant 0.000000e+00 : f32
    %1 = vector.broadcast %cst : f32 to vector<64x128xf32>
    %c0_i32 = arith.constant 0 : i32
    %2 = arith.addi %0, %c0_i32 : i32
    %c0 = arith.constant 0 : index
    %c0_0 = arith.constant 0 : index
    %3 = arith.index_cast %2 : i32 to index
    %c0_1 = arith.constant 0 : index
    %c0_2 = arith.constant 0 : index
    %4 = vector.load %arg2[%c0, %c0_0, %3, %c0_1, %c0_2] : memref<1x4x9x9x128xbf16, #tpu.memory_space<vmem>>, vector<1x1x8x8x128xbf16>
    %5 = vector.shape_cast %4 : vector<1x1x8x8x128xbf16> to vector<8x8x128xbf16>
    %6 = vector.shape_cast %5 : vector<8x8x128xbf16> to vector<64x128xbf16>
    %c0_3 = arith.constant 0 : index
    %c0_4 = arith.constant 0 : index
    %c0_5 = arith.constant 0 : index
    %7 = vector.load %arg3[%c0_3, %c0_4, %c0_5] : memref<9x128x128xbf16, #tpu.memory_space<vmem>>, vector<1x128x128xbf16>
    %8 = vector.shape_cast %7 : vector<1x128x128xbf16> to vector<128x128xbf16>
    %cst_6 = arith.constant dense<0.000000e+00> : vector<64x128xf32>
    %9 = tpu.matmul %6, %8, %cst_6 {dimension_numbers = #tpu.dot_dimension_numbers<[1], [0], [0], [1], [0, 0, 1, 1], [], []>} : vector<64x128xbf16>, vector<128x128xbf16>, vector<64x128xf32> -> vector<64x128xf32>
    %10 = arith.addf %1, %9 : vector<64x128xf32>
    %c0_i32_7 = arith.constant 0 : i32
    %11 = arith.addi %0, %c0_i32_7 : i32
    %c0_8 = arith.constant 0 : index
    %c1 = arith.constant 1 : index
    %12 = arith.index_cast %11 : i32 to index
    %c0_9 = arith.constant 0 : index
    %c0_10 = arith.constant 0 : index
    %13 = vector.load %arg2[%c0_8, %c1, %12, %c0_9, %c0_10] : memref<1x4x9x9x128xbf16, #tpu.memory_space<vmem>>, vector<1x1x8x8x128xbf16>
    %14 = vector.shape_cast %13 : vector<1x1x8x8x128xbf16> to vector<8x8x128xbf16>
    %15 = vector.shape_cast %14 : vector<8x8x128xbf16> to vector<64x128xbf16>
    %c1_11 = arith.constant 1 : index
    %c0_12 = arith.constant 0 : index
    %c0_13 = arith.constant 0 : index
    %16 = vector.load %arg3[%c1_11, %c0_12, %c0_13] : memref<9x128x128xbf16, #tpu.memory_space<vmem>>, vector<1x128x128xbf16>
    %17 = vector.shape_cast %16 : vector<1x128x128xbf16> to vector<128x128xbf16>
    %cst_14 = arith.constant dense<0.000000e+00> : vector<64x128xf32>
    %18 = tpu.matmul %15, %17, %cst_14 {dimension_numbers = #tpu.dot_dimension_numbers<[1], [0], [0], [1], [0, 0, 1, 1], [], []>} : vector<64x128xbf16>, vector<128x128xbf16>, vector<64x128xf32> -> vector<64x128xf32>
    %19 = arith.addf %10, %18 : vector<64x128xf32>
    %c0_i32_15 = arith.constant 0 : i32
    %20 = arith.addi %0, %c0_i32_15 : i32
    %c0_16 = arith.constant 0 : index
    %c0_17 = arith.constant 0 : index
    %21 = arith.index_cast %20 : i32 to index
    %c1_18 = arith.constant 1 : index
    %c0_19 = arith.constant 0 : index
    %22 = vector.load %arg2[%c0_16, %c0_17, %21, %c1_18, %c0_19] : memref<1x4x9x9x128xbf16, #tpu.memory_space<vmem>>, vector<1x1x8x8x128xbf16>
    %23 = vector.shape_cast %22 : vector<1x1x8x8x128xbf16> to vector<8x8x128xbf16>
    %24 = vector.shape_cast %23 : vector<8x8x128xbf16> to vector<64x128xbf16>
    %c2 = arith.constant 2 : index
    %c0_20 = arith.constant 0 : index
    %c0_21 = arith.constant 0 : index
    %25 = vector.load %arg3[%c2, %c0_20, %c0_21] : memref<9x128x128xbf16, #tpu.memory_space<vmem>>, vector<1x128x128xbf16>
    %26 = vector.shape_cast %25 : vector<1x128x128xbf16> to vector<128x128xbf16>
    %cst_22 = arith.constant dense<0.000000e+00> : vector<64x128xf32>
    %27 = tpu.matmul %24, %26, %cst_22 {dimension_numbers = #tpu.dot_dimension_numbers<[1], [0], [0], [1], [0, 0, 1, 1], [], []>} : vector<64x128xbf16>, vector<128x128xbf16>, vector<64x128xf32> -> vector<64x128xf32>
    %28 = arith.addf %19, %27 : vector<64x128xf32>
    %c0_i32_23 = arith.constant 0 : i32
    %29 = arith.addi %0, %c0_i32_23 : i32
    %c0_24 = arith.constant 0 : index
    %c2_25 = arith.constant 2 : index
    %30 = arith.index_cast %29 : i32 to index
    %c0_26 = arith.constant 0 : index
    %c0_27 = arith.constant 0 : index
    %31 = vector.load %arg2[%c0_24, %c2_25, %30, %c0_26, %c0_27] : memref<1x4x9x9x128xbf16, #tpu.memory_space<vmem>>, vector<1x1x8x8x128xbf16>
    %32 = vector.shape_cast %31 : vector<1x1x8x8x128xbf16> to vector<8x8x128xbf16>
    %33 = vector.shape_cast %32 : vector<8x8x128xbf16> to vector<64x128xbf16>
    %c3 = arith.constant 3 : index
    %c0_28 = arith.constant 0 : index
    %c0_29 = arith.constant 0 : index
    %34 = vector.load %arg3[%c3, %c0_28, %c0_29] : memref<9x128x128xbf16, #tpu.memory_space<vmem>>, vector<1x128x128xbf16>
    %35 = vector.shape_cast %34 : vector<1x128x128xbf16> to vector<128x128xbf16>
    %cst_30 = arith.constant dense<0.000000e+00> : vector<64x128xf32>
    %36 = tpu.matmul %33, %35, %cst_30 {dimension_numbers = #tpu.dot_dimension_numbers<[1], [0], [0], [1], [0, 0, 1, 1], [], []>} : vector<64x128xbf16>, vector<128x128xbf16>, vector<64x128xf32> -> vector<64x128xf32>
    %37 = arith.addf %28, %36 : vector<64x128xf32>
    %c0_i32_31 = arith.constant 0 : i32
    %38 = arith.addi %0, %c0_i32_31 : i32
    %c0_32 = arith.constant 0 : index
    %c3_33 = arith.constant 3 : index
    %39 = arith.index_cast %38 : i32 to index
    %c0_34 = arith.constant 0 : index
    %c0_35 = arith.constant 0 : index
    %40 = vector.load %arg2[%c0_32, %c3_33, %39, %c0_34, %c0_35] : memref<1x4x9x9x128xbf16, #tpu.memory_space<vmem>>, vector<1x1x8x8x128xbf16>
    %41 = vector.shape_cast %40 : vector<1x1x8x8x128xbf16> to vector<8x8x128xbf16>
    %42 = vector.shape_cast %41 : vector<8x8x128xbf16> to vector<64x128xbf16>
    %c4 = arith.constant 4 : index
    %c0_36 = arith.constant 0 : index
    %c0_37 = arith.constant 0 : index
    %43 = vector.load %arg3[%c4, %c0_36, %c0_37] : memref<9x128x128xbf16, #tpu.memory_space<vmem>>, vector<1x128x128xbf16>
    %44 = vector.shape_cast %43 : vector<1x128x128xbf16> to vector<128x128xbf16>
    %cst_38 = arith.constant dense<0.000000e+00> : vector<64x128xf32>
    %45 = tpu.matmul %42, %44, %cst_38 {dimension_numbers = #tpu.dot_dimension_numbers<[1], [0], [0], [1], [0, 0, 1, 1], [], []>} : vector<64x128xbf16>, vector<128x128xbf16>, vector<64x128xf32> -> vector<64x128xf32>
    %46 = arith.addf %37, %45 : vector<64x128xf32>
    %c0_i32_39 = arith.constant 0 : i32
    %47 = arith.addi %0, %c0_i32_39 : i32
    %c0_40 = arith.constant 0 : index
    %c2_41 = arith.constant 2 : index
    %48 = arith.index_cast %47 : i32 to index
    %c1_42 = arith.constant 1 : index
    %c0_43 = arith.constant 0 : index
    %49 = vector.load %arg2[%c0_40, %c2_41, %48, %c1_42, %c0_43] : memref<1x4x9x9x128xbf16, #tpu.memory_space<vmem>>, vector<1x1x8x8x128xbf16>
    %50 = vector.shape_cast %49 : vector<1x1x8x8x128xbf16> to vector<8x8x128xbf16>
    %51 = vector.shape_cast %50 : vector<8x8x128xbf16> to vector<64x128xbf16>
    %c5 = arith.constant 5 : index
    %c0_44 = arith.constant 0 : index
    %c0_45 = arith.constant 0 : index
    %52 = vector.load %arg3[%c5, %c0_44, %c0_45] : memref<9x128x128xbf16, #tpu.memory_space<vmem>>, vector<1x128x128xbf16>
    %53 = vector.shape_cast %52 : vector<1x128x128xbf16> to vector<128x128xbf16>
    %cst_46 = arith.constant dense<0.000000e+00> : vector<64x128xf32>
    %54 = tpu.matmul %51, %53, %cst_46 {dimension_numbers = #tpu.dot_dimension_numbers<[1], [0], [0], [1], [0, 0, 1, 1], [], []>} : vector<64x128xbf16>, vector<128x128xbf16>, vector<64x128xf32> -> vector<64x128xf32>
    %55 = arith.addf %46, %54 : vector<64x128xf32>
    %c1_i32 = arith.constant 1 : i32
    %56 = arith.addi %0, %c1_i32 : i32
    %c0_47 = arith.constant 0 : index
    %c0_48 = arith.constant 0 : index
    %57 = arith.index_cast %56 : i32 to index
    %c0_49 = arith.constant 0 : index
    %c0_50 = arith.constant 0 : index
    %58 = vector.load %arg2[%c0_47, %c0_48, %57, %c0_49, %c0_50] : memref<1x4x9x9x128xbf16, #tpu.memory_space<vmem>>, vector<1x1x8x8x128xbf16>
    %59 = vector.shape_cast %58 : vector<1x1x8x8x128xbf16> to vector<8x8x128xbf16>
    %60 = vector.shape_cast %59 : vector<8x8x128xbf16> to vector<64x128xbf16>
    %c6 = arith.constant 6 : index
    %c0_51 = arith.constant 0 : index
    %c0_52 = arith.constant 0 : index
    %61 = vector.load %arg3[%c6, %c0_51, %c0_52] : memref<9x128x128xbf16, #tpu.memory_space<vmem>>, vector<1x128x128xbf16>
    %62 = vector.shape_cast %61 : vector<1x128x128xbf16> to vector<128x128xbf16>
    %cst_53 = arith.constant dense<0.000000e+00> : vector<64x128xf32>
    %63 = tpu.matmul %60, %62, %cst_53 {dimension_numbers = #tpu.dot_dimension_numbers<[1], [0], [0], [1], [0, 0, 1, 1], [], []>} : vector<64x128xbf16>, vector<128x128xbf16>, vector<64x128xf32> -> vector<64x128xf32>
    %64 = arith.addf %55, %63 : vector<64x128xf32>
    %c1_i32_54 = arith.constant 1 : i32
    %65 = arith.addi %0, %c1_i32_54 : i32
    %c0_55 = arith.constant 0 : index
    %c1_56 = arith.constant 1 : index
    %66 = arith.index_cast %65 : i32 to index
    %c0_57 = arith.constant 0 : index
    %c0_58 = arith.constant 0 : index
    %67 = vector.load %arg2[%c0_55, %c1_56, %66, %c0_57, %c0_58] : memref<1x4x9x9x128xbf16, #tpu.memory_space<vmem>>, vector<1x1x8x8x128xbf16>
    %68 = vector.shape_cast %67 : vector<1x1x8x8x128xbf16> to vector<8x8x128xbf16>
    %69 = vector.shape_cast %68 : vector<8x8x128xbf16> to vector<64x128xbf16>
    %c7 = arith.constant 7 : index
    %c0_59 = arith.constant 0 : index
    %c0_60 = arith.constant 0 : index
    %70 = vector.load %arg3[%c7, %c0_59, %c0_60] : memref<9x128x128xbf16, #tpu.memory_space<vmem>>, vector<1x128x128xbf16>
    %71 = vector.shape_cast %70 : vector<1x128x128xbf16> to vector<128x128xbf16>
    %cst_61 = arith.constant dense<0.000000e+00> : vector<64x128xf32>
    %72 = tpu.matmul %69, %71, %cst_61 {dimension_numbers = #tpu.dot_dimension_numbers<[1], [0], [0], [1], [0, 0, 1, 1], [], []>} : vector<64x128xbf16>, vector<128x128xbf16>, vector<64x128xf32> -> vector<64x128xf32>
    %73 = arith.addf %64, %72 : vector<64x128xf32>
    %c1_i32_62 = arith.constant 1 : i32
    %74 = arith.addi %0, %c1_i32_62 : i32
    %c0_63 = arith.constant 0 : index
    %c0_64 = arith.constant 0 : index
    %75 = arith.index_cast %74 : i32 to index
    %c1_65 = arith.constant 1 : index
    %c0_66 = arith.constant 0 : index
    %76 = vector.load %arg2[%c0_63, %c0_64, %75, %c1_65, %c0_66] : memref<1x4x9x9x128xbf16, #tpu.memory_space<vmem>>, vector<1x1x8x8x128xbf16>
    %77 = vector.shape_cast %76 : vector<1x1x8x8x128xbf16> to vector<8x8x128xbf16>
    %78 = vector.shape_cast %77 : vector<8x8x128xbf16> to vector<64x128xbf16>
    %c8 = arith.constant 8 : index
    %c0_67 = arith.constant 0 : index
    %c0_68 = arith.constant 0 : index
    %79 = vector.load %arg3[%c8, %c0_67, %c0_68] : memref<9x128x128xbf16, #tpu.memory_space<vmem>>, vector<1x128x128xbf16>
    %80 = vector.shape_cast %79 : vector<1x128x128xbf16> to vector<128x128xbf16>
    %cst_69 = arith.constant dense<0.000000e+00> : vector<64x128xf32>
    %81 = tpu.matmul %78, %80, %cst_69 {dimension_numbers = #tpu.dot_dimension_numbers<[1], [0], [0], [1], [0, 0, 1, 1], [], []>} : vector<64x128xbf16>, vector<128x128xbf16>, vector<64x128xf32> -> vector<64x128xf32>
    %82 = arith.addf %73, %81 : vector<64x128xf32>
    %83 = vector.shape_cast %82 : vector<64x128xf32> to vector<1x8x8x128xf32>
    %c0_70 = arith.constant 0 : index
    %c0_71 = arith.constant 0 : index
    %c0_72 = arith.constant 0 : index
    %c0_73 = arith.constant 0 : index
    %84 = vector.load %arg4[%c0_70, %c0_71, %c0_72, %c0_73] : memref<1x8x8x128xf32, #tpu.memory_space<vmem>>, vector<1x8x8x128xf32>
    tpu.vector_store %arg4[%c0_70, %c0_71, %c0_72, %c0_73], %83 {strides = array<i32>} : memref<1x8x8x128xf32, #tpu.memory_space<vmem>>, vector<1x8x8x128xf32>,
    %cst_74 = arith.constant dense<0.000000e+00> : vector<128xf32>
    %85 = vector.multi_reduction <add>, %82, %cst_74 [0] : vector<64x128xf32> to vector<128xf32>
    %86 = vector.shape_cast %85 : vector<128xf32> to vector<1x128xf32>
    %87 = arith.mulf %82, %82 : vector<64x128xf32>
    %cst_75 = arith.constant dense<0.000000e+00> : vector<128xf32>
    %88 = vector.multi_reduction <add>, %87, %cst_75 [0] : vector<64x128xf32> to vector<128xf32>
    %89 = vector.shape_cast %88 : vector<128xf32> to vector<1x128xf32>
    %90 = tpu.iota {dimensions = array<i32: 0>} : vector<8x128xi32>
    %cst_76 = arith.constant 0.000000e+00 : f32
    %91 = vector.broadcast %cst_76 : f32 to vector<8x128xf32>
    %c0_i32_77 = arith.constant 0 : i32
    %92 = vector.broadcast %c0_i32_77 : i32 to vector<8x128xi32>
    %93 = arith.cmpi eq, %90, %92 : vector<8x128xi32>
    %94 = vector.shape_cast %86 : vector<1x128xf32> to vector<1x128xf32>
    %95 = vector.broadcast %94 : vector<1x128xf32> to vector<8x128xf32>
    %c1_i32_78 = arith.constant 1 : i32
    %96 = vector.broadcast %c1_i32_78 : i32 to vector<8x128xi32>
    %97 = arith.cmpi eq, %90, %96 : vector<8x128xi32>
    %98 = vector.shape_cast %89 : vector<1x128xf32> to vector<1x128xf32>
    %99 = vector.broadcast %98 : vector<1x128xf32> to vector<8x128xf32>
    %100 = arith.select %97, %99, %91 : vector<8x128xi1>, vector<8x128xf32>
    %101 = arith.select %93, %95, %100 : vector<8x128xi1>, vector<8x128xf32>
    %c0_79 = arith.constant 0 : index
    %c0_80 = arith.constant 0 : index
    %c0_81 = arith.constant 0 : index
    %c0_82 = arith.constant 0 : index
    %102 = vector.load %arg5[%c0_79, %c0_80, %c0_81, %c0_82] : memref<1x1x8x128xf32, #tpu.memory_space<vmem>>, vector<1x1x8x128xf32>
    %103 = vector.shape_cast %102 : vector<1x1x8x128xf32> to vector<8x128xf32>
    %104 = vector.shape_cast %101 : vector<8x128xf32> to vector<1x1x8x128xf32>
    tpu.vector_store %arg5[%c0_79, %c0_80, %c0_81, %c0_82], %104 {strides = array<i32>} : memref<1x1x8x128xf32, #tpu.memory_space<vmem>>, vector<1x1x8x128xf32>,
    return
  }
  func.func @transform_0(%arg0: i32, %arg1: i32) -> (i32, i32, i32, i32, i32) {
    %c0_i32 = arith.constant 0 : i32
    %c0_i32_0 = arith.constant 0 : i32
    %c0_i32_1 = arith.constant 0 : i32
    %c0_i32_2 = arith.constant 0 : i32
    %c0_i32_3 = arith.constant 0 : i32
    return %arg0, %c0_i32, %c0_i32_0, %c0_i32_1, %c0_i32_2 : i32, i32, i32, i32, i32
  }
  func.func @transform_1(%arg0: i32, %arg1: i32) -> (i32, i32, i32) {
    %c0_i32 = arith.constant 0 : i32
    %c0_i32_0 = arith.constant 0 : i32
    %c0_i32_1 = arith.constant 0 : i32
    %c0_i32_2 = arith.constant 0 : i32
    return %c0_i32, %c0_i32_0, %c0_i32_1 : i32, i32, i32
  }
  func.func @transform_2(%arg0: i32, %arg1: i32) -> (i32, i32, i32, i32) {
    %c0_i32 = arith.constant 0 : i32
    %c0_i32_0 = arith.constant 0 : i32
    %c0_i32_1 = arith.constant 0 : i32
    return %arg0, %arg1, %c0_i32, %c0_i32_0 : i32, i32, i32, i32
  }
  func.func @transform_3(%arg0: i32, %arg1: i32) -> (i32, i32, i32, i32) {
    %c0_i32 = arith.constant 0 : i32
    %c0_i32_0 = arith.constant 0 : i32
    %c0_i32_1 = arith.constant 0 : i32
    return %arg0, %arg1, %c0_i32, %c0_i32_0 : i32, i32, i32, i32
  }
}

module attributes {stable_mosaic.version = 11 : i64} {
  func.func @_bn_relu_kernel(%arg0: i32, %arg1: memref<1x8x8x128xf32, #tpu.memory_space<vmem>>, %arg2: memref<1x128xf32, #tpu.memory_space<vmem>>, %arg3: memref<1x128xf32, #tpu.memory_space<vmem>>, %arg4: memref<1x8x8x128xbf16, #tpu.memory_space<vmem>>) attributes {dimension_semantics = [#tpu.dimension_semantics<parallel>], iteration_bounds = array<i64: 2>, scalar_prefetch = 0 : i64, scratch_operands = 0 : i64, tpu.core_type = #tpu.core_type<tc>, window_params = [{transform_indices = @transform_0, window_bounds = array<i64: 1, 8, 8, 128>}, {pipeline_mode = #tpu.pipeline_mode<synchronous>, transform_indices = @transform_1, window_bounds = array<i64: 1, 128>}, {pipeline_mode = #tpu.pipeline_mode<synchronous>, transform_indices = @transform_2, window_bounds = array<i64: 1, 128>}, {transform_indices = @transform_3, window_bounds = array<i64: 1, 8, 8, 128>}]} {
    %c0 = arith.constant 0 : index
    %c0_0 = arith.constant 0 : index
    %c0_1 = arith.constant 0 : index
    %c0_2 = arith.constant 0 : index
    %0 = vector.load %arg1[%c0, %c0_0, %c0_1, %c0_2] : memref<1x8x8x128xf32, #tpu.memory_space<vmem>>, vector<1x8x8x128xf32>
    %c0_3 = arith.constant 0 : index
    %c0_4 = arith.constant 0 : index
    %1 = vector.load %arg2[%c0_3, %c0_4] : memref<1x128xf32, #tpu.memory_space<vmem>>, vector<1x128xf32>
    %2 = vector.shape_cast %1 : vector<1x128xf32> to vector<1x1x1x128xf32>
    %3 = vector.broadcast %2 : vector<1x1x1x128xf32> to vector<1x8x8x128xf32>
    %4 = arith.mulf %0, %3 : vector<1x8x8x128xf32>
    %c0_5 = arith.constant 0 : index
    %c0_6 = arith.constant 0 : index
    %5 = vector.load %arg3[%c0_5, %c0_6] : memref<1x128xf32, #tpu.memory_space<vmem>>, vector<1x128xf32>
    %6 = vector.shape_cast %5 : vector<1x128xf32> to vector<1x1x1x128xf32>
    %7 = vector.broadcast %6 : vector<1x1x1x128xf32> to vector<1x8x8x128xf32>
    %8 = arith.addf %4, %7 : vector<1x8x8x128xf32>
    %cst = arith.constant 0.000000e+00 : f32
    %9 = vector.broadcast %cst : f32 to vector<1x8x8x128xf32>
    %10 = arith.maximumf %8, %9 : vector<1x8x8x128xf32>
    %11 = arith.truncf %10 : vector<1x8x8x128xf32> to vector<1x8x8x128xbf16>
    %c0_7 = arith.constant 0 : index
    %c0_8 = arith.constant 0 : index
    %c0_9 = arith.constant 0 : index
    %c0_10 = arith.constant 0 : index
    %12 = vector.load %arg4[%c0_7, %c0_8, %c0_9, %c0_10] : memref<1x8x8x128xbf16, #tpu.memory_space<vmem>>, vector<1x8x8x128xbf16>
    tpu.vector_store %arg4[%c0_7, %c0_8, %c0_9, %c0_10], %11 {strides = array<i32>} : memref<1x8x8x128xbf16, #tpu.memory_space<vmem>>, vector<1x8x8x128xbf16>,
    return
  }
  func.func @transform_0(%arg0: i32) -> (i32, i32, i32, i32) {
    %c0_i32 = arith.constant 0 : i32
    %c0_i32_0 = arith.constant 0 : i32
    %c0_i32_1 = arith.constant 0 : i32
    %c0_i32_2 = arith.constant 0 : i32
    return %arg0, %c0_i32, %c0_i32_0, %c0_i32_1 : i32, i32, i32, i32
  }
  func.func @transform_1(%arg0: i32) -> (i32, i32) {
    %c0_i32 = arith.constant 0 : i32
    %c0_i32_0 = arith.constant 0 : i32
    %c0_i32_1 = arith.constant 0 : i32
    return %c0_i32, %c0_i32_0 : i32, i32
  }
  func.func @transform_2(%arg0: i32) -> (i32, i32) {
    %c0_i32 = arith.constant 0 : i32
    %c0_i32_0 = arith.constant 0 : i32
    %c0_i32_1 = arith.constant 0 : i32
    return %c0_i32, %c0_i32_0 : i32, i32
  }
  func.func @transform_3(%arg0: i32) -> (i32, i32, i32, i32) {
    %c0_i32 = arith.constant 0 : i32
    %c0_i32_0 = arith.constant 0 : i32
    %c0_i32_1 = arith.constant 0 : i32
    %c0_i32_2 = arith.constant 0 : i32
    return %arg0, %c0_i32, %c0_i32_0, %c0_i32_1 : i32, i32, i32, i32
  }
}

module attributes {stable_mosaic.version = 11 : i64} {
  func.func @kernel(%arg0: i32, %arg1: i32, %arg2: memref<1x1x10x10x128xbf16, #tpu.memory_space<vmem>>, %arg3: memref<9x128x128xbf16, #tpu.memory_space<vmem>>, %arg4: memref<1x8x8x128xf32, #tpu.memory_space<vmem>>, %arg5: memref<1x1x8x128xf32, #tpu.memory_space<vmem>>) attributes {dimension_semantics = [#tpu.dimension_semantics<parallel>, #tpu.dimension_semantics<arbitrary>], iteration_bounds = array<i64: 2, 1>, scalar_prefetch = 0 : i64, scratch_operands = 0 : i64, tpu.core_type = #tpu.core_type<tc>, window_params = [{transform_indices = @transform_0, window_bounds = array<i64: 1, 1, 10, 10, 128>}, {pipeline_mode = #tpu.pipeline_mode<synchronous>, transform_indices = @transform_1, window_bounds = array<i64: 9, 128, 128>}, {transform_indices = @transform_2, window_bounds = array<i64: 1, 8, 8, 128>}, {transform_indices = @transform_3, window_bounds = array<i64: 1, 1, 8, 128>}]} {
    %c8_i32 = arith.constant 8 : i32
    %0 = arith.muli %arg1, %c8_i32 : i32
    %cst = arith.constant 0.000000e+00 : f32
    %1 = vector.broadcast %cst : f32 to vector<64x128xf32>
    %c0_i32 = arith.constant 0 : i32
    %2 = arith.addi %0, %c0_i32 : i32
    %c0 = arith.constant 0 : index
    %c0_0 = arith.constant 0 : index
    %3 = arith.index_cast %2 : i32 to index
    %c0_1 = arith.constant 0 : index
    %c0_2 = arith.constant 0 : index
    %4 = vector.load %arg2[%c0, %c0_0, %3, %c0_1, %c0_2] : memref<1x1x10x10x128xbf16, #tpu.memory_space<vmem>>, vector<1x1x8x8x128xbf16>
    %5 = vector.shape_cast %4 : vector<1x1x8x8x128xbf16> to vector<8x8x128xbf16>
    %6 = vector.shape_cast %5 : vector<8x8x128xbf16> to vector<64x128xbf16>
    %c0_3 = arith.constant 0 : index
    %c0_4 = arith.constant 0 : index
    %c0_5 = arith.constant 0 : index
    %7 = vector.load %arg3[%c0_3, %c0_4, %c0_5] : memref<9x128x128xbf16, #tpu.memory_space<vmem>>, vector<1x128x128xbf16>
    %8 = vector.shape_cast %7 : vector<1x128x128xbf16> to vector<128x128xbf16>
    %cst_6 = arith.constant dense<0.000000e+00> : vector<64x128xf32>
    %9 = tpu.matmul %6, %8, %cst_6 {dimension_numbers = #tpu.dot_dimension_numbers<[1], [0], [0], [1], [0, 0, 1, 1], [], []>} : vector<64x128xbf16>, vector<128x128xbf16>, vector<64x128xf32> -> vector<64x128xf32>
    %10 = arith.addf %1, %9 : vector<64x128xf32>
    %c0_i32_7 = arith.constant 0 : i32
    %11 = arith.addi %0, %c0_i32_7 : i32
    %c0_8 = arith.constant 0 : index
    %c0_9 = arith.constant 0 : index
    %12 = arith.index_cast %11 : i32 to index
    %c1 = arith.constant 1 : index
    %c0_10 = arith.constant 0 : index
    %13 = vector.load %arg2[%c0_8, %c0_9, %12, %c1, %c0_10] : memref<1x1x10x10x128xbf16, #tpu.memory_space<vmem>>, vector<1x1x8x8x128xbf16>
    %14 = vector.shape_cast %13 : vector<1x1x8x8x128xbf16> to vector<8x8x128xbf16>
    %15 = vector.shape_cast %14 : vector<8x8x128xbf16> to vector<64x128xbf16>
    %c1_11 = arith.constant 1 : index
    %c0_12 = arith.constant 0 : index
    %c0_13 = arith.constant 0 : index
    %16 = vector.load %arg3[%c1_11, %c0_12, %c0_13] : memref<9x128x128xbf16, #tpu.memory_space<vmem>>, vector<1x128x128xbf16>
    %17 = vector.shape_cast %16 : vector<1x128x128xbf16> to vector<128x128xbf16>
    %cst_14 = arith.constant dense<0.000000e+00> : vector<64x128xf32>
    %18 = tpu.matmul %15, %17, %cst_14 {dimension_numbers = #tpu.dot_dimension_numbers<[1], [0], [0], [1], [0, 0, 1, 1], [], []>} : vector<64x128xbf16>, vector<128x128xbf16>, vector<64x128xf32> -> vector<64x128xf32>
    %19 = arith.addf %10, %18 : vector<64x128xf32>
    %c0_i32_15 = arith.constant 0 : i32
    %20 = arith.addi %0, %c0_i32_15 : i32
    %c0_16 = arith.constant 0 : index
    %c0_17 = arith.constant 0 : index
    %21 = arith.index_cast %20 : i32 to index
    %c2 = arith.constant 2 : index
    %c0_18 = arith.constant 0 : index
    %22 = vector.load %arg2[%c0_16, %c0_17, %21, %c2, %c0_18] : memref<1x1x10x10x128xbf16, #tpu.memory_space<vmem>>, vector<1x1x8x8x128xbf16>
    %23 = vector.shape_cast %22 : vector<1x1x8x8x128xbf16> to vector<8x8x128xbf16>
    %24 = vector.shape_cast %23 : vector<8x8x128xbf16> to vector<64x128xbf16>
    %c2_19 = arith.constant 2 : index
    %c0_20 = arith.constant 0 : index
    %c0_21 = arith.constant 0 : index
    %25 = vector.load %arg3[%c2_19, %c0_20, %c0_21] : memref<9x128x128xbf16, #tpu.memory_space<vmem>>, vector<1x128x128xbf16>
    %26 = vector.shape_cast %25 : vector<1x128x128xbf16> to vector<128x128xbf16>
    %cst_22 = arith.constant dense<0.000000e+00> : vector<64x128xf32>
    %27 = tpu.matmul %24, %26, %cst_22 {dimension_numbers = #tpu.dot_dimension_numbers<[1], [0], [0], [1], [0, 0, 1, 1], [], []>} : vector<64x128xbf16>, vector<128x128xbf16>, vector<64x128xf32> -> vector<64x128xf32>
    %28 = arith.addf %19, %27 : vector<64x128xf32>
    %c1_i32 = arith.constant 1 : i32
    %29 = arith.addi %0, %c1_i32 : i32
    %c0_23 = arith.constant 0 : index
    %c0_24 = arith.constant 0 : index
    %30 = arith.index_cast %29 : i32 to index
    %c0_25 = arith.constant 0 : index
    %c0_26 = arith.constant 0 : index
    %31 = vector.load %arg2[%c0_23, %c0_24, %30, %c0_25, %c0_26] : memref<1x1x10x10x128xbf16, #tpu.memory_space<vmem>>, vector<1x1x8x8x128xbf16>
    %32 = vector.shape_cast %31 : vector<1x1x8x8x128xbf16> to vector<8x8x128xbf16>
    %33 = vector.shape_cast %32 : vector<8x8x128xbf16> to vector<64x128xbf16>
    %c3 = arith.constant 3 : index
    %c0_27 = arith.constant 0 : index
    %c0_28 = arith.constant 0 : index
    %34 = vector.load %arg3[%c3, %c0_27, %c0_28] : memref<9x128x128xbf16, #tpu.memory_space<vmem>>, vector<1x128x128xbf16>
    %35 = vector.shape_cast %34 : vector<1x128x128xbf16> to vector<128x128xbf16>
    %cst_29 = arith.constant dense<0.000000e+00> : vector<64x128xf32>
    %36 = tpu.matmul %33, %35, %cst_29 {dimension_numbers = #tpu.dot_dimension_numbers<[1], [0], [0], [1], [0, 0, 1, 1], [], []>} : vector<64x128xbf16>, vector<128x128xbf16>, vector<64x128xf32> -> vector<64x128xf32>
    %37 = arith.addf %28, %36 : vector<64x128xf32>
    %c1_i32_30 = arith.constant 1 : i32
    %38 = arith.addi %0, %c1_i32_30 : i32
    %c0_31 = arith.constant 0 : index
    %c0_32 = arith.constant 0 : index
    %39 = arith.index_cast %38 : i32 to index
    %c1_33 = arith.constant 1 : index
    %c0_34 = arith.constant 0 : index
    %40 = vector.load %arg2[%c0_31, %c0_32, %39, %c1_33, %c0_34] : memref<1x1x10x10x128xbf16, #tpu.memory_space<vmem>>, vector<1x1x8x8x128xbf16>
    %41 = vector.shape_cast %40 : vector<1x1x8x8x128xbf16> to vector<8x8x128xbf16>
    %42 = vector.shape_cast %41 : vector<8x8x128xbf16> to vector<64x128xbf16>
    %c4 = arith.constant 4 : index
    %c0_35 = arith.constant 0 : index
    %c0_36 = arith.constant 0 : index
    %43 = vector.load %arg3[%c4, %c0_35, %c0_36] : memref<9x128x128xbf16, #tpu.memory_space<vmem>>, vector<1x128x128xbf16>
    %44 = vector.shape_cast %43 : vector<1x128x128xbf16> to vector<128x128xbf16>
    %cst_37 = arith.constant dense<0.000000e+00> : vector<64x128xf32>
    %45 = tpu.matmul %42, %44, %cst_37 {dimension_numbers = #tpu.dot_dimension_numbers<[1], [0], [0], [1], [0, 0, 1, 1], [], []>} : vector<64x128xbf16>, vector<128x128xbf16>, vector<64x128xf32> -> vector<64x128xf32>
    %46 = arith.addf %37, %45 : vector<64x128xf32>
    %c1_i32_38 = arith.constant 1 : i32
    %47 = arith.addi %0, %c1_i32_38 : i32
    %c0_39 = arith.constant 0 : index
    %c0_40 = arith.constant 0 : index
    %48 = arith.index_cast %47 : i32 to index
    %c2_41 = arith.constant 2 : index
    %c0_42 = arith.constant 0 : index
    %49 = vector.load %arg2[%c0_39, %c0_40, %48, %c2_41, %c0_42] : memref<1x1x10x10x128xbf16, #tpu.memory_space<vmem>>, vector<1x1x8x8x128xbf16>
    %50 = vector.shape_cast %49 : vector<1x1x8x8x128xbf16> to vector<8x8x128xbf16>
    %51 = vector.shape_cast %50 : vector<8x8x128xbf16> to vector<64x128xbf16>
    %c5 = arith.constant 5 : index
    %c0_43 = arith.constant 0 : index
    %c0_44 = arith.constant 0 : index
    %52 = vector.load %arg3[%c5, %c0_43, %c0_44] : memref<9x128x128xbf16, #tpu.memory_space<vmem>>, vector<1x128x128xbf16>
    %53 = vector.shape_cast %52 : vector<1x128x128xbf16> to vector<128x128xbf16>
    %cst_45 = arith.constant dense<0.000000e+00> : vector<64x128xf32>
    %54 = tpu.matmul %51, %53, %cst_45 {dimension_numbers = #tpu.dot_dimension_numbers<[1], [0], [0], [1], [0, 0, 1, 1], [], []>} : vector<64x128xbf16>, vector<128x128xbf16>, vector<64x128xf32> -> vector<64x128xf32>
    %55 = arith.addf %46, %54 : vector<64x128xf32>
    %c2_i32 = arith.constant 2 : i32
    %56 = arith.addi %0, %c2_i32 : i32
    %c0_46 = arith.constant 0 : index
    %c0_47 = arith.constant 0 : index
    %57 = arith.index_cast %56 : i32 to index
    %c0_48 = arith.constant 0 : index
    %c0_49 = arith.constant 0 : index
    %58 = vector.load %arg2[%c0_46, %c0_47, %57, %c0_48, %c0_49] : memref<1x1x10x10x128xbf16, #tpu.memory_space<vmem>>, vector<1x1x8x8x128xbf16>
    %59 = vector.shape_cast %58 : vector<1x1x8x8x128xbf16> to vector<8x8x128xbf16>
    %60 = vector.shape_cast %59 : vector<8x8x128xbf16> to vector<64x128xbf16>
    %c6 = arith.constant 6 : index
    %c0_50 = arith.constant 0 : index
    %c0_51 = arith.constant 0 : index
    %61 = vector.load %arg3[%c6, %c0_50, %c0_51] : memref<9x128x128xbf16, #tpu.memory_space<vmem>>, vector<1x128x128xbf16>
    %62 = vector.shape_cast %61 : vector<1x128x128xbf16> to vector<128x128xbf16>
    %cst_52 = arith.constant dense<0.000000e+00> : vector<64x128xf32>
    %63 = tpu.matmul %60, %62, %cst_52 {dimension_numbers = #tpu.dot_dimension_numbers<[1], [0], [0], [1], [0, 0, 1, 1], [], []>} : vector<64x128xbf16>, vector<128x128xbf16>, vector<64x128xf32> -> vector<64x128xf32>
    %64 = arith.addf %55, %63 : vector<64x128xf32>
    %c2_i32_53 = arith.constant 2 : i32
    %65 = arith.addi %0, %c2_i32_53 : i32
    %c0_54 = arith.constant 0 : index
    %c0_55 = arith.constant 0 : index
    %66 = arith.index_cast %65 : i32 to index
    %c1_56 = arith.constant 1 : index
    %c0_57 = arith.constant 0 : index
    %67 = vector.load %arg2[%c0_54, %c0_55, %66, %c1_56, %c0_57] : memref<1x1x10x10x128xbf16, #tpu.memory_space<vmem>>, vector<1x1x8x8x128xbf16>
    %68 = vector.shape_cast %67 : vector<1x1x8x8x128xbf16> to vector<8x8x128xbf16>
    %69 = vector.shape_cast %68 : vector<8x8x128xbf16> to vector<64x128xbf16>
    %c7 = arith.constant 7 : index
    %c0_58 = arith.constant 0 : index
    %c0_59 = arith.constant 0 : index
    %70 = vector.load %arg3[%c7, %c0_58, %c0_59] : memref<9x128x128xbf16, #tpu.memory_space<vmem>>, vector<1x128x128xbf16>
    %71 = vector.shape_cast %70 : vector<1x128x128xbf16> to vector<128x128xbf16>
    %cst_60 = arith.constant dense<0.000000e+00> : vector<64x128xf32>
    %72 = tpu.matmul %69, %71, %cst_60 {dimension_numbers = #tpu.dot_dimension_numbers<[1], [0], [0], [1], [0, 0, 1, 1], [], []>} : vector<64x128xbf16>, vector<128x128xbf16>, vector<64x128xf32> -> vector<64x128xf32>
    %73 = arith.addf %64, %72 : vector<64x128xf32>
    %c2_i32_61 = arith.constant 2 : i32
    %74 = arith.addi %0, %c2_i32_61 : i32
    %c0_62 = arith.constant 0 : index
    %c0_63 = arith.constant 0 : index
    %75 = arith.index_cast %74 : i32 to index
    %c2_64 = arith.constant 2 : index
    %c0_65 = arith.constant 0 : index
    %76 = vector.load %arg2[%c0_62, %c0_63, %75, %c2_64, %c0_65] : memref<1x1x10x10x128xbf16, #tpu.memory_space<vmem>>, vector<1x1x8x8x128xbf16>
    %77 = vector.shape_cast %76 : vector<1x1x8x8x128xbf16> to vector<8x8x128xbf16>
    %78 = vector.shape_cast %77 : vector<8x8x128xbf16> to vector<64x128xbf16>
    %c8 = arith.constant 8 : index
    %c0_66 = arith.constant 0 : index
    %c0_67 = arith.constant 0 : index
    %79 = vector.load %arg3[%c8, %c0_66, %c0_67] : memref<9x128x128xbf16, #tpu.memory_space<vmem>>, vector<1x128x128xbf16>
    %80 = vector.shape_cast %79 : vector<1x128x128xbf16> to vector<128x128xbf16>
    %cst_68 = arith.constant dense<0.000000e+00> : vector<64x128xf32>
    %81 = tpu.matmul %78, %80, %cst_68 {dimension_numbers = #tpu.dot_dimension_numbers<[1], [0], [0], [1], [0, 0, 1, 1], [], []>} : vector<64x128xbf16>, vector<128x128xbf16>, vector<64x128xf32> -> vector<64x128xf32>
    %82 = arith.addf %73, %81 : vector<64x128xf32>
    %83 = vector.shape_cast %82 : vector<64x128xf32> to vector<1x8x8x128xf32>
    %c0_69 = arith.constant 0 : index
    %c0_70 = arith.constant 0 : index
    %c0_71 = arith.constant 0 : index
    %c0_72 = arith.constant 0 : index
    %84 = vector.load %arg4[%c0_69, %c0_70, %c0_71, %c0_72] : memref<1x8x8x128xf32, #tpu.memory_space<vmem>>, vector<1x8x8x128xf32>
    tpu.vector_store %arg4[%c0_69, %c0_70, %c0_71, %c0_72], %83 {strides = array<i32>} : memref<1x8x8x128xf32, #tpu.memory_space<vmem>>, vector<1x8x8x128xf32>,
    %cst_73 = arith.constant dense<0.000000e+00> : vector<128xf32>
    %85 = vector.multi_reduction <add>, %82, %cst_73 [0] : vector<64x128xf32> to vector<128xf32>
    %86 = vector.shape_cast %85 : vector<128xf32> to vector<1x128xf32>
    %87 = arith.mulf %82, %82 : vector<64x128xf32>
    %cst_74 = arith.constant dense<0.000000e+00> : vector<128xf32>
    %88 = vector.multi_reduction <add>, %87, %cst_74 [0] : vector<64x128xf32> to vector<128xf32>
    %89 = vector.shape_cast %88 : vector<128xf32> to vector<1x128xf32>
    %90 = tpu.iota {dimensions = array<i32: 0>} : vector<8x128xi32>
    %cst_75 = arith.constant 0.000000e+00 : f32
    %91 = vector.broadcast %cst_75 : f32 to vector<8x128xf32>
    %c0_i32_76 = arith.constant 0 : i32
    %92 = vector.broadcast %c0_i32_76 : i32 to vector<8x128xi32>
    %93 = arith.cmpi eq, %90, %92 : vector<8x128xi32>
    %94 = vector.shape_cast %86 : vector<1x128xf32> to vector<1x128xf32>
    %95 = vector.broadcast %94 : vector<1x128xf32> to vector<8x128xf32>
    %c1_i32_77 = arith.constant 1 : i32
    %96 = vector.broadcast %c1_i32_77 : i32 to vector<8x128xi32>
    %97 = arith.cmpi eq, %90, %96 : vector<8x128xi32>
    %98 = vector.shape_cast %89 : vector<1x128xf32> to vector<1x128xf32>
    %99 = vector.broadcast %98 : vector<1x128xf32> to vector<8x128xf32>
    %100 = arith.select %97, %99, %91 : vector<8x128xi1>, vector<8x128xf32>
    %101 = arith.select %93, %95, %100 : vector<8x128xi1>, vector<8x128xf32>
    %c0_78 = arith.constant 0 : index
    %c0_79 = arith.constant 0 : index
    %c0_80 = arith.constant 0 : index
    %c0_81 = arith.constant 0 : index
    %102 = vector.load %arg5[%c0_78, %c0_79, %c0_80, %c0_81] : memref<1x1x8x128xf32, #tpu.memory_space<vmem>>, vector<1x1x8x128xf32>
    %103 = vector.shape_cast %102 : vector<1x1x8x128xf32> to vector<8x128xf32>
    %104 = vector.shape_cast %101 : vector<8x128xf32> to vector<1x1x8x128xf32>
    tpu.vector_store %arg5[%c0_78, %c0_79, %c0_80, %c0_81], %104 {strides = array<i32>} : memref<1x1x8x128xf32, #tpu.memory_space<vmem>>, vector<1x1x8x128xf32>,
    return
  }
  func.func @transform_0(%arg0: i32, %arg1: i32) -> (i32, i32, i32, i32, i32) {
    %c0_i32 = arith.constant 0 : i32
    %c0_i32_0 = arith.constant 0 : i32
    %c0_i32_1 = arith.constant 0 : i32
    %c0_i32_2 = arith.constant 0 : i32
    %c0_i32_3 = arith.constant 0 : i32
    return %arg0, %c0_i32, %c0_i32_0, %c0_i32_1, %c0_i32_2 : i32, i32, i32, i32, i32
  }
  func.func @transform_1(%arg0: i32, %arg1: i32) -> (i32, i32, i32) {
    %c0_i32 = arith.constant 0 : i32
    %c0_i32_0 = arith.constant 0 : i32
    %c0_i32_1 = arith.constant 0 : i32
    %c0_i32_2 = arith.constant 0 : i32
    return %c0_i32, %c0_i32_0, %c0_i32_1 : i32, i32, i32
  }
  func.func @transform_2(%arg0: i32, %arg1: i32) -> (i32, i32, i32, i32) {
    %c0_i32 = arith.constant 0 : i32
    %c0_i32_0 = arith.constant 0 : i32
    %c0_i32_1 = arith.constant 0 : i32
    return %arg0, %arg1, %c0_i32, %c0_i32_0 : i32, i32, i32, i32
  }
  func.func @transform_3(%arg0: i32, %arg1: i32) -> (i32, i32, i32, i32) {
    %c0_i32 = arith.constant 0 : i32
    %c0_i32_0 = arith.constant 0 : i32
    %c0_i32_1 = arith.constant 0 : i32
    return %arg0, %arg1, %c0_i32, %c0_i32_0 : i32, i32, i32, i32
  }
}

module attributes {stable_mosaic.version = 11 : i64} {
  func.func @_conv1x1_kernel(%arg0: i32, %arg1: memref<1x8x8x128xbf16, #tpu.memory_space<vmem>>, %arg2: memref<128x128xbf16, #tpu.memory_space<vmem>>, %arg3: memref<1x8x8x128xf32, #tpu.memory_space<vmem>>, %arg4: memref<1x8x128xf32, #tpu.memory_space<vmem>>) attributes {dimension_semantics = [#tpu.dimension_semantics<parallel>], iteration_bounds = array<i64: 2>, scalar_prefetch = 0 : i64, scratch_operands = 0 : i64, tpu.core_type = #tpu.core_type<tc>, window_params = [{transform_indices = @transform_0, window_bounds = array<i64: 1, 8, 8, 128>}, {pipeline_mode = #tpu.pipeline_mode<synchronous>, transform_indices = @transform_1, window_bounds = array<i64: 128, 128>}, {transform_indices = @transform_2, window_bounds = array<i64: 1, 8, 8, 128>}, {transform_indices = @transform_3, window_bounds = array<i64: 1, 8, 128>}]} {
    %c0 = arith.constant 0 : index
    %c0_0 = arith.constant 0 : index
    %c0_1 = arith.constant 0 : index
    %c0_2 = arith.constant 0 : index
    %0 = vector.load %arg1[%c0, %c0_0, %c0_1, %c0_2] : memref<1x8x8x128xbf16, #tpu.memory_space<vmem>>, vector<1x8x8x128xbf16>
    %1 = vector.shape_cast %0 : vector<1x8x8x128xbf16> to vector<8x8x128xbf16>
    %2 = vector.shape_cast %1 : vector<8x8x128xbf16> to vector<64x128xbf16>
    %c0_3 = arith.constant 0 : index
    %c0_4 = arith.constant 0 : index
    %3 = vector.load %arg2[%c0_3, %c0_4] : memref<128x128xbf16, #tpu.memory_space<vmem>>, vector<128x128xbf16>
    %cst = arith.constant dense<0.000000e+00> : vector<64x128xf32>
    %4 = tpu.matmul %2, %3, %cst {dimension_numbers = #tpu.dot_dimension_numbers<[1], [0], [0], [1], [0, 0, 1, 1], [], []>} : vector<64x128xbf16>, vector<128x128xbf16>, vector<64x128xf32> -> vector<64x128xf32>
    %5 = vector.shape_cast %4 : vector<64x128xf32> to vector<1x8x8x128xf32>
    %c0_5 = arith.constant 0 : index
    %c0_6 = arith.constant 0 : index
    %c0_7 = arith.constant 0 : index
    %c0_8 = arith.constant 0 : index
    %6 = vector.load %arg3[%c0_5, %c0_6, %c0_7, %c0_8] : memref<1x8x8x128xf32, #tpu.memory_space<vmem>>, vector<1x8x8x128xf32>
    tpu.vector_store %arg3[%c0_5, %c0_6, %c0_7, %c0_8], %5 {strides = array<i32>} : memref<1x8x8x128xf32, #tpu.memory_space<vmem>>, vector<1x8x8x128xf32>,
    %cst_9 = arith.constant dense<0.000000e+00> : vector<128xf32>
    %7 = vector.multi_reduction <add>, %4, %cst_9 [0] : vector<64x128xf32> to vector<128xf32>
    %8 = vector.shape_cast %7 : vector<128xf32> to vector<1x128xf32>
    %9 = arith.mulf %4, %4 : vector<64x128xf32>
    %cst_10 = arith.constant dense<0.000000e+00> : vector<128xf32>
    %10 = vector.multi_reduction <add>, %9, %cst_10 [0] : vector<64x128xf32> to vector<128xf32>
    %11 = vector.shape_cast %10 : vector<128xf32> to vector<1x128xf32>
    %12 = tpu.iota {dimensions = array<i32: 0>} : vector<8x128xi32>
    %cst_11 = arith.constant 0.000000e+00 : f32
    %13 = vector.broadcast %cst_11 : f32 to vector<8x128xf32>
    %c0_i32 = arith.constant 0 : i32
    %14 = vector.broadcast %c0_i32 : i32 to vector<8x128xi32>
    %15 = arith.cmpi eq, %12, %14 : vector<8x128xi32>
    %16 = vector.shape_cast %8 : vector<1x128xf32> to vector<1x128xf32>
    %17 = vector.broadcast %16 : vector<1x128xf32> to vector<8x128xf32>
    %c1_i32 = arith.constant 1 : i32
    %18 = vector.broadcast %c1_i32 : i32 to vector<8x128xi32>
    %19 = arith.cmpi eq, %12, %18 : vector<8x128xi32>
    %20 = vector.shape_cast %11 : vector<1x128xf32> to vector<1x128xf32>
    %21 = vector.broadcast %20 : vector<1x128xf32> to vector<8x128xf32>
    %22 = arith.select %19, %21, %13 : vector<8x128xi1>, vector<8x128xf32>
    %23 = arith.select %15, %17, %22 : vector<8x128xi1>, vector<8x128xf32>
    %c0_12 = arith.constant 0 : index
    %c0_13 = arith.constant 0 : index
    %c0_14 = arith.constant 0 : index
    %24 = vector.load %arg4[%c0_12, %c0_13, %c0_14] : memref<1x8x128xf32, #tpu.memory_space<vmem>>, vector<1x8x128xf32>
    %25 = vector.shape_cast %24 : vector<1x8x128xf32> to vector<8x128xf32>
    %26 = vector.shape_cast %23 : vector<8x128xf32> to vector<1x8x128xf32>
    tpu.vector_store %arg4[%c0_12, %c0_13, %c0_14], %26 {strides = array<i32>} : memref<1x8x128xf32, #tpu.memory_space<vmem>>, vector<1x8x128xf32>,
    return
  }
  func.func @transform_0(%arg0: i32) -> (i32, i32, i32, i32) {
    %c0_i32 = arith.constant 0 : i32
    %c0_i32_0 = arith.constant 0 : i32
    %c0_i32_1 = arith.constant 0 : i32
    %c0_i32_2 = arith.constant 0 : i32
    return %arg0, %c0_i32, %c0_i32_0, %c0_i32_1 : i32, i32, i32, i32
  }
  func.func @transform_1(%arg0: i32) -> (i32, i32) {
    %c0_i32 = arith.constant 0 : i32
    %c0_i32_0 = arith.constant 0 : i32
    %c0_i32_1 = arith.constant 0 : i32
    return %c0_i32, %c0_i32_0 : i32, i32
  }
  func.func @transform_2(%arg0: i32) -> (i32, i32, i32, i32) {
    %c0_i32 = arith.constant 0 : i32
    %c0_i32_0 = arith.constant 0 : i32
    %c0_i32_1 = arith.constant 0 : i32
    %c0_i32_2 = arith.constant 0 : i32
    return %arg0, %c0_i32, %c0_i32_0, %c0_i32_1 : i32, i32, i32, i32
  }
  func.func @transform_3(%arg0: i32) -> (i32, i32, i32) {
    %c0_i32 = arith.constant 0 : i32
    %c0_i32_0 = arith.constant 0 : i32
    %c0_i32_1 = arith.constant 0 : i32
    return %arg0, %c0_i32, %c0_i32_0 : i32, i32, i32
  }
}

module attributes {stable_mosaic.version = 11 : i64} {
  func.func @_bn_add_relu_kernel(%arg0: i32, %arg1: memref<1x8x8x128xf32, #tpu.memory_space<vmem>>, %arg2: memref<1x8x8x128xf32, #tpu.memory_space<vmem>>, %arg3: memref<1x128xf32, #tpu.memory_space<vmem>>, %arg4: memref<1x128xf32, #tpu.memory_space<vmem>>, %arg5: memref<1x128xf32, #tpu.memory_space<vmem>>, %arg6: memref<1x128xf32, #tpu.memory_space<vmem>>, %arg7: memref<1x8x8x128xf32, #tpu.memory_space<vmem>>) attributes {dimension_semantics = [#tpu.dimension_semantics<parallel>], iteration_bounds = array<i64: 2>, scalar_prefetch = 0 : i64, scratch_operands = 0 : i64, tpu.core_type = #tpu.core_type<tc>, window_params = [{transform_indices = @transform_0, window_bounds = array<i64: 1, 8, 8, 128>}, {transform_indices = @transform_1, window_bounds = array<i64: 1, 8, 8, 128>}, {pipeline_mode = #tpu.pipeline_mode<synchronous>, transform_indices = @transform_2, window_bounds = array<i64: 1, 128>}, {pipeline_mode = #tpu.pipeline_mode<synchronous>, transform_indices = @transform_3, window_bounds = array<i64: 1, 128>}, {pipeline_mode = #tpu.pipeline_mode<synchronous>, transform_indices = @transform_4, window_bounds = array<i64: 1, 128>}, {pipeline_mode = #tpu.pipeline_mode<synchronous>, transform_indices = @transform_5, window_bounds = array<i64: 1, 128>}, {transform_indices = @transform_6, window_bounds = array<i64: 1, 8, 8, 128>}]} {
    %c0 = arith.constant 0 : index
    %c0_0 = arith.constant 0 : index
    %c0_1 = arith.constant 0 : index
    %c0_2 = arith.constant 0 : index
    %0 = vector.load %arg1[%c0, %c0_0, %c0_1, %c0_2] : memref<1x8x8x128xf32, #tpu.memory_space<vmem>>, vector<1x8x8x128xf32>
    %c0_3 = arith.constant 0 : index
    %c0_4 = arith.constant 0 : index
    %1 = vector.load %arg3[%c0_3, %c0_4] : memref<1x128xf32, #tpu.memory_space<vmem>>, vector<1x128xf32>
    %2 = vector.shape_cast %1 : vector<1x128xf32> to vector<1x1x1x128xf32>
    %3 = vector.broadcast %2 : vector<1x1x1x128xf32> to vector<1x8x8x128xf32>
    %4 = arith.mulf %0, %3 : vector<1x8x8x128xf32>
    %c0_5 = arith.constant 0 : index
    %c0_6 = arith.constant 0 : index
    %5 = vector.load %arg4[%c0_5, %c0_6] : memref<1x128xf32, #tpu.memory_space<vmem>>, vector<1x128xf32>
    %6 = vector.shape_cast %5 : vector<1x128xf32> to vector<1x1x1x128xf32>
    %7 = vector.broadcast %6 : vector<1x1x1x128xf32> to vector<1x8x8x128xf32>
    %8 = arith.addf %4, %7 : vector<1x8x8x128xf32>
    %c0_7 = arith.constant 0 : index
    %c0_8 = arith.constant 0 : index
    %c0_9 = arith.constant 0 : index
    %c0_10 = arith.constant 0 : index
    %9 = vector.load %arg2[%c0_7, %c0_8, %c0_9, %c0_10] : memref<1x8x8x128xf32, #tpu.memory_space<vmem>>, vector<1x8x8x128xf32>
    %c0_11 = arith.constant 0 : index
    %c0_12 = arith.constant 0 : index
    %10 = vector.load %arg5[%c0_11, %c0_12] : memref<1x128xf32, #tpu.memory_space<vmem>>, vector<1x128xf32>
    %11 = vector.shape_cast %10 : vector<1x128xf32> to vector<1x1x1x128xf32>
    %12 = vector.broadcast %11 : vector<1x1x1x128xf32> to vector<1x8x8x128xf32>
    %13 = arith.mulf %9, %12 : vector<1x8x8x128xf32>
    %14 = arith.addf %8, %13 : vector<1x8x8x128xf32>
    %c0_13 = arith.constant 0 : index
    %c0_14 = arith.constant 0 : index
    %15 = vector.load %arg6[%c0_13, %c0_14] : memref<1x128xf32, #tpu.memory_space<vmem>>, vector<1x128xf32>
    %16 = vector.shape_cast %15 : vector<1x128xf32> to vector<1x1x1x128xf32>
    %17 = vector.broadcast %16 : vector<1x1x1x128xf32> to vector<1x8x8x128xf32>
    %18 = arith.addf %14, %17 : vector<1x8x8x128xf32>
    %cst = arith.constant 0.000000e+00 : f32
    %19 = vector.broadcast %cst : f32 to vector<1x8x8x128xf32>
    %20 = arith.maximumf %18, %19 : vector<1x8x8x128xf32>
    %c0_15 = arith.constant 0 : index
    %c0_16 = arith.constant 0 : index
    %c0_17 = arith.constant 0 : index
    %c0_18 = arith.constant 0 : index
    %21 = vector.load %arg7[%c0_15, %c0_16, %c0_17, %c0_18] : memref<1x8x8x128xf32, #tpu.memory_space<vmem>>, vector<1x8x8x128xf32>
    tpu.vector_store %arg7[%c0_15, %c0_16, %c0_17, %c0_18], %20 {strides = array<i32>} : memref<1x8x8x128xf32, #tpu.memory_space<vmem>>, vector<1x8x8x128xf32>,
    return
  }
  func.func @transform_0(%arg0: i32) -> (i32, i32, i32, i32) {
    %c0_i32 = arith.constant 0 : i32
    %c0_i32_0 = arith.constant 0 : i32
    %c0_i32_1 = arith.constant 0 : i32
    %c0_i32_2 = arith.constant 0 : i32
    return %arg0, %c0_i32, %c0_i32_0, %c0_i32_1 : i32, i32, i32, i32
  }
  func.func @transform_1(%arg0: i32) -> (i32, i32, i32, i32) {
    %c0_i32 = arith.constant 0 : i32
    %c0_i32_0 = arith.constant 0 : i32
    %c0_i32_1 = arith.constant 0 : i32
    %c0_i32_2 = arith.constant 0 : i32
    return %arg0, %c0_i32, %c0_i32_0, %c0_i32_1 : i32, i32, i32, i32
  }
  func.func @transform_2(%arg0: i32) -> (i32, i32) {
    %c0_i32 = arith.constant 0 : i32
    %c0_i32_0 = arith.constant 0 : i32
    %c0_i32_1 = arith.constant 0 : i32
    return %c0_i32, %c0_i32_0 : i32, i32
  }
  func.func @transform_3(%arg0: i32) -> (i32, i32) {
    %c0_i32 = arith.constant 0 : i32
    %c0_i32_0 = arith.constant 0 : i32
    %c0_i32_1 = arith.constant 0 : i32
    return %c0_i32, %c0_i32_0 : i32, i32
  }
  func.func @transform_4(%arg0: i32) -> (i32, i32) {
    %c0_i32 = arith.constant 0 : i32
    %c0_i32_0 = arith.constant 0 : i32
    %c0_i32_1 = arith.constant 0 : i32
    return %c0_i32, %c0_i32_0 : i32, i32
  }
  func.func @transform_5(%arg0: i32) -> (i32, i32) {
    %c0_i32 = arith.constant 0 : i32
    %c0_i32_0 = arith.constant 0 : i32
    %c0_i32_1 = arith.constant 0 : i32
    return %c0_i32, %c0_i32_0 : i32, i32
  }
  func.func @transform_6(%arg0: i32) -> (i32, i32, i32, i32) {
    %c0_i32 = arith.constant 0 : i32
    %c0_i32_0 = arith.constant 0 : i32
    %c0_i32_1 = arith.constant 0 : i32
    %c0_i32_2 = arith.constant 0 : i32
    return %arg0, %c0_i32, %c0_i32_0, %c0_i32_1 : i32, i32, i32, i32
  }
}

</mosaic_0001>

<bundles_post_ra>
// kernel: basic_block.6
= control target key start
LH: loop header
LB: loop body
LE: loop exit
PB: predicated region body
PF: predicated region fallthrough
CT: control target
= control target key end

     0   :  { %s362_s12 = smov 0   ;;  %s389_s0 = inlined_call_operand.vmem [shape: f32[2,8,8,128], index: 0, kind: input, shape index: {}]   ;;  %s390_s1 = inlined_call_operand.vmem [shape: f32[1,128], index: 1, kind: input, shape index: {}]   ;;  %s391_s2 = inlined_call_operand.vmem [shape: f32[1,128], index: 2, kind: input, shape index: {}]   ;;  %s392_s3 = inlined_call_operand.vmem [shape: bf16[2,8,8,128], index: 3, kind: output, shape index: {}]  }
   0x1 LB: > { %s288_s13 = sadd.s32 4294967295, %s340_s12   ;;  %p292_p0 = scmp.ge.s32.totalorder %s340_s12, 1  ;;  %s340_s12 = sphi %s362_s12, %s13_s12  }
   0x2   : > { %p137_p1 = scmp.lt.s32.totalorder %s340_s12, 3 }
   0x4   : > { %p138_p2 = pnand %p292_p0, %p137_p1 }
   0x5   : > { %p161_p3 = scmp.lt.s32.totalorder (!%p138_p2), %s288_s13, 1  ;;  %v297_v0 = vld [vmem:[%s390_s1] ss:$0 sm:$0xff] (!%p138_p2) }
   0x6   : > { %141 = sbr.rel (%p138_p2) target bundleno = 29 (0x1d), region = 32  ;;  %v298_v1 = vld [vmem:[%s391_s2] ss:$0 sm:$0xff] (!%p138_p2) }
   0xd   : > { %s394_s13 = smov (!%p161_p3, %s288_s13), 1 }
   0xe   : > { %s301_s14 = sshll.u32 %s394_s13, 6  ;;  %s302_s22 = sshll.u32 %s394_s13, 5 }
   0xf   : > { %s165_s19 = scalar_lea.vmem %s389_s0, %s301_s14  ;;  %s170_s25 = scalar_lea.vmem %s392_s3, %s302_s22 }
  0x10   : > { %v171_v2 = vld [vmem:[%s165_s19] sm:$0xff]  ;;  %v172_v3 = vld [vmem:[%s165_s19 + $0x8] sm:$0xff]  ;;  %v173_v4 = vld [vmem:[%s165_s19 + $0x10] sm:$0xff] }
  0x11   : > { %v186_v5 = vmul.f32 %v297_v0, %v171_v2  ;;  %v187_v6 = vmul.f32 %v297_v0, %v172_v3  ;;  %v174_v7 = vld [vmem:[%s165_s19 + $0x18] sm:$0xff]  ;;  %v188_v8 = vmul.f32 %v297_v0, %v173_v4  ;;  %v175_v9 = vld [vmem:[%s165_s19 + $0x20] sm:$0xff]  ;;  %v176_v10 = vld [vmem:[%s165_s19 + $0x28] sm:$0xff] }
  0x12   : > { %v189_v11 = vmul.f32 %v297_v0, %v174_v7  ;;  %v190_v12 = vmul.f32 %v297_v0, %v175_v9  ;;  %v191_v13 = vmul.f32 %v297_v0, %v176_v10  ;;  %v177_v14 = vld [vmem:[%s165_s19 + $0x30] sm:$0xff]  ;;  %v178_v15 = vld [vmem:[%s165_s19 + $0x38] sm:$0xff] }
  0x13   : > { %v201_v16 = vadd.f32 %v298_v1, %v186_v5  ;;  %v202_v17 = vadd.f32 %v298_v1, %v187_v6  ;;  %v203_v18 = vadd.f32 %v298_v1, %v188_v8  ;;  %v192_v19 = vmul.f32 %v297_v0, %v177_v14 }
  0x14   : > { %v204_v20 = vadd.f32 %v298_v1, %v189_v11  ;;  %v205_v21 = vadd.f32 %v298_v1, %v190_v12  ;;  %v206_v22 = vadd.f32 %v298_v1, %v191_v13  ;;  %v193_v23 = vmul.f32 %v297_v0, %v178_v15 }
  0x15   : > { %v209_v24 = vmax.f32 %v201_v16, 0.0  ;;  %v210_v25 = vmax.f32 %v202_v17, 0.0  ;;  %v211_v26 = vmax.f32 %v203_v18, 0.0  ;;  %v207_v27 = vadd.f32 %v298_v1, %v192_v19 }
  0x16   : > { %v212_v28 = vmax.f32 %v204_v20, 0.0  ;;  %v213_v29 = vmax.f32 %v205_v21, 0.0  ;;  %v214_v30 = vmax.f32 %v206_v22, 0.0  ;;  %v208_v31 = vadd.f32 %v298_v1, %v193_v23 }
  0x17   : > { %v306_v32 = vpack.c.bf16 %v210_v25, %v209_v24  ;;  %v215_v33 = vmax.f32 %v207_v27, 0.0 }
  0x18   : > { %v311_v34 = vpack.c.bf16 %v212_v28, %v211_v26  ;;  %v316_v35 = vpack.c.bf16 %v214_v30, %v213_v29  ;;  %v216_v36 = vmax.f32 %v208_v31, 0.0 }
  0x19   : > { %307 = vst [vmem:[%s170_s25] sm:$0xff] %v306_v32  }
  0x1a   : > { %323 = vst [vmem:[%s170_s25 + $0x8] sm:$0xff] %v311_v34   ;;  %324 = vst [vmem:[%s170_s25 + $0x10] sm:$0xff] %v316_v35   ;;  %v321_v37 = vpack.c.bf16 %v216_v36, %v215_v33 }
  0x1c   : > { %325 = vst [vmem:[%s170_s25 + $0x18] sm:$0xff] %v321_v37  }
  0x1d PF: > { %s13_s12 = sadd.s32 1, %s340_s12  }
  0x1e   : > { %p10_p4 = scmp.ge.s32.totalorder %s13_s12, 4  }
  0x20   :  { %12 = sbr.rel (!%p10_p4) target bundleno = 1 (0x1), region = 62 }

// kernel: basic_block.8
= control target key start
LH: loop header
LB: loop body
LE: loop exit
PB: predicated region body
PF: predicated region fallthrough
CT: control target
= control target key end

     0   :  { %s605_s12 = smov 0   ;;  %s660_s0 = inlined_call_operand.vmem [shape: bf16[2,8,8,128], index: 0, kind: input, shape index: {}]   ;;  %s661_s1 = inlined_call_operand.vmem [shape: bf16[128,128], index: 1, kind: input, shape index: {}]   ;;  %s662_s2 = inlined_call_operand.vmem [shape: f32[2,8,8,128], index: 2, kind: output, shape index: {0}]   ;;  %s663_s3 = inlined_call_operand.vmem [shape: f32[2,8,128], index: 3, kind: output, shape index: {1}]  }
   0x1 LB: > { %s479_s13 = sadd.s32 4294967295, %s583_s12   ;;  %p483_p0 = scmp.ge.s32.totalorder %s583_s12, 1  ;;  %s583_s12 = sphi %s605_s12, %s14_s12  }
   0x2   : > { %p140_p1 = scmp.lt.s32.totalorder %s583_s12, 3 }
   0x4   : > { %p141_p2 = pnand %p483_p0, %p140_p1 }
   0x5   : > { %v565_v0 = vld [vmem:[%s661_s1] sm:$0xff] (!%p141_p2)   ;;  %p168_p3 = scmp.lt.s32.totalorder (!%p141_p2), %s479_s13, 1  ;;  %v566_v1 = vld [vmem:[%s661_s1 + $0x8] sm:$0xff] (!%p141_p2)   ;;  %v567_v2 = vld [vmem:[%s661_s1 + $0x10] sm:$0xff] (!%p141_p2)   ;;  %v386_v45 = vlaneseq (!%p141_p2) }
   0x6   : > { %144 = sbr.rel (%p141_p2) target bundleno = 284 (0x11c), region = 28  ;;  %517 = vmatprep.subr.bf16.mxu0 (!%p141_p2), %v565_v0  ;;  %541 = vmatprep.subr.bf16.mxu1 (!%p141_p2), %v565_v0  ;;  %v568_v3 = vld [vmem:[%s661_s1 + $0x18] sm:$0xff] (!%p141_p2)   ;;  %v569_v6 = vld [vmem:[%s661_s1 + $0x20] sm:$0xff] (!%p141_p2)   ;;  %v570_v7 = vld [vmem:[%s661_s1 + $0x28] sm:$0xff] (!%p141_p2)  }
   0x7   : > { %518 = vmatpush3.bf16.msra.mxu0 (!%p141_p2), %v565_v0  ;;  %549 = vmatpush3.bf16.msra.mxu1 (!%p141_p2), %v565_v0  ;;  %v571_v8 = vld [vmem:[%s661_s1 + $0x30] sm:$0xff] (!%p141_p2)   ;;  %v572_v9 = vld [vmem:[%s661_s1 + $0x38] sm:$0xff] (!%p141_p2)   ;;  %v387_v50 = vshrl.u32 (!%p141_p2), %v386_v45, 7 }
   0x8   : > { %519 = vmatprep.subr.bf16.mxu0 (!%p141_p2), %v566_v1  ;;  %542 = vmatprep.subr.bf16.mxu1 (!%p141_p2), %v566_v1 }
   0x9   : > { %vm389_vm0 = vcmp.eq.s32.totalorder (!%p141_p2), %v387_v50, 1  ;;  %vm388_vm1 = vcmp.eq.s32.totalorder (!%p141_p2), %v387_v50, 0 }
   0xb   : > { %520 = vmatpush3.bf16.msra.mxu0 (!%p141_p2), %v566_v1  ;;  %550 = vmatpush3.bf16.msra.mxu1 (!%p141_p2), %v566_v1 }
   0xc   : > { %521 = vmatprep.subr.bf16.mxu0 (!%p141_p2), %v567_v2  ;;  %543 = vmatprep.subr.bf16.mxu1 (!%p141_p2), %v567_v2 }
   0xd   : > { %s665_s13 = smov (!%p168_p3, %s479_s13), 1 }
   0xe   : > { %s503_s20 = sshll.u32 %s665_s13, 5  ;;  %s504_s7 = sshll.u32 %s665_s13, 6 }
   0xf   : > { %s628_s23 = scalar_lea.vmem %s660_s0, %s503_s20  ;;  %522 = vmatpush3.bf16.msra.mxu0 %v567_v2  ;;  %551 = vmatpush3.bf16.msra.mxu1 %v567_v2  ;;  %s177_s10 = scalar_lea.vmem %s662_s2, %s504_s7 }
  0x10   : > { %v573_v4 = vld [vmem:[%s628_s23] sm:$0xff]   ;;  %v575_v5 = vld [vmem:[%s628_s23 + $0x10] sm:$0xff]   ;;  %523 = vmatprep.subr.bf16.mxu0 %v568_v3  ;;  %544 = vmatprep.subr.bf16.mxu1 %v568_v3  ;;  %v574_v10 = vld [vmem:[%s628_s23 + $0x8] sm:$0xff]   ;;  %s488_s11 = sshll.u32 %s665_s13, 3 }
  0x11   : > { %533 = vmatprep.mubr.bf16.mxu0 %v573_v4  ;;  %537 = vmatprep.mubr.bf16.mxu1 %v575_v5  ;;  %v576_v11 = vld [vmem:[%s628_s23 + $0x18] sm:$0xff]   ;;  %s181_s16 = scalar_lea.vmem %s663_s3, %s488_s11 }
  0x13   : > { %524 = vmatpush3.bf16.msra.mxu0 %v568_v3  ;;  %552 = vmatpush3.bf16.msra.mxu1 %v568_v3 }
  0x14   : > { %525 = vmatprep.subr.bf16.mxu0 %v569_v6  ;;  %545 = vmatprep.subr.bf16.mxu1 %v569_v6 }
  0x17   : > { %526 = vmatpush3.bf16.msra.mxu0 %v569_v6  ;;  %553 = vmatpush3.bf16.msra.mxu1 %v569_v6 }
  0x18   : > { %527 = vmatprep.subr.bf16.mxu0 %v570_v7  ;;  %546 = vmatprep.subr.bf16.mxu1 %v570_v7 }
  0x1b   : > { %528 = vmatpush3.bf16.msra.mxu0 %v570_v7  ;;  %554 = vmatpush3.bf16.msra.mxu1 %v570_v7 }
  0x1c   : > { %529 = vmatprep.subr.bf16.mxu0 %v571_v8  ;;  %547 = vmatprep.subr.bf16.mxu1 %v571_v8 }
  0x1f   : > { %530 = vmatpush3.bf16.msra.mxu0 %v571_v8  ;;  %555 = vmatpush3.bf16.msra.mxu1 %v571_v8 }
  0x20   : > { %531 = vmatprep.subr.bf16.mxu0 %v572_v9  ;;  %548 = vmatprep.subr.bf16.mxu1 %v572_v9 }
  0x23   : > { %532 = vmatpush3.bf16.msra.mxu0 %v572_v9  ;;  %556 = vmatpush3.bf16.msra.mxu1 %v572_v9 }
  0x26   : > { %534 = vmatmul.mubr.bf16.vlgmr.msra.gmra.mrb[0].mxu0 %v574_v10  ;;  %538 = vmatmul.mubr.bf16.vlgmr.msra.gmra.mrb[0].mxu1 %v576_v11 }
  0xf9   : > { %v535_v12 = vpop.f32.mrb[0].mxu0  ;;  %v539_v13 = vpop.f32.mrb[0].mxu1 }
  0xfa   : > { %346 = vst [vmem:[%s177_s10 + $0x10] sm:$0xff] %v535_v12  ;;  %v313_v14 = vpop.f32.mrb[1].mxu0  ;;  %350 = vst [vmem:[%s177_s10 + $0x30] sm:$0xff] %v539_v13  ;;  %v329_v15 = vpop.f32.mrb[1].mxu1  ;;  %v367_v23 = vmul.f32 %v535_v12, %v535_v12  ;;  %v371_v35 = vmul.f32 %v539_v13, %v539_v13 }
  0xfb   : > { %344 = vst [vmem:[%s177_s10] sm:$0xff] %v313_v14  ;;  %v536_v16 = vpop.f32.mrb[2].mxu0  ;;  %348 = vst [vmem:[%s177_s10 + $0x20] sm:$0xff] %v329_v15  ;;  %v540_v17 = vpop.f32.mrb[2].mxu1  ;;  %v365_v20 = vmul.f32 %v313_v14, %v313_v14  ;;  %v369_v29 = vmul.f32 %v329_v15, %v329_v15 }
  0xfc   : > { %347 = vst [vmem:[%s177_s10 + $0x18] sm:$0xff] %v536_v16  ;;  %v316_v18 = vpop.f32.mrb[3].mxu0  ;;  %351 = vst [vmem:[%s177_s10 + $0x38] sm:$0xff] %v540_v17  ;;  %v332_v19 = vpop.f32.mrb[3].mxu1  ;;  %v368_v26 = vmul.f32 %v536_v16, %v536_v16  ;;  %v372_v38 = vmul.f32 %v540_v17, %v540_v17 }
  0xfd   : > { %345 = vst [vmem:[%s177_s10 + $0x8] sm:$0xff] %v316_v18  ;;  %v352_v21 = vadd.f32 %v316_v18, %v313_v14  ;;  %v366_v22 = vmul.f32 %v316_v18, %v316_v18  ;;  %349 = vst [vmem:[%s177_s10 + $0x28] sm:$0xff] %v332_v19  ;;  %v370_v34 = vmul.f32 %v332_v19, %v332_v19 }
  0xff   : > { %v353_v24 = vadd.f32 %v535_v12, %v352_v21  ;;  %v373_v25 = vadd.f32 %v366_v22, %v365_v20 }
 0x101   : > { %v374_v27 = vadd.f32 %v373_v25, %v367_v23  ;;  %v354_v28 = vadd.f32 %v536_v16, %v353_v24 }
 0x103   : > { %v355_v30 = vadd.f32 %v354_v28, %v329_v15  ;;  %v375_v31 = vadd.f32 %v374_v27, %v368_v26 }
 0x105   : > { %v376_v32 = vadd.f32 %v375_v31, %v369_v29  ;;  %v356_v33 = vadd.f32 %v355_v30, %v332_v19 }
 0x107   : > { %v357_v36 = vadd.f32 %v539_v13, %v356_v33  ;;  %v377_v37 = vadd.f32 %v376_v32, %v370_v34 }
 0x109   : > { %v358_v39 = vadd.f32 %v540_v17, %v357_v36  ;;  %v378_v40 = vadd.f32 %v377_v37, %v371_v35 }
 0x10b   : > { %v359_v41 = vrot.slane %v358_v39, 4  ;;  %v379_v42 = vadd.f32 %v378_v40, %v372_v38 }
 0x10d   : > { %v360_v43 = vadd.f32 %v359_v41, %v358_v39  ;;  %v380_v44 = vrot.slane %v379_v42, 4 }
 0x10f   : > { %v361_v46 = vrot.slane %v360_v43, 2  ;;  %v381_v47 = vadd.f32 %v380_v44, %v379_v42 }
 0x111   : > { %v362_v48 = vadd.f32 %v361_v46, %v360_v43  ;;  %v382_v49 = vrot.slane %v381_v47, 2 }
 0x113   : > { %v383_v51 = vadd.f32 %v382_v49, %v381_v47  ;;  %v363_v52 = vrot.slane %v362_v48, 1 }
 0x115   : > { %v384_v53 = vrot.slane %v383_v51, 1  ;;  %v364_v55 = vadd.f32 %v363_v52, %v362_v48 }
 0x117   : > { %v385_v54 = vadd.f32 %v384_v53, %v383_v51 }
 0x119   : > { %v390_v56 = vsel %vm389_vm0, %v385_v54, 0.0 }
 0x11a   : > { %v391_v57 = vsel %vm388_vm1, %v364_v55, %v390_v56 }
 0x11b   : > { %392 = vst [vmem:[%s181_s16] sm:$0xff] %v391_v57 }
 0x11c PF: > { %s14_s12 = sadd.s32 1, %s583_s12  }
 0x11d   : > { %p11_p4 = scmp.ge.s32.totalorder %s14_s12, 4  }
 0x11f   :  { %13 = sbr.rel (!%p11_p4) target bundleno = 1 (0x1), region = 70 }

// kernel: basic_block.9
= control target key start
LH: loop header
LB: loop body
LE: loop exit
PB: predicated region body
PF: predicated region fallthrough
CT: control target
= control target key end

     0   :  { %s510_s21 = smov 0   ;;  %s587_s0 = inlined_call_operand.vmem [shape: f32[2,8,8,128], index: 0, kind: input, shape index: {}]   ;;  %s588_s1 = inlined_call_operand.vmem [shape: f32[2,8,8,128], index: 1, kind: input, shape index: {}]   ;;  %s589_s2 = inlined_call_operand.vmem [shape: f32[1,128], index: 2, kind: input, shape index: {}]   ;;  %s590_s3 = inlined_call_operand.vmem [shape: f32[1,128], index: 3, kind: input, shape index: {}]   ;;  %s591_s4 = inlined_call_operand.vmem [shape: f32[1,128], index: 4, kind: input, shape index: {}]   ;;  %s592_s5 = inlined_call_operand.vmem [shape: f32[1,128], index: 5, kind: input, shape index: {}]   ;;  %s593_s6 = inlined_call_operand.vmem [shape: f32[2,8,8,128], index: 6, kind: output, shape index: {}]  }
   0x1 LB: > { %s439_s22 = sadd.s32 4294967295, %s473_s21   ;;  %p443_p0 = scmp.ge.s32.totalorder %s473_s21, 1  ;;  %s473_s21 = sphi %s510_s21, %s16_s21  }
   0x2   : > { %p222_p1 = scmp.lt.s32.totalorder %s473_s21, 3 }
   0x4   : > { %p223_p2 = pnand %p443_p0, %p222_p1 }
   0x5   : > { %p257_p3 = scmp.lt.s32.totalorder (!%p223_p2), %s439_s22, 1  ;;  %v450_v0 = vld [vmem:[%s589_s2] ss:$0 sm:$0xff] (!%p223_p2) }
   0x6   : > { %226 = sbr.rel (%p223_p2) target bundleno = 36 (0x24), region = 44  ;;  %v526_v1 = vld [vmem:[%s591_s4] ss:$0 sm:$0xff] (!%p223_p2) }
   0x7   : > { %v451_v2 = vld [vmem:[%s590_s3] ss:$0 sm:$0xff] (!%p223_p2) }
   0x8   : > { %v453_v25 = vld [vmem:[%s592_s5] ss:$0 sm:$0xff] (!%p223_p2) }
   0xd   : > { %s595_s22 = smov (!%p257_p3, %s439_s22), 1 }
   0xe   : > { %s518_s23 = sshll.u32 %s595_s22, 6 }
   0xf   : > { %s532_s30 = scalar_lea.vmem %s587_s0, %s518_s23  ;;  %s538_s9 = scalar_lea.vmem %s588_s1, %s518_s23 }
  0x10   : > { %v272_v3 = vld [vmem:[%s532_s30] sm:$0xff]  ;;  %v273_v5 = vld [vmem:[%s532_s30 + $0x8] sm:$0xff]  ;;  %v274_v10 = vld [vmem:[%s532_s30 + $0x10] sm:$0xff]  ;;  %s572_s16 = scalar_lea.vmem %s593_s6, %s518_s23 }
  0x11   : > { %v310_v4 = vld [vmem:[%s538_s9] sm:$0xff]  ;;  %v287_v6 = vmul.f32 %v450_v0, %v272_v3  ;;  %v288_v8 = vmul.f32 %v450_v0, %v273_v5  ;;  %v311_v9 = vld [vmem:[%s538_s9 + $0x8] sm:$0xff]  ;;  %v312_v11 = vld [vmem:[%s538_s9 + $0x10] sm:$0xff]  ;;  %v289_v13 = vmul.f32 %v450_v0, %v274_v10 }
  0x12   : > { %v325_v7 = vmul.f32 %v526_v1, %v310_v4  ;;  %v326_v12 = vmul.f32 %v526_v1, %v311_v9  ;;  %v327_v14 = vmul.f32 %v526_v1, %v312_v11  ;;  %v275_v15 = vld [vmem:[%s532_s30 + $0x18] sm:$0xff]  ;;  %v276_v17 = vld [vmem:[%s532_s30 + $0x20] sm:$0xff]  ;;  %v277_v23 = vld [vmem:[%s532_s30 + $0x28] sm:$0xff] }
  0x13   : > { %v313_v16 = vld [vmem:[%s538_s9 + $0x18] sm:$0xff]  ;;  %v302_v18 = vadd.f32 %v451_v2, %v287_v6  ;;  %v303_v19 = vadd.f32 %v451_v2, %v288_v8  ;;  %v290_v20 = vmul.f32 %v450_v0, %v275_v15  ;;  %v314_v22 = vld [vmem:[%s538_s9 + $0x20] sm:$0xff]  ;;  %v315_v24 = vld [vmem:[%s538_s9 + $0x28] sm:$0xff]  ;;  %v304_v26 = vadd.f32 %v451_v2, %v289_v13 }
  0x14   : > { %v328_v21 = vmul.f32 %v526_v1, %v313_v16  ;;  %v291_v27 = vmul.f32 %v450_v0, %v276_v17  ;;  %v329_v28 = vmul.f32 %v526_v1, %v314_v22  ;;  %v292_v29 = vmul.f32 %v450_v0, %v277_v23  ;;  %v278_v30 = vld [vmem:[%s532_s30 + $0x30] sm:$0xff]  ;;  %v279_v40 = vld [vmem:[%s532_s30 + $0x38] sm:$0xff] }
  0x15   : > { %v316_v31 = vld [vmem:[%s538_s9 + $0x30] sm:$0xff]  ;;  %v333_v32 = vadd.f32 %v325_v7, %v302_v18  ;;  %v334_v33 = vadd.f32 %v326_v12, %v303_v19  ;;  %v305_v34 = vadd.f32 %v451_v2, %v290_v20  ;;  %v330_v35 = vmul.f32 %v526_v1, %v315_v24  ;;  %v317_v49 = vld [vmem:[%s538_s9 + $0x38] sm:$0xff] }
  0x16   : > { %v335_v36 = vadd.f32 %v327_v14, %v304_v26  ;;  %v306_v37 = vadd.f32 %v451_v2, %v291_v27  ;;  %v307_v38 = vadd.f32 %v451_v2, %v292_v29  ;;  %v293_v39 = vmul.f32 %v450_v0, %v278_v30 }
  0x17   : > { %v348_v41 = vadd.f32 %v453_v25, %v333_v32  ;;  %v349_v42 = vadd.f32 %v453_v25, %v334_v33  ;;  %v336_v43 = vadd.f32 %v328_v21, %v305_v34  ;;  %v331_v44 = vmul.f32 %v526_v1, %v316_v31 }
  0x18   : > { %v350_v45 = vadd.f32 %v453_v25, %v335_v36  ;;  %v337_v46 = vadd.f32 %v329_v28, %v306_v37  ;;  %v338_v47 = vadd.f32 %v330_v35, %v307_v38  ;;  %v308_v48 = vadd.f32 %v451_v2, %v293_v39 }
  0x19   : > { %v356_v50 = vmax.f32 %v348_v41, 0.0  ;;  %v357_v51 = vmax.f32 %v349_v42, 0.0  ;;  %v351_v52 = vadd.f32 %v453_v25, %v336_v43  ;;  %v294_v53 = vmul.f32 %v450_v0, %v279_v40 }
  0x1a   : > { %v358_v54 = vmax.f32 %v350_v45, 0.0  ;;  %v352_v55 = vadd.f32 %v453_v25, %v337_v46  ;;  %v353_v56 = vadd.f32 %v453_v25, %v338_v47  ;;  %v339_v57 = vadd.f32 %v331_v44, %v308_v48 }
  0x1b   : > { %364 = vst [vmem:[%s572_s16] sm:$0xff] %v356_v50  ;;  %365 = vst [vmem:[%s572_s16 + $0x8] sm:$0xff] %v357_v51  ;;  %v359_v58 = vmax.f32 %v351_v52, 0.0  ;;  %v309_v59 = vadd.f32 %v451_v2, %v294_v53  ;;  %v332_v60 = vmul.f32 %v526_v1, %v317_v49 }
  0x1c   : > { %366 = vst [vmem:[%s572_s16 + $0x10] sm:$0xff] %v358_v54  ;;  %v360_v61 = vmax.f32 %v352_v55, 0.0  ;;  %v361_v62 = vmax.f32 %v353_v56, 0.0  ;;  %v354_v63 = vadd.f32 %v453_v25, %v339_v57 }
  0x1d   : > { %367 = vst [vmem:[%s572_s16 + $0x18] sm:$0xff] %v359_v58  ;;  %v340_v0 = vadd.f32 %v332_v60, %v309_v59 }
  0x1e   : > { %368 = vst [vmem:[%s572_s16 + $0x20] sm:$0xff] %v360_v61  ;;  %369 = vst [vmem:[%s572_s16 + $0x28] sm:$0xff] %v361_v62  ;;  %v362_v3 = vmax.f32 %v354_v63, 0.0 }
  0x1f   : > { %v355_v4 = vadd.f32 %v453_v25, %v340_v0 }
  0x20   : > { %370 = vst [vmem:[%s572_s16 + $0x30] sm:$0xff] %v362_v3 }
  0x21   : > { %v363_v5 = vmax.f32 %v355_v4, 0.0 }
  0x23   : > { %371 = vst [vmem:[%s572_s16 + $0x38] sm:$0xff] %v363_v5 }
  0x24 PF: > { %s16_s21 = sadd.s32 1, %s473_s21  }
  0x25   : > { %p13_p4 = scmp.ge.s32.totalorder %s16_s21, 4  }
  0x27   :  { %15 = sbr.rel (!%p13_p4) target bundleno = 1 (0x1), region = 77 }

// kernel: basic_block.5
= control target key start
LH: loop header
LB: loop body
LE: loop exit
PB: predicated region body
PF: predicated region fallthrough
CT: control target
= control target key end

     0   :  { %s3169_s12 = smov 0   ;;  %s3171_s13 = smov 0   ;;  %s3554_s0 = inlined_call_operand.vmem [shape: bf16[2,4,9,9,128], index: 0, kind: input, shape index: {}]   ;;  %s3555_s1 = inlined_call_operand.vmem [shape: bf16[9,128,128], index: 1, kind: input, shape index: {}]   ;;  %s3556_s2 = inlined_call_operand.vmem [shape: f32[2,8,8,128], index: 2, kind: output, shape index: {0}]   ;;  %s3557_s3 = inlined_call_operand.vmem [shape: f32[2,1,8,128], index: 3, kind: output, shape index: {1}]  }
   0x1   :  { %s3173_s14 = smov 0  }
   0x2 LB: > { %s26_s15 = sadd.s32 1, %s3143_s13  ;;  %p2284_p0 = scmp.ge.s32.totalorder %s3147_s14, 1  ;;  %s3147_s14 = sphi %s3173_s14, %s14_s14   ;;  %s3143_s13 = sphi %s3171_s13, %s3561_s13   ;;  %s3139_s12 = sphi %s3169_s12, %s3560_s12  }
   0x3   : > { %p28_p1 = scmp.ge.s32.totalorder %s26_s15, 2  ;;  %p156_p2 = scmp.lt.s32.totalorder %s3147_s14, 3 }
   0x5   : > { %s3563_s15 = smov (%p28_p1, %s26_s15), 0  ;;  %p157_p3 = pnand %p2284_p0, %p156_p2 }
   0x6   : > { %v3029_v0 = vld [vmem:[%s3555_s1 + $0x40] sm:$0xff] (!%p157_p3)   ;;  %p191_p4 = scmp.lt.s32.totalorder (!%p157_p3), %s3139_s12, 1  ;;  %v3031_v2 = vld [vmem:[%s3555_s1 + $0x48] sm:$0xff] (!%p157_p3)   ;;  %v3033_v4 = vld [vmem:[%s3555_s1 + $0x50] sm:$0xff] (!%p157_p3)   ;;  %vm560_vm0 = vsmask.f32 (!%p157_p3), 3328 }
   0x7   : > { %160 = sbr.rel (%p157_p3) target bundleno = 416 (0x1a0), region = 28  ;;  %v3030_v1 = vld [vmem:[%s3555_s1 + $0x100] sm:$0xff] (!%p157_p3)   ;;  %2708 = vmatprep.subr.bf16.mxu1 (!%p157_p3), %v3029_v0  ;;  %v3032_v3 = vld [vmem:[%s3555_s1 + $0x108] sm:$0xff] (!%p157_p3)   ;;  %v3034_v5 = vld [vmem:[%s3555_s1 + $0x110] sm:$0xff] (!%p157_p3)   ;;  %vm561_vm1 = vsmask.f32 (!%p157_p3), 7440 }
   0x8   : > { %2804 = vmatprep.subr.bf16.mxu0 (!%p157_p3), %v3030_v1  ;;  %2709 = vmatpush3.bf16.msra.mxu1 (!%p157_p3), %v3029_v0  ;;  %v3035_v6 = vld [vmem:[%s3555_s1 + $0x58] sm:$0xff] (!%p157_p3)   ;;  %v3037_v8 = vld [vmem:[%s3555_s1 + $0x60] sm:$0xff] (!%p157_p3)   ;;  %v3039_v10 = vld [vmem:[%s3555_s1 + $0x68] sm:$0xff] (!%p157_p3)  }
   0x9   : > { %2805 = vmatpush3.bf16.msra.mxu0 (!%p157_p3), %v3030_v1  ;;  %2710 = vmatprep.subr.bf16.mxu1 (!%p157_p3), %v3031_v2  ;;  %v3036_v7 = vld [vmem:[%s3555_s1 + $0x118] sm:$0xff] (!%p157_p3)   ;;  %v3038_v9 = vld [vmem:[%s3555_s1 + $0x120] sm:$0xff] (!%p157_p3)   ;;  %v3040_v12 = vld [vmem:[%s3555_s1 + $0x128] sm:$0xff] (!%p157_p3)  }
   0xa   : > { %2806 = vmatprep.subr.bf16.mxu0 (!%p157_p3), %v3032_v3  ;;  %v3041_v14 = vld [vmem:[%s3555_s1 + $0x70] sm:$0xff] (!%p157_p3)   ;;  %v3043_v16 = vld [vmem:[%s3555_s1 + $0x78] sm:$0xff] (!%p157_p3)   ;;  %v3046_v18 = vld [vmem:[%s3555_s1] sm:$0xff] (!%p157_p3)  }
   0xb   : > { %v3042_v15 = vld [vmem:[%s3555_s1 + $0x130] sm:$0xff] (!%p157_p3)   ;;  %v3044_v17 = vld [vmem:[%s3555_s1 + $0x138] sm:$0xff] (!%p157_p3)   ;;  %v3048_v19 = vld [vmem:[%s3555_s1 + $0x140] sm:$0xff] (!%p157_p3)  }
   0xc   : > { %2711 = vmatpush3.bf16.msra.mxu1 (!%p157_p3), %v3031_v2  ;;  %v3051_v22 = vld [vmem:[%s3555_s1 + $0x8] sm:$0xff] (!%p157_p3)   ;;  %v3053_v26 = vld [vmem:[%s3555_s1 + $0x10] sm:$0xff] (!%p157_p3)   ;;  %v3055_v28 = vld [vmem:[%s3555_s1 + $0x18] sm:$0xff] (!%p157_p3)  }
   0xd   : > { %2807 = vmatpush3.bf16.msra.mxu0 (!%p157_p3), %v3032_v3  ;;  %2712 = vmatprep.subr.bf16.mxu1 (!%p157_p3), %v3033_v4  ;;  %v3052_v23 = vld [vmem:[%s3555_s1 + $0x148] sm:$0xff] (!%p157_p3)   ;;  %v3054_v27 = vld [vmem:[%s3555_s1 + $0x150] sm:$0xff] (!%p157_p3)   ;;  %v3056_v31 = vld [vmem:[%s3555_s1 + $0x158] sm:$0xff] (!%p157_p3)  }
   0xe   : > { %s3565_s12 = smov (!%p191_p4, %s3139_s12), 1  ;;  %2808 = vmatprep.subr.bf16.mxu0 %v3034_v5  ;;  %v3057_v38 = vld [vmem:[%s3555_s1 + $0x20] sm:$0xff]   ;;  %v3059_v47 = vld [vmem:[%s3555_s1 + $0x28] sm:$0xff]   ;;  %vm3294_vm2 = vmor %vm560_vm0, %vm561_vm1 }
   0xf   : > { %s3004_s5 = smul.u32 288, %s3565_s12  ;;  %v3058_v43 = vld [vmem:[%s3555_s1 + $0x160] sm:$0xff]   ;;  %v3060_v50 = vld [vmem:[%s3555_s1 + $0x168] sm:$0xff]   ;;  %v3062_v2 = vld [vmem:[%s3555_s1 + $0x30] sm:$0xff]   ;;  %s2599_s30 = sshll.u32 %s3565_s12, 6 }
  0x10   : > { %2713 = vmatpush3.bf16.msra.mxu1 %v3033_v4  ;;  %s204_s6 = scalar_lea.vmem %s3556_s2, %s2599_s30  ;;  %s2288_s7 = sshll.u32 %s3565_s12, 3 }
  0x11   : > { %2809 = vmatpush3.bf16.msra.mxu0 %v3034_v5  ;;  %2714 = vmatprep.subr.bf16.mxu1 %v3035_v6  ;;  %s3223_s16 = scalar_lea.vmem %s3554_s0, %s3004_s5  ;;  %s212_s10 = scalar_lea.vmem %s3557_s3, %s2288_s7 }
  0x12   : > { %2810 = vmatprep.subr.bf16.mxu0 %v3036_v7  ;;  %v3045_v11 = vld [vmem:[%s3223_s16 + $0x48] ss:$8 sps:$4 sm:$0xff]   ;;  %v3047_v13 = vld [vmem:[%s3223_s16 + $0xd8] ss:$8 sps:$4 sm:$0xff]   ;;  %v2438_v34 = vld [vmem:[%s3223_s16 + $0x94] sm:$0x1] }
  0x13   : > { %2724 = vmatprep.mubr.bf16.mxu1 %v3045_v11  ;;  %2820 = vmatprep.mubr.bf16.mxu0 %v3047_v13  ;;  %v3049_v20 = vld [vmem:[%s3223_s16 + $0x58] ss:$8 sps:$4 sm:$0xff]   ;;  %v3050_v21 = vld [vmem:[%s3223_s16 + $0xe8] ss:$8 sps:$4 sm:$0xff]   ;;  %v2440_v39 = vld [vmem:[%s3223_s16 + $0x9c] sm:$0x1] }
  0x14   : > { %2715 = vmatpush3.bf16.msra.mxu1 %v3035_v6  ;;  %v3061_v24 = vld [vmem:[%s3223_s16 + $0x68] ss:$8 sps:$4 sm:$0xff]   ;;  %v3063_v25 = vld [vmem:[%s3223_s16 + $0xf8] ss:$8 sps:$4 sm:$0xff]   ;;  %v1201_v40 = vshll.u32 %v2438_v34, 16  ;;  %v1215_v46 = vshll.u32 %v2440_v39, 16 }
  0x15   : > { %2811 = vmatpush3.bf16.msra.mxu0 %v3036_v7  ;;  %2716 = vmatprep.subr.bf16.mxu1 %v3037_v8  ;;  %v3065_v29 = vld [vmem:[%s3223_s16 + $0x78] ss:$8 sps:$4 sm:$0xff]   ;;  %v3066_v30 = vld [vmem:[%s3223_s16 + $0x108] ss:$8 sps:$4 sm:$0xff]   ;;  %v2442_v57 = vld [vmem:[%s3223_s16 + $0xa4] sm:$0x1] }
  0x16   : > { %2812 = vmatprep.subr.bf16.mxu0 %v3038_v9  ;;  %v3069_v32 = vld [vmem:[%s3223_s16] ss:$8 sps:$4 sm:$0xff]   ;;  %v2437_v33 = vld [vmem:[%s3223_s16 + $0x90] sm:$0xf]  ;;  %v2439_v35 = vld [vmem:[%s3223_s16 + $0x98] sm:$0xf] }
  0x17   : > { %v1192_v36 = vshrl.u32 %v2437_v33, 16  ;;  %v1195_v37 = vshll.u32 %v2437_v33, 16  ;;  %v1206_v41 = vshrl.u32 %v2439_v35, 16  ;;  %v1209_v42 = vshll.u32 %v2439_v35, 16  ;;  %v2441_v56 = vld [vmem:[%s3223_s16 + $0xa0] sm:$0xf] }
  0x18   : > { %2717 = vmatpush3.bf16.msra.mxu1 %v3037_v8  ;;  %v1203_v52 = vrot.slane %v1201_v40, 5  ;;  %v1217_v55 = vrot.slane %v1215_v46, 5  ;;  %v2443_v59 = vld [vmem:[%s3223_s16 + $0xa8] sm:$0xf]  ;;  %v2444_v60 = vld [vmem:[%s3223_s16 + $0xac] sm:$0x1] }
  0x19   : > { %2813 = vmatpush3.bf16.msra.mxu0 %v3038_v9  ;;  %2718 = vmatprep.subr.bf16.mxu1 %v3039_v10  ;;  %v1194_v44 = vrot.slane %v1192_v36, 4  ;;  %v1197_v45 = vrot.slane %v1195_v37, 5  ;;  %v1208_v48 = vrot.slane %v1206_v41, 4  ;;  %v1211_v49 = vrot.slane %v1209_v42, 5  ;;  %v3064_v6 = vld [vmem:[%s3555_s1 + $0x170] sm:$0xff]  }
  0x1a   : > { %2814 = vmatprep.subr.bf16.mxu0 %v3040_v12  ;;  %v1220_v61 = vshrl.u32 %v2441_v56, 16  ;;  %v1223_v63 = vshll.u32 %v2441_v56, 16  ;;  %v1229_v0 = vshll.u32 %v2442_v57, 16  ;;  %v1234_v1 = vshrl.u32 %v2443_v59, 16  ;;  %v3083_v37 = vld [vmem:[%s3223_s16 + $0x20] ss:$8 sps:$4 sm:$0xff]  }
  0x1b   : > { %v1198_v51 = vor.u32 %v1197_v45, %v1194_v44  ;;  %v1212_v54 = vor.u32 %v1211_v49, %v1208_v48  ;;  %v1237_v5 = vshll.u32 %v2443_v59, 16  ;;  %v3086_v48 = vld [vmem:[%s3223_s16 + $0x30] ss:$8 sps:$4 sm:$0xff]   ;;  %v2449_v49 = vld [vmem:[%s3223_s16 + $0xc0] sm:$0xf] }
  0x1c   : > { %2719 = vmatpush3.bf16.msra.mxu1 %v3039_v10  ;;  %v1222_v4 = vrot.slane %v1220_v61, 4  ;;  %v1225_v8 = vrot.slane %v1223_v63, 5  ;;  %v1236_v9 = vrot.slane %v1234_v1, 4  ;;  %v1243_v10 = vshll.u32 %v2444_v60, 16  ;;  %v3077_v59 = vld [vmem:[%s3555_s1 + $0x98] sm:$0xff]  }
  0x1d   : > { %2815 = vmatpush3.bf16.msra.mxu0 %v3040_v12  ;;  %2720 = vmatprep.subr.bf16.mxu1 %v3041_v14  ;;  %v1199_v58 = vrot.slane %v1198_v51, 4  ;;  %v1213_v62 = vrot.slane %v1212_v54, 4  ;;  %v1231_v12 = vrot.slane %v1229_v0, 5  ;;  %v1239_v13 = vrot.slane %v1237_v5, 5  ;;  %v2451_v51 = vld [vmem:[%s3223_s16 + $0xc8] sm:$0xf] }
  0x1e   : > { %2816 = vmatprep.subr.bf16.mxu0 %v3042_v15  ;;  %v1276_v56 = vshrl.u32 %v2449_v49, 16  ;;  %v1279_v57 = vshll.u32 %v2449_v49, 16  ;;  %v1290_v61 = vshrl.u32 %v2451_v51, 16 }
  0x1f   : > { %v1204_v3 = vsel %vm3294_vm2, %v1199_v58, %v1203_v52  ;;  %v1218_v7 = vsel %vm3294_vm2, %v1213_v62, %v1217_v55  ;;  %v3076_v52 = vld [vmem:[%s3555_s1 + $0x190] sm:$0xff]   ;;  %v2452_v55 = vld [vmem:[%s3223_s16 + $0xcc] sm:$0x1]  ;;  %v1293_v62 = vshll.u32 %v2451_v51, 16 }
  0x20   : > { %2721 = vmatpush3.bf16.msra.mxu1 %v3041_v14  ;;  %v2469_v11 = vcombine.low %v1204_v3, %v1218_v7  ;;  %v3067_v14 = vld [vmem:[%s3555_s1 + $0x38] sm:$0xff]   ;;  %v1299_v63 = vshll.u32 %v2452_v55, 16  ;;  %v1278_v1 = vrot.slane %v1276_v56, 4 }
  0x21   : > { %2817 = vmatpush3.bf16.msra.mxu0 %v3042_v15  ;;  %2722 = vmatprep.subr.bf16.mxu1 %v3043_v16  ;;  %v1226_v15 = vor.u32 %v1225_v8, %v1222_v4  ;;  %v3078_v4 = vld [vmem:[%s3555_s1 + $0x198] sm:$0xff]   ;;  %v1295_v7 = vrot.slane %v1293_v62, 5 }
  0x22   : > { %2818 = vmatprep.subr.bf16.mxu0 %v3044_v17  ;;  %v1301_v8 = vrot.slane %v1299_v63, 5 }
  0x24   : > { %2723 = vmatpush3.bf16.msra.mxu1 %v3043_v16  ;;  %v1240_v16 = vor.u32 %v1239_v13, %v1236_v9  ;;  %v3079_v13 = vld [vmem:[%s3555_s1 + $0xa0] sm:$0xff]  }
  0x25   : > { %2819 = vmatpush3.bf16.msra.mxu0 %v3044_v17  ;;  %2732 = vmatprep.subr.bf16.mxu1 %v3046_v18  ;;  %v1227_v17 = vrot.slane %v1226_v15, 4 }
  0x26   : > { %2828 = vmatprep.subr.bf16.mxu0 %v3048_v19 }
  0x27   : > { %2725 = vmatmul.mubr.bf16.vlgmr.msra.gmra.mrb[0].mxu1 %v3049_v20  ;;  %v1241_v20 = vrot.slane %v1240_v16, 4  ;;  %v546_v16 = vld [vmem:[%s3223_s16 + $0x8] sm:$0xf] }
  0x28   : > { %2733 = vmatpush3.bf16.msra.mxu1 %v3046_v18  ;;  %2821 = vmatmul.mubr.bf16.vlgmr.msra.gmra.mrb[0].mxu0 %v3050_v21  ;;  %v1245_v18 = vrot.slane %v1243_v10, 5  ;;  %v3070_v21 = vld [vmem:[%s3555_s1 + $0x80] sm:$0xff]  }
  0x29   : > { %2829 = vmatpush3.bf16.msra.mxu0 %v3048_v19  ;;  %2734 = vmatprep.subr.bf16.mxu1 %v3051_v22  ;;  %v3068_v19 = vld [vmem:[%s3555_s1 + $0x178] sm:$0xff]  }
  0x2a   : > { %2830 = vmatprep.subr.bf16.mxu0 %v3052_v23  ;;  %2728 = vmatprep.mubr.bf16.mxu1 %v3061_v24  ;;  %v3071_v24 = vld [vmem:[%s3555_s1 + $0x180] sm:$0xff]  }
  0x2b   : > { %2824 = vmatprep.mubr.bf16.mxu0 %v3063_v25  ;;  %v3072_v25 = vld [vmem:[%s3223_s16 + $0x10] ss:$8 sps:$4 sm:$0xff]  }
  0x2c   : > { %2735 = vmatpush3.bf16.msra.mxu1 %v3051_v22  ;;  %v1232_v22 = vsel %vm3294_vm2, %v1227_v17, %v1231_v12  ;;  %v545_v12 = vld [vmem:[%s3223_s16 + $0x4] sm:$0x1]  ;;  %v547_v17 = vld [vmem:[%s3223_s16 + $0xc] sm:$0x1] }
  0x2d   : > { %2831 = vmatpush3.bf16.msra.mxu0 %v3052_v23  ;;  %2736 = vmatprep.subr.bf16.mxu1 %v3053_v26  ;;  %v1246_v23 = vsel %vm3294_vm2, %v1241_v20, %v1245_v18 }
  0x2e   : > { %2832 = vmatprep.subr.bf16.mxu0 %v3054_v27 }
  0x2f   : > { %2729 = vmatmul.mubr.bf16.gmra.mrb[4].mxu1 %v3065_v29  ;;  %v3074_v29 = vld [vmem:[%s3555_s1 + $0x188] sm:$0xff]  }
  0x30   : > { %2737 = vmatpush3.bf16.msra.mxu1 %v3053_v26  ;;  %2825 = vmatmul.mubr.bf16.gmra.mrb[4].mxu0 %v3066_v30  ;;  %v3073_v26 = vld [vmem:[%s3555_s1 + $0x88] sm:$0xff]   ;;  %v2446_v30 = vld [vmem:[%s3223_s16 + $0xb4] sm:$0x1] }
  0x31   : > { %2833 = vmatpush3.bf16.msra.mxu0 %v3054_v27  ;;  %2738 = vmatprep.subr.bf16.mxu1 %v3055_v28  ;;  %v2445_v27 = vld [vmem:[%s3223_s16 + $0xb0] sm:$0xf]  ;;  %v1257_v35 = vshll.u32 %v2446_v30, 16 }
  0x32   : > { %2834 = vmatprep.subr.bf16.mxu0 %v3056_v31  ;;  %2748 = vmatprep.mubr.bf16.mxu1 %v3069_v32  ;;  %v2448_v32 = vld [vmem:[%s3223_s16 + $0xbc] sm:$0x1]  ;;  %v1248_v33 = vshrl.u32 %v2445_v27, 16  ;;  %v1251_v34 = vshll.u32 %v2445_v27, 16  ;;  %v587_v27 = vshll.u32 %v547_v17, 16 }
  0x33   : > { %2844 = vmatprep.mubr.bf16.mxu0 %v2469_v11  ;;  %v1271_v39 = vshll.u32 %v2448_v32, 16  ;;  %v1259_v44 = vrot.slane %v1257_v35, 5  ;;  %v544_v11 = vld [vmem:[%s3223_s16] sm:$0xf]  ;;  %v3081_v32 = vld [vmem:[%s3555_s1 + $0xa8] sm:$0xff]  }
  0x34   : > { %2739 = vmatpush3.bf16.msra.mxu1 %v3055_v28  ;;  %v2470_v28 = vcombine.low %v1232_v22, %v1246_v23  ;;  %v1250_v40 = vrot.slane %v1248_v33, 4  ;;  %v1253_v41 = vrot.slane %v1251_v34, 5  ;;  %v564_v18 = vshrl.u32 %v544_v11, 16  ;;  %v555_v17 = vld [vmem:[%s3223_s16 + $0x2c] sm:$0x1] }
  0x35   : > { %2835 = vmatpush3.bf16.msra.mxu0 %v3056_v31  ;;  %2740 = vmatprep.subr.bf16.mxu1 %v3057_v38  ;;  %v2447_v31 = vld [vmem:[%s3223_s16 + $0xb8] sm:$0xf]  ;;  %v1273_v46 = vrot.slane %v1271_v39, 5  ;;  %v578_v22 = vshrl.u32 %v546_v16, 16  ;;  %v581_v23 = vshll.u32 %v546_v16, 16 }
  0x36   : > { %2836 = vmatprep.subr.bf16.mxu0 %v3058_v43  ;;  %v1262_v36 = vshrl.u32 %v2447_v31, 16  ;;  %v554_v16 = vld [vmem:[%s3223_s16 + $0x28] sm:$0xf] }
  0x37   : > { %v580_v30 = vrot.slane %v578_v22, 4  ;;  %v634_v22 = vshrl.u32 %v554_v16, 16 }
  0x38   : > { %2741 = vmatpush3.bf16.msra.mxu1 %v3057_v38  ;;  %v1265_v38 = vshll.u32 %v2447_v31, 16  ;;  %v1264_v42 = vrot.slane %v1262_v36, 4  ;;  %v583_v31 = vrot.slane %v581_v23, 5  ;;  %v589_v36 = vrot.slane %v587_v27, 5 }
  0x39   : > { %2837 = vmatpush3.bf16.msra.mxu0 %v3058_v43  ;;  %2742 = vmatprep.subr.bf16.mxu1 %v3059_v47  ;;  %v3075_v43 = vld [vmem:[%s3555_s1 + $0x90] sm:$0xff]   ;;  %v637_v23 = vshll.u32 %v554_v16, 16  ;;  %v2554_v16 = vld [vmem:[%s3223_s16 + $0xc] sm:$0x1] }
  0x3a   : > { %2838 = vmatprep.subr.bf16.mxu0 %v3060_v50  ;;  %v1267_v45 = vrot.slane %v1265_v38, 5  ;;  %v3082_v38 = vld [vmem:[%s3555_s1 + $0x1a8] sm:$0xff]  }
  0x3c   : > { %2743 = vmatpush3.bf16.msra.mxu1 %v3059_v47  ;;  %v1254_v47 = vor.u32 %v1253_v41, %v1250_v40  ;;  %v1268_v54 = vor.u32 %v1267_v45, %v1264_v42  ;;  %v584_v40 = vor.u32 %v583_v31, %v580_v30  ;;  %v548_v41 = vld [vmem:[%s3223_s16 + $0x10] sm:$0xf]  ;;  %v639_v31 = vrot.slane %v637_v23, 5 }
  0x3d   : > { %2839 = vmatpush3.bf16.msra.mxu0 %v3060_v50  ;;  %2744 = vmatprep.subr.bf16.mxu1 %v3062_v2  ;;  %v2450_v50 = vld [vmem:[%s3223_s16 + $0xc4] sm:$0x1]  ;;  %v592_v45 = vshrl.u32 %v548_v41, 16  ;;  %v556_v30 = vld [vmem:[%s3223_s16 + $0x30] sm:$0xf] }
  0x3e   : > { %2840 = vmatprep.subr.bf16.mxu0 %v3064_v6  ;;  %v1285_v58 = vshll.u32 %v2450_v50, 16  ;;  %v1255_v60 = vrot.slane %v1254_v47, 4  ;;  %v1269_v0 = vrot.slane %v1268_v54, 4  ;;  %v551_v47 = vld [vmem:[%s3223_s16 + $0x1c] sm:$0x1] }
  0x40   : > { %2745 = vmatpush3.bf16.msra.mxu1 %v3062_v2  ;;  %v1281_v2 = vrot.slane %v1279_v57, 5  ;;  %v1287_v3 = vrot.slane %v1285_v58, 5  ;;  %v1260_v5 = vsel %vm3294_vm2, %v1255_v60, %v1259_v44  ;;  %v1274_v9 = vsel %vm3294_vm2, %v1269_v0, %v1273_v46  ;;  %v550_v44 = vld [vmem:[%s3223_s16 + $0x18] sm:$0xf]  ;;  %v3085_v60 = vld [vmem:[%s3555_s1 + $0x1b0] sm:$0xff]  }
  0x41   : > { %2841 = vmatpush3.bf16.msra.mxu0 %v3064_v6  ;;  %2746 = vmatprep.subr.bf16.mxu1 %v3067_v14  ;;  %v1292_v6 = vrot.slane %v1290_v61, 4  ;;  %v585_v46 = vrot.slane %v584_v40, 4  ;;  %v606_v50 = vshrl.u32 %v550_v44, 16  ;;  %v609_v54 = vshll.u32 %v550_v44, 16 }
  0x42   : > { %2842 = vmatprep.subr.bf16.mxu0 %v3068_v19  ;;  %v1282_v10 = vor.u32 %v1281_v2, %v1278_v1  ;;  %v615_v58 = vshll.u32 %v551_v47, 16 }
  0x43   : > { %v1296_v15 = vor.u32 %v1295_v7, %v1292_v6  ;;  %v590_v55 = vsel %vm3294_vm2, %v585_v46, %v589_v36  ;;  %v608_v57 = vrot.slane %v606_v50, 4  ;;  %v611_v63 = vrot.slane %v609_v54, 5  ;;  %v3088_v6 = vld [vmem:[%s3555_s1 + $0x1b8] sm:$0xff]   ;;  %v3089_v7 = vld [vmem:[%s3555_s1 + $0xc0] sm:$0xff]  }
  0x44   : > { %2747 = vmatpush3.bf16.msra.mxu1 %v3067_v14  ;;  %v2471_v14 = vcombine.low %v1260_v5, %v1274_v9  ;;  %v1283_v20 = vrot.slane %v1282_v10, 4  ;;  %v3091_v10 = vld [vmem:[%s3555_s1 + $0x1c0] sm:$0xff]   ;;  %v3097_v50 = vld [vmem:[%s3555_s1 + $0xd8] sm:$0xff]  }
  0x45   : > { %2843 = vmatpush3.bf16.msra.mxu0 %v3068_v19  ;;  %2756 = vmatprep.subr.bf16.mxu1 %v3070_v21  ;;  %v567_v19 = vshll.u32 %v544_v11, 16  ;;  %v612_v1 = vor.u32 %v611_v63, %v608_v57  ;;  %v3092_v11 = vld [vmem:[%s3223_s16 + $0x18] ss:$8 sps:$4 sm:$0xff]  }
  0x46   : > { %2852 = vmatprep.subr.bf16.mxu0 %v3071_v24 }
  0x47   : > { %2749 = vmatmul.mubr.bf16.vlgmr.msra.gmra.mrb[0].mxu1 %v3072_v25  ;;  %v566_v25 = vrot.slane %v564_v18, 4  ;;  %v613_v5 = vrot.slane %v612_v1, 4  ;;  %v3094_v18 = vld [vmem:[%s3555_s1 + $0x1c8] sm:$0xff]   ;;  %v3099_v1 = vld [vmem:[%s3555_s1 + $0xe0] sm:$0xff]  }
  0x48   : > { %2757 = vmatpush3.bf16.msra.mxu1 %v3070_v21  ;;  %2845 = vmatmul.mubr.bf16.vlgmr.msra.gmra.mrb[0].mxu0 %v2470_v28  ;;  %v573_v21 = vshll.u32 %v545_v12, 16  ;;  %v3080_v28 = vld [vmem:[%s3555_s1 + $0x1a0] sm:$0xff]  }
  0x49   : > { %2853 = vmatpush3.bf16.msra.mxu0 %v3071_v24  ;;  %2758 = vmatprep.subr.bf16.mxu1 %v3073_v26  ;;  %v1297_v24 = vrot.slane %v1296_v15, 4  ;;  %v552_v12 = vld [vmem:[%s3223_s16 + $0x20] sm:$0xf]  ;;  %v553_v15 = vld [vmem:[%s3223_s16 + $0x24] sm:$0x1] }
  0x4a   : > { %2854 = vmatprep.subr.bf16.mxu0 %v3074_v29  ;;  %2752 = vmatprep.mubr.bf16.mxu1 %v3083_v37  ;;  %v575_v35 = vrot.slane %v573_v21, 5  ;;  %v3090_v37 = vld [vmem:[%s3223_s16 + $0x8] ss:$8 sps:$4 sm:$0xff]   ;;  %v629_v21 = vshll.u32 %v553_v15, 16 }
  0x4b   : > { %2848 = vmatprep.mubr.bf16.mxu0 %v2471_v14  ;;  %v1302_v33 = vsel %vm3294_vm2, %v1297_v24, %v1301_v8  ;;  %v3093_v14 = vld [vmem:[%s3555_s1 + $0xc8] sm:$0xff]   ;;  %v643_v24 = vshll.u32 %v555_v17, 16  ;;  %v2555_v17 = vld [vmem:[%s3223_s16 + $0x10] sm:$0xf] }
  0x4c   : > { %2759 = vmatpush3.bf16.msra.mxu1 %v3073_v26  ;;  %v569_v26 = vrot.slane %v567_v19, 5  ;;  %v620_v19 = vshrl.u32 %v552_v12, 16  ;;  %v2553_v15 = vld [vmem:[%s3223_s16 + $0x8] sm:$0xf]  ;;  %v1838_v23 = vshll.u32 %v2555_v17, 16 }
  0x4d   : > { %2855 = vmatpush3.bf16.msra.mxu0 %v3074_v29  ;;  %2760 = vmatprep.subr.bf16.mxu1 %v3075_v43  ;;  %v1288_v29 = vsel %vm3294_vm2, %v1283_v20, %v1287_v3  ;;  %v617_v3 = vrot.slane %v615_v58, 5  ;;  %v623_v20 = vshll.u32 %v552_v12, 16  ;;  %v3105_v58 = vld [vmem:[%s3223_s16 + $0x38] ss:$8 sps:$4 sm:$0xff]  }
  0x4e   : > { %2856 = vmatprep.subr.bf16.mxu0 %v3076_v52  ;;  %v570_v34 = vor.u32 %v569_v26, %v566_v25  ;;  %v2472_v39 = vcombine.low %v1288_v29, %v1302_v33  ;;  %v3103_v25 = vld [vmem:[%s3223_s16 + $0x28] ss:$8 sps:$4 sm:$0xff]   ;;  %v622_v26 = vrot.slane %v620_v19, 4  ;;  %v636_v29 = vrot.slane %v634_v22, 4  ;;  %v557_v33 = vld [vmem:[%s3223_s16 + $0x34] sm:$0x1] }
  0x4f   : > { %2753 = vmatmul.mubr.bf16.gmra.mrb[4].mxu1 %v3086_v48  ;;  %v595_v48 = vshll.u32 %v548_v41, 16  ;;  %v618_v9 = vsel %vm3294_vm2, %v613_v5, %v617_v3  ;;  %v625_v27 = vrot.slane %v623_v20, 5  ;;  %v657_v40 = vshll.u32 %v557_v33, 16  ;;  %v3096_v41 = vld [vmem:[%s3555_s1 + $0x1d0] sm:$0xff]   ;;  %v3100_v5 = vld [vmem:[%s3555_s1 + $0x1e0] sm:$0xff]   ;;  %v3107_v12 = vld [vmem:[%s3555_s1 + $0xf8] sm:$0xff]  }
  0x50   : > { %2761 = vmatpush3.bf16.msra.mxu1 %v3075_v43  ;;  %v571_v42 = vrot.slane %v570_v34, 4  ;;  %v549_v43 = vld [vmem:[%s3223_s16 + $0x14] sm:$0x1]  ;;  %2849 = vmatmul.mubr.bf16.gmra.mrb[4].mxu0 %v2472_v39  ;;  %v558_v34 = vld [vmem:[%s3223_s16 + $0x38] sm:$0xf]  ;;  %v651_v39 = vshll.u32 %v556_v30, 16 }
  0x51   : > { %2857 = vmatpush3.bf16.msra.mxu0 %v3076_v52  ;;  %2762 = vmatprep.subr.bf16.mxu1 %v3077_v59  ;;  %v601_v49 = vshll.u32 %v549_v43, 16  ;;  %v594_v52 = vrot.slane %v592_v45, 4  ;;  %v597_v56 = vrot.slane %v595_v48, 5  ;;  %v626_v36 = vor.u32 %v625_v27, %v622_v26  ;;  %v2564_v33 = vld [vmem:[%s3223_s16 + $0x34] sm:$0x1] }
  0x52   : > { %2858 = vmatprep.subr.bf16.mxu0 %v3078_v4  ;;  %v576_v51 = vsel %vm3294_vm2, %v571_v42, %v575_v35  ;;  %2868 = vmatprep.mubr.bf16.mxu0 %v3090_v37  ;;  %v3095_v35 = vld [vmem:[%s3555_s1 + $0xd0] sm:$0xff]   ;;  %v559_v37 = vld [vmem:[%s3223_s16 + $0x3c] sm:$0x1]  ;;  %v640_v42 = vor.u32 %v639_v31, %v636_v29  ;;  %v662_v43 = vshrl.u32 %v558_v34, 16  ;;  %v665_v44 = vshll.u32 %v558_v34, 16 }
  0x53   : > { %v2353_v61 = vcombine.low %v576_v51, %v590_v55  ;;  %v603_v62 = vrot.slane %v601_v49, 5  ;;  %v598_v0 = vor.u32 %v597_v56, %v594_v52  ;;  %v671_v45 = vshll.u32 %v559_v37, 16  ;;  %v2563_v29 = vld [vmem:[%s3223_s16 + $0x30] sm:$0xf]  ;;  %v3112_v34 = vld [vmem:[%s3223_s16 + $0x60] ss:$8 sps:$4 sm:$0xff]  }
  0x54   : > { %2763 = vmatpush3.bf16.msra.mxu1 %v3077_v59  ;;  %v3084_v59 = vld [vmem:[%s3555_s1 + $0xb0] sm:$0xff]   ;;  %v627_v46 = vrot.slane %v626_v36, 4  ;;  %v653_v48 = vrot.slane %v651_v39, 5  ;;  %v659_v49 = vrot.slane %v657_v40, 5  ;;  %v641_v51 = vrot.slane %v640_v42, 4  ;;  %v3114_v39 = vld [vmem:[%s3555_s1 + $0x208] sm:$0xff]  }
  0x55   : > { %2859 = vmatpush3.bf16.msra.mxu0 %v3078_v4  ;;  %2764 = vmatprep.subr.bf16.mxu1 %v3079_v13  ;;  %v599_v2 = vrot.slane %v598_v0, 4  ;;  %v3087_v4 = vld [vmem:[%s3555_s1 + $0xb8] sm:$0xff]   ;;  %v664_v52 = vrot.slane %v662_v43, 4  ;;  %v667_v54 = vrot.slane %v665_v44, 5  ;;  %v673_v55 = vrot.slane %v671_v45, 5 }
  0x56   : > { %2860 = vmatprep.subr.bf16.mxu0 %v3080_v28  ;;  %2772 = vmatprep.mubr.bf16.mxu1 %v2353_v61  ;;  %v3098_v61 = vld [vmem:[%s3555_s1 + $0x1d8] sm:$0xff]   ;;  %v1821_v19 = vshrl.u32 %v2553_v15, 16  ;;  %v1824_v20 = vshll.u32 %v2553_v15, 16  ;;  %v1835_v22 = vshrl.u32 %v2555_v17, 16  ;;  %v1894_v42 = vshll.u32 %v2563_v29, 16  ;;  %v3121_v15 = vld [vmem:[%s3555_s1 + $0x220] sm:$0xff]  }
  0x57   : > { %v604_v8 = vsel %vm3294_vm2, %v599_v2, %v603_v62  ;;  %v1900_v43 = vshll.u32 %v2564_v33, 16  ;;  %v3115_v44 = vld [vmem:[%s3223_s16 + $0xb0] ss:$8 sps:$4 sm:$0xff]  }
  0x58   : > { %2765 = vmatpush3.bf16.msra.mxu1 %v3079_v13  ;;  %v2354_v13 = vcombine.low %v604_v8, %v618_v9  ;;  %v3101_v8 = vld [vmem:[%s3555_s1 + $0xe8] sm:$0xff]   ;;  %v1823_v26 = vrot.slane %v1821_v19, 4  ;;  %v1826_v27 = vrot.slane %v1824_v20, 5  ;;  %v1837_v31 = vrot.slane %v1835_v22, 4 }
  0x59   : > { %2861 = vmatpush3.bf16.msra.mxu0 %v3080_v28  ;;  %2766 = vmatprep.subr.bf16.mxu1 %v3081_v32  ;;  %v631_v28 = vrot.slane %v629_v21, 5  ;;  %v3102_v9 = vld [vmem:[%s3555_s1 + $0x1e8] sm:$0xff]   ;;  %v1830_v21 = vshll.u32 %v2554_v16, 16 }
  0x5a   : > { %2862 = vmatprep.subr.bf16.mxu0 %v3082_v38  ;;  %v3122_v20 = vld [vmem:[%s3555_s1 + $0x228] sm:$0xff]  }
  0x5b   : > { %v632_v56 = vsel %vm3294_vm2, %v627_v46, %v631_v28  ;;  %v2562_v28 = vld [vmem:[%s3223_s16 + $0x2c] sm:$0x1]  ;;  %v1832_v45 = vrot.slane %v1830_v21, 5  ;;  %v2566_v21 = vld [vmem:[%s3223_s16 + $0x3c] sm:$0x1] }
  0x5c   : > { %2767 = vmatpush3.bf16.msra.mxu1 %v3081_v32  ;;  %v645_v32 = vrot.slane %v643_v24, 5 }
  0x5d   : > { %2863 = vmatpush3.bf16.msra.mxu0 %v3082_v38  ;;  %2768 = vmatprep.subr.bf16.mxu1 %v3084_v59  ;;  %v648_v38 = vshrl.u32 %v556_v30, 16  ;;  %v3111_v30 = vld [vmem:[%s3223_s16 + $0xa0] ss:$8 sps:$4 sm:$0xff]  }
  0x5e   : > { %2864 = vmatprep.subr.bf16.mxu0 %v3085_v60 }
  0x5f   : > { %v650_v47 = vrot.slane %v648_v38, 4  ;;  %v1886_v38 = vshll.u32 %v2562_v28, 16 }
  0x60   : > { %2769 = vmatpush3.bf16.msra.mxu1 %v3084_v59  ;;  %v646_v59 = vsel %vm3294_vm2, %v641_v51, %v645_v32  ;;  %v1840_v32 = vrot.slane %v1838_v23, 5 }
  0x61   : > { %2865 = vmatpush3.bf16.msra.mxu0 %v3085_v60  ;;  %2770 = vmatprep.subr.bf16.mxu1 %v3087_v4  ;;  %v654_v57 = vor.u32 %v653_v48, %v650_v47  ;;  %v668_v60 = vor.u32 %v667_v54, %v664_v52  ;;  %v2355_v62 = vcombine.low %v632_v56, %v646_v59  ;;  %v1896_v54 = vrot.slane %v1894_v42, 5 }
  0x62   : > { %2866 = vmatprep.subr.bf16.mxu0 %v3088_v6  ;;  %v1841_v40 = vor.u32 %v1840_v32, %v1837_v31  ;;  %v1888_v56 = vrot.slane %v1886_v38, 5  ;;  %v1902_v59 = vrot.slane %v1900_v43, 5  ;;  %v2558_v31 = vld [vmem:[%s3223_s16 + $0x1c] sm:$0x1]  ;;  %v2560_v32 = vld [vmem:[%s3223_s16 + $0x24] sm:$0x1] }
  0x63   : > { %v655_v63 = vrot.slane %v654_v57, 4  ;;  %v669_v0 = vrot.slane %v668_v60, 4  ;;  %v3119_v57 = vld [vmem:[%s3555_s1 + $0x210] sm:$0xff]  }
  0x64   : > { %2771 = vmatpush3.bf16.msra.mxu1 %v3087_v4  ;;  %v3110_v4 = vld [vmem:[%s3223_s16 + $0x50] ss:$8 sps:$4 sm:$0xff]   ;;  %v1842_v51 = vrot.slane %v1841_v40, 4 }
  0x65   : > { %2867 = vmatpush3.bf16.msra.mxu0 %v3088_v6  ;;  %2780 = vmatprep.subr.bf16.mxu1 %v3089_v7  ;;  %v660_v2 = vsel %vm3294_vm2, %v655_v63, %v659_v49  ;;  %v674_v3 = vsel %vm3294_vm2, %v669_v0, %v673_v55  ;;  %v3116_v49 = vld [vmem:[%s3223_s16 + $0x70] ss:$8 sps:$4 sm:$0xff]  }
  0x66   : > { %2876 = vmatprep.subr.bf16.mxu0 %v3091_v10  ;;  %v2356_v6 = vcombine.low %v660_v2, %v674_v3  ;;  %v3120_v3 = vld [vmem:[%s3555_s1 + $0x218] sm:$0xff]  }
  0x67   : > { %2773 = vmatmul.mubr.bf16.vlgmr.msra.gmra.mrb[0].mxu1 %v2354_v13  ;;  %v3108_v13 = vld [vmem:[%s3555_s1 + $0x1f8] sm:$0xff]  }
  0x68   : > { %2781 = vmatpush3.bf16.msra.mxu1 %v3089_v7  ;;  %2869 = vmatmul.mubr.bf16.vlgmr.msra.gmra.mrb[0].mxu0 %v3092_v11  ;;  %v3109_v7 = vld [vmem:[%s3223_s16 + $0x90] ss:$8 sps:$4 sm:$0xff]  }
  0x69   : > { %2877 = vmatpush3.bf16.msra.mxu0 %v3091_v10  ;;  %2782 = vmatprep.subr.bf16.mxu1 %v3093_v14  ;;  %v3104_v10 = vld [vmem:[%s3555_s1 + $0xf0] sm:$0xff]  }
  0x6a   : > { %2878 = vmatprep.subr.bf16.mxu0 %v3094_v18  ;;  %2872 = vmatprep.mubr.bf16.mxu0 %v3103_v25  ;;  %v3106_v11 = vld [vmem:[%s3555_s1 + $0x1f0] sm:$0xff]   ;;  %v2561_v25 = vld [vmem:[%s3223_s16 + $0x28] sm:$0xf] }
  0x6b   : > { %2776 = vmatprep.mubr.bf16.mxu1 %v2355_v62  ;;  %v1877_v36 = vshrl.u32 %v2561_v25, 16  ;;  %v1880_v37 = vshll.u32 %v2561_v25, 16 }
  0x6c   : > { %2783 = vmatpush3.bf16.msra.mxu1 %v3093_v14  ;;  %v3113_v14 = vld [vmem:[%s3555_s1 + $0x200] sm:$0xff]  }
  0x6d   : > { %2879 = vmatpush3.bf16.msra.mxu0 %v3094_v18  ;;  %2784 = vmatprep.subr.bf16.mxu1 %v3095_v35  ;;  %v2556_v18 = vld [vmem:[%s3223_s16 + $0x14] sm:$0x1]  ;;  %v1879_v47 = vrot.slane %v1877_v36, 4  ;;  %v1882_v48 = vrot.slane %v1880_v37, 5 }
  0x6e   : > { %2880 = vmatprep.subr.bf16.mxu0 %v3096_v41  ;;  %v1844_v24 = vshll.u32 %v2556_v18, 16  ;;  %v3123_v37 = vld [vmem:[%s3555_s1 + $0x230] sm:$0xff]  }
  0x6f   : > { %2777 = vmatmul.mubr.bf16.gmra.mrb[4].mxu1 %v2356_v6  ;;  %v1883_v55 = vor.u32 %v1882_v48, %v1879_v47  ;;  %v2567_v6 = vld [vmem:[%s3223_s16 + $0x40] sm:$0xf] }
  0x70   : > { %2785 = vmatpush3.bf16.msra.mxu1 %v3095_v35  ;;  %2873 = vmatmul.mubr.bf16.gmra.mrb[4].mxu0 %v3105_v58  ;;  %v1827_v35 = vor.u32 %v1826_v27, %v1823_v26  ;;  %v1846_v46 = vrot.slane %v1844_v24, 5 }
  0x71   : > { %2881 = vmatpush3.bf16.msra.mxu0 %v3096_v41  ;;  %2786 = vmatprep.subr.bf16.mxu1 %v3097_v50  ;;  %v1891_v41 = vshrl.u32 %v2563_v29, 16  ;;  %v1884_v60 = vrot.slane %v1883_v55, 4 }
  0x72   : > { %2882 = vmatprep.subr.bf16.mxu0 %v3098_v61  ;;  %2892 = vmatprep.mubr.bf16.mxu0 %v3110_v4  ;;  %v1847_v63 = vsel %vm3294_vm2, %v1842_v51, %v1846_v46  ;;  %v3124_v46 = vld [vmem:[%s3555_s1 + $0x238] sm:$0xff]  }
  0x73   : > { %2796 = vmatprep.mubr.bf16.mxu1 %v3109_v7  ;;  %v1893_v52 = vrot.slane %v1891_v41, 4  ;;  %v1889_v2 = vsel %vm3294_vm2, %v1884_v60, %v1888_v56  ;;  %v1872_v41 = vshll.u32 %v2560_v32, 16 }
  0x74   : > { %2787 = vmatpush3.bf16.msra.mxu1 %v3097_v50  ;;  %v1828_v50 = vrot.slane %v1827_v35, 4 }
  0x75   : > { %2883 = vmatpush3.bf16.msra.mxu0 %v3098_v61  ;;  %2788 = vmatprep.subr.bf16.mxu1 %v3099_v1  ;;  %v1897_v58 = vor.u32 %v1896_v54, %v1893_v52  ;;  %v3117_v61 = vld [vmem:[%s3223_s16 + $0xc0] ss:$8 sps:$4 sm:$0xff]  }
  0x76   : > { %2884 = vmatprep.subr.bf16.mxu0 %v3100_v5  ;;  %v1833_v62 = vsel %vm3294_vm2, %v1828_v50, %v1832_v45  ;;  %v1874_v50 = vrot.slane %v1872_v41, 5 }
  0x77   : > { %v1898_v0 = vrot.slane %v1897_v58, 4  ;;  %v2585_v7 = vcombine.low %v1833_v62, %v1847_v63 }
  0x78   : > { %2789 = vmatpush3.bf16.msra.mxu1 %v3099_v1  ;;  %v3118_v1 = vld [vmem:[%s3223_s16 + $0x80] ss:$8 sps:$4 sm:$0xff]  }
  0x79   : > { %2885 = vmatpush3.bf16.msra.mxu0 %v3100_v5  ;;  %2790 = vmatprep.subr.bf16.mxu1 %v3101_v8  ;;  %v1903_v4 = vsel %vm3294_vm2, %v1898_v0, %v1902_v59  ;;  %v2565_v5 = vld [vmem:[%s3223_s16 + $0x38] sm:$0xf] }
  0x7a   : > { %2886 = vmatprep.subr.bf16.mxu0 %v3102_v9 }
  0x7c   : > { %2791 = vmatpush3.bf16.msra.mxu1 %v3101_v8  ;;  %v2557_v8 = vld [vmem:[%s3223_s16 + $0x18] sm:$0xf] }
  0x7d   : > { %2887 = vmatpush3.bf16.msra.mxu0 %v3102_v9  ;;  %2792 = vmatprep.subr.bf16.mxu1 %v3104_v10  ;;  %v2559_v9 = vld [vmem:[%s3223_s16 + $0x20] sm:$0xf]  ;;  %v1849_v16 = vshrl.u32 %v2557_v8, 16  ;;  %v1852_v17 = vshll.u32 %v2557_v8, 16 }
  0x7e   : > { %2888 = vmatprep.subr.bf16.mxu0 %v3106_v11  ;;  %v1863_v18 = vshrl.u32 %v2559_v9, 16  ;;  %v1866_v19 = vshll.u32 %v2559_v9, 16 }
  0x7f   : > { %v1851_v26 = vrot.slane %v1849_v16, 4  ;;  %v1854_v27 = vrot.slane %v1852_v17, 5 }
  0x80   : > { %2793 = vmatpush3.bf16.msra.mxu1 %v3104_v10  ;;  %v2587_v10 = vcombine.low %v1889_v2, %v1903_v4  ;;  %v1865_v28 = vrot.slane %v1863_v18, 4  ;;  %v1868_v29 = vrot.slane %v1866_v19, 5 }
  0x81   : > { %2889 = vmatpush3.bf16.msra.mxu0 %v3106_v11  ;;  %2794 = vmatprep.subr.bf16.mxu1 %v3107_v12  ;;  %v1905_v11 = vshrl.u32 %v2565_v5, 16  ;;  %v1855_v38 = vor.u32 %v1854_v27, %v1851_v26 }
  0x82   : > { %2890 = vmatprep.subr.bf16.mxu0 %v3108_v13  ;;  %v1869_v40 = vor.u32 %v1868_v29, %v1865_v28 }
  0x83   : > { %v1907_v22 = vrot.slane %v1905_v11, 4  ;;  %v1856_v47 = vrot.slane %v1855_v38, 4 }
  0x84   : > { %2795 = vmatpush3.bf16.msra.mxu1 %v3107_v12  ;;  %v1908_v12 = vshll.u32 %v2565_v5, 16 }
  0x85   : > { %2891 = vmatpush3.bf16.msra.mxu0 %v3108_v13  ;;  %2924 = vmatprep.subr.bf16.mxu1 %v3113_v14  ;;  %v1919_v13 = vshrl.u32 %v2567_v6, 16 }
  0x86   : > { %2900 = vmatprep.subr.bf16.mxu0 %v3113_v14  ;;  %v1910_v23 = vrot.slane %v1908_v12, 5 }
  0x87   : > { %2797 = vmatmul.mubr.bf16.vlgmr.msra.gmra.mrb[0].mxu1 %v3111_v30  ;;  %v1921_v24 = vrot.slane %v1919_v13, 4  ;;  %v2568_v30 = vld [vmem:[%s3223_s16 + $0x44] sm:$0x1] }
  0x88   : > { %2893 = vmatmul.mubr.bf16.vlgmr.msra.gmra.mrb[0].mxu0 %v3112_v34  ;;  %2932 = vmatpush3.bf16.msra.mxu1 %v3113_v14  ;;  %v1911_v33 = vor.u32 %v1910_v23, %v1907_v22  ;;  %v1914_v34 = vshll.u32 %v2566_v21, 16  ;;  %v1928_v36 = vshll.u32 %v2568_v30, 16 }
  0x89   : > { %2901 = vmatpush3.bf16.msra.mxu0 %v3113_v14  ;;  %2925 = vmatprep.subr.bf16.mxu1 %v3114_v39  ;;  %v1922_v14 = vshll.u32 %v2567_v6, 16 }
  0x8a   : > { %2902 = vmatprep.subr.bf16.mxu0 %v3114_v39  ;;  %2800 = vmatprep.mubr.bf16.mxu1 %v3115_v44  ;;  %v1912_v42 = vrot.slane %v1911_v33, 4  ;;  %v1916_v43 = vrot.slane %v1914_v34, 5  ;;  %v1930_v45 = vrot.slane %v1928_v36, 5 }
  0x8b   : > { %2896 = vmatprep.mubr.bf16.mxu0 %v3116_v49  ;;  %v1924_v25 = vrot.slane %v1922_v14, 5  ;;  %v1870_v49 = vrot.slane %v1869_v40, 4 }
  0x8c   : > { %2933 = vmatpush3.bf16.msra.mxu1 %v3114_v39  ;;  %v1917_v51 = vsel %vm3294_vm2, %v1912_v42, %v1916_v43 }
  0x8d   : > { %2903 = vmatpush3.bf16.msra.mxu0 %v3114_v39  ;;  %2926 = vmatprep.subr.bf16.mxu1 %v3119_v57  ;;  %v1925_v35 = vor.u32 %v1924_v25, %v1921_v24  ;;  %v1858_v39 = vshll.u32 %v2558_v31, 16  ;;  %v1875_v55 = vsel %vm3294_vm2, %v1870_v49, %v1874_v50  ;;  %v2128_v50 = vlaneseq }
  0x8e   : > { %2904 = vmatprep.subr.bf16.mxu0 %v3119_v57 }
  0x8f   : > { %2801 = vmatmul.mubr.bf16.gmra.mrb[4].mxu1 %v3117_v61  ;;  %v1926_v44 = vrot.slane %v1925_v35, 4  ;;  %v1860_v48 = vrot.slane %v1858_v39, 5 }
  0x90   : > { %2897 = vmatmul.mubr.bf16.gmra.mrb[4].mxu0 %v3118_v1  ;;  %2934 = vmatpush3.bf16.msra.mxu1 %v3119_v57 }
  0x91   : > { %2905 = vmatpush3.bf16.msra.mxu0 %v3119_v57  ;;  %2927 = vmatprep.subr.bf16.mxu1 %v3120_v3  ;;  %v1931_v52 = vsel %vm3294_vm2, %v1926_v44, %v1930_v45  ;;  %v1861_v54 = vsel %vm3294_vm2, %v1856_v47, %v1860_v48 }
  0x92   : > { %2906 = vmatprep.subr.bf16.mxu0 %v3120_v3  ;;  %2916 = vmatprep.mubr.bf16.mxu0 %v2585_v7  ;;  %v2588_v56 = vcombine.low %v1917_v51, %v1931_v52  ;;  %v2586_v57 = vcombine.low %v1861_v54, %v1875_v55 }
  0x93   : > { %2920 = vmatprep.mubr.bf16.mxu1 %v2587_v10 }
  0x94   : > { %2935 = vmatpush3.bf16.msra.mxu1 %v3120_v3 }
  0x95   : > { %2907 = vmatpush3.bf16.msra.mxu0 %v3120_v3  ;;  %2928 = vmatprep.subr.bf16.mxu1 %v3121_v15 }
  0x96   : > { %2908 = vmatprep.subr.bf16.mxu0 %v3121_v15 }
  0x98   : > { %2936 = vmatpush3.bf16.msra.mxu1 %v3121_v15 }
  0x99   : > { %2909 = vmatpush3.bf16.msra.mxu0 %v3121_v15  ;;  %2929 = vmatprep.subr.bf16.mxu1 %v3122_v20 }
  0x9a   : > { %2910 = vmatprep.subr.bf16.mxu0 %v3122_v20 }
  0x9c   : > { %2937 = vmatpush3.bf16.msra.mxu1 %v3122_v20 }
  0x9d   : > { %2911 = vmatpush3.bf16.msra.mxu0 %v3122_v20  ;;  %2930 = vmatprep.subr.bf16.mxu1 %v3123_v37 }
  0x9e   : > { %2912 = vmatprep.subr.bf16.mxu0 %v3123_v37 }
  0xa0   : > { %2938 = vmatpush3.bf16.msra.mxu1 %v3123_v37 }
  0xa1   : > { %2913 = vmatpush3.bf16.msra.mxu0 %v3123_v37  ;;  %2931 = vmatprep.subr.bf16.mxu1 %v3124_v46 }
  0xa2   : > { %2914 = vmatprep.subr.bf16.mxu0 %v3124_v46 }
  0xa4   : > { %2939 = vmatpush3.bf16.msra.mxu1 %v3124_v46 }
  0xa5   : > { %2915 = vmatpush3.bf16.msra.mxu0 %v3124_v46 }
  0xa7   : > { %2921 = vmatmul.mubr.bf16.vlgmr.msra.gmra.mrb[8].mxu1 %v2588_v56  ;;  %v2129_v56 = vshrl.u32 %v2128_v50, 7 }
  0xa8   : > { %2917 = vmatmul.mubr.bf16.vlgmr.msra.gmra.mrb[0].mxu0 %v2586_v57 }
  0xa9   : > { %vm2131_vm3 = vcmp.eq.s32.totalorder %v2129_v56, 1  ;;  %vm2130_vm4 = vcmp.eq.s32.totalorder %v2129_v56, 0 }
 0x15a   : > { %v2798_v58 = vpop.f32.mrb[0].mxu1 }
 0x15b   : > { %v963_v59 = vpop.f32.mrb[1].mxu1 }
 0x15c   : > { %v2799_v60 = vpop.f32.mrb[2].mxu1 }
 0x15d   : > { %v966_v61 = vpop.f32.mrb[3].mxu1 }
 0x162   : > { %v2802_v62 = vpop.f32.mrb[4].mxu1 }
 0x163   : > { %v2898_v63 = vpop.f32.mrb[4].mxu0  ;;  %v979_v0 = vpop.f32.mrb[5].mxu1 }
 0x164   : > { %v2944_v1 = vadd.f32 %v2898_v63, %v2802_v62  ;;  %v1781_v2 = vpop.f32.mrb[5].mxu0  ;;  %v2803_v3 = vpop.f32.mrb[6].mxu1 }
 0x165   : > { %v2946_v53 = vadd.f32 %v1781_v2, %v979_v0  ;;  %v2899_v4 = vpop.f32.mrb[6].mxu0  ;;  %v982_v5 = vpop.f32.mrb[7].mxu1 }
 0x166   : > { %v2948_v6 = vadd.f32 %v2899_v4, %v2803_v3  ;;  %v1784_v7 = vpop.f32.mrb[7].mxu0 }
 0x167   : > { %v2950_v8 = vadd.f32 %v1784_v7, %v982_v5 }
 0x17a   : > { %v2922_v9 = vpop.f32.mrb[8].mxu1 }
 0x17b   : > { %v2918_v10 = vpop.f32.mrb[0].mxu0  ;;  %v2945_v11 = vadd.f32 %v2944_v1, %v2922_v9  ;;  %v2063_v12 = vpop.f32.mrb[9].mxu1 }
 0x17c   : > { %v2940_v13 = vadd.f32 %v2918_v10, %v2798_v58  ;;  %v2047_v14 = vpop.f32.mrb[1].mxu0  ;;  %v2947_v15 = vadd.f32 %v2946_v53, %v2063_v12  ;;  %v2923_v16 = vpop.f32.mrb[10].mxu1 }
 0x17d   : > { %2092 = vst [vmem:[%s204_s6 + $0x30] sm:$0xff] %v2945_v11  ;;  %v2941_v17 = vadd.f32 %v2047_v14, %v963_v59  ;;  %v2919_v18 = vpop.f32.mrb[2].mxu0  ;;  %v2949_v19 = vadd.f32 %v2948_v6, %v2923_v16  ;;  %v2066_v20 = vpop.f32.mrb[11].mxu1  ;;  %v2113_v40 = vmul.f32 %v2945_v11, %v2945_v11 }
 0x17e   : > { %2088 = vst [vmem:[%s204_s6 + $0x10] sm:$0xff] %v2940_v13  ;;  %2090 = vst [vmem:[%s204_s6 + $0x20] sm:$0xff] %v2947_v15  ;;  %v2942_v21 = vadd.f32 %v2919_v18, %v2799_v60  ;;  %v2050_v22 = vpop.f32.mrb[3].mxu0  ;;  %v2951_v23 = vadd.f32 %v2950_v8, %v2066_v20  ;;  %v2109_v28 = vmul.f32 %v2940_v13, %v2940_v13 }
 0x17f   : > { %2086 = vst [vmem:[%s204_s6] sm:$0xff] %v2941_v17  ;;  %2093 = vst [vmem:[%s204_s6 + $0x38] sm:$0xff] %v2949_v19  ;;  %v2943_v24 = vadd.f32 %v2050_v22, %v966_v61  ;;  %v2107_v25 = vmul.f32 %v2941_v17, %v2941_v17  ;;  %v2111_v34 = vmul.f32 %v2947_v15, %v2947_v15 }
 0x180   : > { %2089 = vst [vmem:[%s204_s6 + $0x18] sm:$0xff] %v2942_v21  ;;  %2091 = vst [vmem:[%s204_s6 + $0x28] sm:$0xff] %v2951_v23  ;;  %v2110_v31 = vmul.f32 %v2942_v21, %v2942_v21  ;;  %v2112_v38 = vmul.f32 %v2951_v23, %v2951_v23  ;;  %v2114_v43 = vmul.f32 %v2949_v19, %v2949_v19 }
 0x181   : > { %2087 = vst [vmem:[%s204_s6 + $0x8] sm:$0xff] %v2943_v24  ;;  %v2094_v26 = vadd.f32 %v2943_v24, %v2941_v17  ;;  %v2108_v27 = vmul.f32 %v2943_v24, %v2943_v24 }
 0x183   : > { %v2095_v29 = vadd.f32 %v2940_v13, %v2094_v26  ;;  %v2115_v30 = vadd.f32 %v2108_v27, %v2107_v25 }
 0x185   : > { %v2116_v32 = vadd.f32 %v2115_v30, %v2109_v28  ;;  %v2096_v33 = vadd.f32 %v2942_v21, %v2095_v29 }
 0x187   : > { %v2097_v35 = vadd.f32 %v2947_v15, %v2096_v33  ;;  %v2117_v36 = vadd.f32 %v2116_v32, %v2110_v31 }
 0x189   : > { %v2098_v37 = vadd.f32 %v2951_v23, %v2097_v35  ;;  %v2118_v39 = vadd.f32 %v2117_v36, %v2111_v34 }
 0x18b   : > { %v2099_v41 = vadd.f32 %v2945_v11, %v2098_v37  ;;  %v2119_v42 = vadd.f32 %v2118_v39, %v2112_v38 }
 0x18d   : > { %v2100_v44 = vadd.f32 %v2949_v19, %v2099_v41  ;;  %v2120_v45 = vadd.f32 %v2119_v42, %v2113_v40 }
 0x18f   : > { %v2101_v46 = vrot.slane %v2100_v44, 4  ;;  %v2121_v47 = vadd.f32 %v2120_v45, %v2114_v43 }
 0x191   : > { %v2102_v48 = vadd.f32 %v2101_v46, %v2100_v44  ;;  %v2122_v49 = vrot.slane %v2121_v47, 4 }
 0x193   : > { %v2103_v51 = vrot.slane %v2102_v48, 2  ;;  %v2123_v52 = vadd.f32 %v2122_v49, %v2121_v47 }
 0x195   : > { %v2104_v54 = vadd.f32 %v2103_v51, %v2102_v48  ;;  %v2124_v55 = vrot.slane %v2123_v52, 2 }
 0x197   : > { %v2125_v57 = vadd.f32 %v2124_v55, %v2123_v52  ;;  %v2105_v58 = vrot.slane %v2104_v54, 1 }
 0x199   : > { %v2126_v59 = vrot.slane %v2125_v57, 1  ;;  %v2106_v61 = vadd.f32 %v2105_v58, %v2104_v54 }
 0x19b   : > { %v2127_v60 = vadd.f32 %v2126_v59, %v2125_v57 }
 0x19d   : > { %v2132_v62 = vsel %vm2131_vm3, %v2127_v60, 0.0 }
 0x19e   : > { %v2133_v63 = vsel %vm2130_vm4, %v2106_v61, %v2132_v62 }
 0x19f   : > { %2134 = vst [vmem:[%s212_s10] sm:$0xff] %v2133_v63 }
 0x1a0 PF: > { %s14_s14 = sadd.s32 1, %s3147_s14   ;;  %s3560_s12 = smov %s3143_s13 }
 0x1a1   : > { %p11_p5 = scmp.ge.s32.totalorder %s14_s14, 4   ;;  %s3561_s13 = smov %s3563_s15 }
 0x1a3   :  { %13 = sbr.rel (!%p11_p5) target bundleno = 2 (0x2), region = 84 }

// kernel: basic_block.7
= control target key start
LH: loop header
LB: loop body
LE: loop exit
PB: predicated region body
PF: predicated region fallthrough
CT: control target
= control target key end

     0   :  { %s3267_s12 = smov 0   ;;  %s3269_s13 = smov 0   ;;  %s3856_s0 = inlined_call_operand.vmem [shape: bf16[2,1,10,10,128], index: 0, kind: input, shape index: {}]   ;;  %s3857_s1 = inlined_call_operand.vmem [shape: bf16[9,128,128], index: 1, kind: input, shape index: {}]   ;;  %s3858_s2 = inlined_call_operand.vmem [shape: f32[2,8,8,128], index: 2, kind: output, shape index: {0}]   ;;  %s3859_s3 = inlined_call_operand.vmem [shape: f32[2,1,8,128], index: 3, kind: output, shape index: {1}]  }
   0x1   :  { %s3271_s14 = smov 0  }
   0x2 LB: > { %s26_s15 = sadd.s32 1, %s3241_s13  ;;  %p2378_p0 = scmp.ge.s32.totalorder %s3245_s14, 1  ;;  %s3245_s14 = sphi %s3271_s14, %s14_s14   ;;  %s3241_s13 = sphi %s3269_s13, %s3865_s13   ;;  %s3237_s12 = sphi %s3267_s12, %s3864_s12  }
   0x3   : > { %p28_p1 = scmp.ge.s32.totalorder %s26_s15, 2  ;;  %p156_p2 = scmp.lt.s32.totalorder %s3245_s14, 3 }
   0x5   : > { %s3867_s15 = smov (%p28_p1, %s26_s15), 0  ;;  %p157_p3 = pnand %p2378_p0, %p156_p2 }
   0x6   : > { %v3139_v0 = vld [vmem:[%s3857_s1 + $0x40] sm:$0xff] (!%p157_p3)   ;;  %p191_p4 = scmp.lt.s32.totalorder (!%p157_p3), %s3237_s12, 1  ;;  %v3141_v2 = vld [vmem:[%s3857_s1 + $0x48] sm:$0xff] (!%p157_p3)   ;;  %v3143_v4 = vld [vmem:[%s3857_s1 + $0x50] sm:$0xff] (!%p157_p3)   ;;  %vm250_vm0 = vsmask.f32 (!%p157_p3), 3328 }
   0x7   : > { %160 = sbr.rel (%p157_p3) target bundleno = 421 (0x1a5), region = 28  ;;  %v3140_v1 = vld [vmem:[%s3857_s1 + $0x100] sm:$0xff] (!%p157_p3)   ;;  %2818 = vmatprep.subr.bf16.mxu1 (!%p157_p3), %v3139_v0  ;;  %v3142_v3 = vld [vmem:[%s3857_s1 + $0x108] sm:$0xff] (!%p157_p3)   ;;  %v3144_v5 = vld [vmem:[%s3857_s1 + $0x110] sm:$0xff] (!%p157_p3)   ;;  %vm251_vm1 = vsmask.f32 (!%p157_p3), 7440 }
   0x8   : > { %2914 = vmatprep.subr.bf16.mxu0 (!%p157_p3), %v3140_v1  ;;  %2819 = vmatpush3.bf16.msra.mxu1 (!%p157_p3), %v3139_v0  ;;  %v3145_v6 = vld [vmem:[%s3857_s1 + $0x58] sm:$0xff] (!%p157_p3)   ;;  %v3147_v8 = vld [vmem:[%s3857_s1 + $0x60] sm:$0xff] (!%p157_p3)   ;;  %v3149_v10 = vld [vmem:[%s3857_s1 + $0x68] sm:$0xff] (!%p157_p3)   ;;  %vm672_vm3 = vcmask (!%p157_p3), 1042432   ;;  %vm673_vm4 = vcmask (!%p157_p3), 1046532  }
   0x9   : > { %2915 = vmatpush3.bf16.msra.mxu0 (!%p157_p3), %v3140_v1  ;;  %2820 = vmatprep.subr.bf16.mxu1 (!%p157_p3), %v3141_v2  ;;  %v3146_v7 = vld [vmem:[%s3857_s1 + $0x118] sm:$0xff] (!%p157_p3)   ;;  %v3148_v9 = vld [vmem:[%s3857_s1 + $0x120] sm:$0xff] (!%p157_p3)   ;;  %v3150_v14 = vld [vmem:[%s3857_s1 + $0x128] sm:$0xff] (!%p157_p3)  }
   0xa   : > { %2916 = vmatprep.subr.bf16.mxu0 (!%p157_p3), %v3142_v3  ;;  %v3151_v22 = vld [vmem:[%s3857_s1 + $0x70] sm:$0xff] (!%p157_p3)   ;;  %v3153_v37 = vld [vmem:[%s3857_s1 + $0x78] sm:$0xff] (!%p157_p3)   ;;  %vm3366_vm2 = vmor (!%p157_p3), %vm250_vm0, %vm251_vm1 }
   0xb   : > { %v3152_v23 = vld [vmem:[%s3857_s1 + $0x130] sm:$0xff] (!%p157_p3)   ;;  %v3154_v47 = vld [vmem:[%s3857_s1 + $0x138] sm:$0xff] (!%p157_p3)   ;;  %v3155_v63 = vld [vmem:[%s3857_s1] sm:$0xff] (!%p157_p3)  }
   0xc   : > { %2821 = vmatpush3.bf16.msra.mxu1 (!%p157_p3), %v3141_v2  ;;  %v3398_v1 = vld [vmem:[%s3857_s1 + $0x140] sm:$0xff] (!%p157_p3)   ;;  %vm3540_vm5 = vmor (!%p157_p3), %vm672_vm3, %vm673_vm4 }
   0xd   : > { %2917 = vmatpush3.bf16.msra.mxu0 (!%p157_p3), %v3142_v3  ;;  %2822 = vmatprep.subr.bf16.mxu1 (!%p157_p3), %v3143_v4  ;;  %v3219_v38 = vld [vmem:[%s3857_s1 + $0x220] sm:$0xff] (!%p157_p3)  }
   0xe   : > { %s3869_s12 = smov (!%p191_p4, %s3237_s12), 1  ;;  %2918 = vmatprep.subr.bf16.mxu0 %v3144_v5 }
   0xf   : > { %s3114_s5 = smul.u32 80, %s3869_s12  ;;  %s2382_s7 = sshll.u32 %s3869_s12, 3 }
  0x10   : > { %2823 = vmatpush3.bf16.msra.mxu1 %v3143_v4  ;;  %s212_s10 = scalar_lea.vmem %s3859_s3, %s2382_s7 }
  0x11   : > { %2919 = vmatpush3.bf16.msra.mxu0 %v3144_v5  ;;  %2824 = vmatprep.subr.bf16.mxu1 %v3145_v6  ;;  %s3321_s16 = scalar_lea.vmem %s3856_s0, %s3114_s5 }
  0x12   : > { %2920 = vmatprep.subr.bf16.mxu0 %v3146_v7  ;;  %v3327_v11 = vld [vmem:[%s3321_s16] sm:$0xf]  ;;  %v3330_v12 = vld [vmem:[%s3321_s16 + $0x8] sm:$0xf]  ;;  %v3333_v13 = vld [vmem:[%s3321_s16 + $0x4] sm:$0x1] }
  0x13   : > { %v3339_v15 = vld [vmem:[%s3321_s16 + $0xc] sm:$0x1]  ;;  %v254_v16 = vshrl.u32 %v3327_v11, 16  ;;  %v257_v17 = vshll.u32 %v3327_v11, 16  ;;  %v263_v18 = vshll.u32 %v3333_v13, 16  ;;  %v268_v19 = vshrl.u32 %v3330_v12, 16 }
  0x14   : > { %2825 = vmatpush3.bf16.msra.mxu1 %v3145_v6  ;;  %v271_v20 = vshll.u32 %v3330_v12, 16  ;;  %v277_v21 = vshll.u32 %v3339_v15, 16  ;;  %v2495_v30 = vld [vmem:[%s3321_s16 + $0x8] sm:$0xf]  ;;  %v3355_v31 = vld [vmem:[%s3321_s16 + $0xc] sm:$0x1] }
  0x15   : > { %2921 = vmatpush3.bf16.msra.mxu0 %v3146_v7  ;;  %2826 = vmatprep.subr.bf16.mxu1 %v3147_v8  ;;  %v256_v24 = vrot.slane %v254_v16, 4  ;;  %v259_v25 = vrot.slane %v257_v17, 5  ;;  %v265_v26 = vrot.slane %v263_v18, 5  ;;  %v270_v27 = vrot.slane %v268_v19, 4  ;;  %v2497_v33 = vld [vmem:[%s3321_s16 + $0x10] sm:$0xf] }
  0x16   : > { %2922 = vmatprep.subr.bf16.mxu0 %v3148_v9  ;;  %v273_v28 = vrot.slane %v271_v20, 5  ;;  %v279_v29 = vrot.slane %v277_v21, 5  ;;  %v3359_v34 = vld [vmem:[%s3321_s16 + $0x14] sm:$0x1]  ;;  %v1052_v35 = vshrl.u32 %v2495_v30, 16  ;;  %v1055_v36 = vshll.u32 %v2495_v30, 16 }
  0x17   : > { %v260_v32 = vor.u32 %v259_v25, %v256_v24  ;;  %v1061_v40 = vshll.u32 %v3355_v31, 16  ;;  %v1066_v41 = vshrl.u32 %v2497_v33, 16  ;;  %v1069_v42 = vshll.u32 %v2497_v33, 16  ;;  %v3376_v51 = vld [vmem:[%s3321_s16 + $0x10] sm:$0xf] }
  0x18   : > { %2827 = vmatpush3.bf16.msra.mxu1 %v3147_v8  ;;  %v274_v39 = vor.u32 %v273_v28, %v270_v27  ;;  %v1054_v44 = vrot.slane %v1052_v35, 4  ;;  %v1057_v45 = vrot.slane %v1055_v36, 5  ;;  %v1075_v46 = vshll.u32 %v3359_v34, 16  ;;  %v3381_v55 = vld [vmem:[%s3321_s16 + $0x18] sm:$0xf] }
  0x19   : > { %2923 = vmatpush3.bf16.msra.mxu0 %v3148_v9  ;;  %2828 = vmatprep.subr.bf16.mxu1 %v3149_v10  ;;  %v261_v43 = vrot.slane %v260_v32, 4  ;;  %v1068_v49 = vrot.slane %v1066_v41, 4  ;;  %v1071_v50 = vrot.slane %v1069_v42, 5  ;;  %v1063_v54 = vrot.slane %v1061_v40, 5  ;;  %v3384_v56 = vld [vmem:[%s3321_s16 + $0x14] sm:$0x1] }
  0x1a   : > { %2924 = vmatprep.subr.bf16.mxu0 %v3150_v14  ;;  %v275_v48 = vrot.slane %v274_v39, 4  ;;  %v1058_v53 = vor.u32 %v1057_v45, %v1054_v44  ;;  %v1077_v59 = vrot.slane %v1075_v46, 5  ;;  %v3389_v60 = vld [vmem:[%s3321_s16 + $0x1c] sm:$0x1]  ;;  %v282_v61 = vshrl.u32 %v3376_v51, 16 }
  0x1b   : > { %v266_v52 = vsel %vm3366_vm2, %v261_v43, %v265_v26  ;;  %v1072_v58 = vor.u32 %v1071_v50, %v1068_v49  ;;  %v285_v2 = vshll.u32 %v3376_v51, 16  ;;  %v291_v3 = vshll.u32 %v3384_v56, 16  ;;  %v2499_v8 = vld [vmem:[%s3321_s16 + $0x18] sm:$0xf]  ;;  %v3409_v16 = vld [vmem:[%s3321_s16 + $0x1c] sm:$0x1] }
  0x1c   : > { %2829 = vmatpush3.bf16.msra.mxu1 %v3149_v10  ;;  %v280_v57 = vsel %vm3366_vm2, %v275_v48, %v279_v29  ;;  %v1059_v0 = vrot.slane %v1058_v53, 4  ;;  %v284_v5 = vrot.slane %v282_v61, 4  ;;  %v296_v6 = vshrl.u32 %v3381_v55, 16  ;;  %v2501_v17 = vld [vmem:[%s3321_s16 + $0x20] sm:$0xf]  ;;  %v3157_v43 = vld [vmem:[%s3857_s1 + $0x8] sm:$0xff]  }
  0x1d   : > { %2925 = vmatpush3.bf16.msra.mxu0 %v3150_v14  ;;  %2830 = vmatprep.subr.bf16.mxu1 %v3151_v22  ;;  %v2399_v62 = vcombine.low %v266_v52, %v280_v57  ;;  %v1073_v4 = vrot.slane %v1072_v58, 4  ;;  %v299_v7 = vshll.u32 %v3381_v55, 16  ;;  %v287_v10 = vrot.slane %v285_v2, 5  ;;  %v3415_v21 = vld [vmem:[%s3321_s16 + $0x24] sm:$0x1] }
  0x1e   : > { %2926 = vmatprep.subr.bf16.mxu0 %v3152_v23  ;;  %v1064_v9 = vsel %vm3366_vm2, %v1059_v0, %v1063_v54  ;;  %v305_v14 = vshll.u32 %v3389_v60, 16  ;;  %v298_v19 = vrot.slane %v296_v6, 4  ;;  %v293_v24 = vrot.slane %v291_v3, 5  ;;  %v3158_v54 = vld [vmem:[%s3857_s1 + $0x148] sm:$0xff]   ;;  %v3445_v0 = vld [vmem:[%s3321_s16 + $0x24] sm:$0x1] }
  0x1f   : > { %2834 = vmatprep.mubr.bf16.mxu1 %v2399_v62  ;;  %v1078_v18 = vsel %vm3366_vm2, %v1073_v4, %v1077_v59  ;;  %v301_v20 = vrot.slane %v299_v7, 5  ;;  %v1080_v27 = vshrl.u32 %v2499_v8, 16  ;;  %v1083_v28 = vshll.u32 %v2499_v8, 16  ;;  %v3159_v59 = vld [vmem:[%s3857_s1 + $0x10] sm:$0xff]   ;;  %v3439_v62 = vld [vmem:[%s3321_s16 + $0x20] sm:$0xf] }
  0x20   : > { %2831 = vmatpush3.bf16.msra.mxu1 %v3151_v22  ;;  %v2527_v22 = vcombine.low %v1064_v9, %v1078_v18  ;;  %v307_v25 = vrot.slane %v305_v14, 5  ;;  %v1089_v29 = vshll.u32 %v3409_v16, 16  ;;  %v1094_v32 = vshrl.u32 %v2501_v17, 16  ;;  %v3448_v2 = vld [vmem:[%s3321_s16 + $0x2c] sm:$0x1]  ;;  %v3160_v9 = vld [vmem:[%s3857_s1 + $0x150] sm:$0xff]  }
  0x21   : > { %2927 = vmatpush3.bf16.msra.mxu0 %v3152_v23  ;;  %2832 = vmatprep.subr.bf16.mxu1 %v3153_v37  ;;  %v288_v23 = vor.u32 %v287_v10, %v284_v5  ;;  %v302_v26 = vor.u32 %v301_v20, %v298_v19  ;;  %v1097_v33 = vshll.u32 %v2501_v17, 16  ;;  %v1103_v35 = vshll.u32 %v3415_v21, 16  ;;  %v3161_v10 = vld [vmem:[%s3857_s1 + $0x18] sm:$0xff]  }
  0x22   : > { %2928 = vmatprep.subr.bf16.mxu0 %v3154_v47  ;;  %2930 = vmatprep.mubr.bf16.mxu0 %v2527_v22  ;;  %v1085_v39 = vrot.slane %v1083_v28, 5  ;;  %v1096_v41 = vrot.slane %v1094_v32, 4  ;;  %v1091_v46 = vrot.slane %v1089_v29, 5  ;;  %v1343_v57 = vrot.slane %v3355_v31, 5  ;;  %v3162_v29 = vld [vmem:[%s3857_s1 + $0x158] sm:$0xff]  }
  0x23   : > { %v289_v30 = vrot.slane %v288_v23, 4  ;;  %v303_v36 = vrot.slane %v302_v26, 4  ;;  %v1099_v42 = vrot.slane %v1097_v33, 5  ;;  %v310_v3 = vshrl.u32 %v3439_v62, 16  ;;  %v2503_v23 = vld [vmem:[%s3321_s16 + $0x28] sm:$0xf] }
  0x24   : > { %2833 = vmatpush3.bf16.msra.mxu1 %v3153_v37  ;;  %v1082_v37 = vrot.slane %v1080_v27, 4  ;;  %v313_v4 = vshll.u32 %v3439_v62, 16  ;;  %v319_v5 = vshll.u32 %v3445_v0, 16  ;;  %v333_v8 = vshll.u32 %v3448_v2, 16  ;;  %v3469_v26 = vld [vmem:[%s3321_s16 + $0x34] sm:$0x1] }
  0x25   : > { %2929 = vmatpush3.bf16.msra.mxu0 %v3154_v47  ;;  %2842 = vmatprep.subr.bf16.mxu1 %v3155_v63  ;;  %v294_v40 = vsel %vm3366_vm2, %v289_v30, %v293_v24  ;;  %v308_v44 = vsel %vm3366_vm2, %v303_v36, %v307_v25  ;;  %v1105_v47 = vrot.slane %v1103_v35, 5  ;;  %v1100_v49 = vor.u32 %v1099_v42, %v1096_v41  ;;  %v3465_v24 = vld [vmem:[%s3321_s16 + $0x2c] sm:$0x1]  ;;  %v2505_v25 = vld [vmem:[%s3321_s16 + $0x30] sm:$0xf]  ;;  %v3163_v30 = vld [vmem:[%s3857_s1 + $0x20] sm:$0xff]  }
  0x26   : > { %2938 = vmatprep.subr.bf16.mxu0 %v3398_v1  ;;  %v1086_v45 = vor.u32 %v1085_v39, %v1082_v37  ;;  %v2400_v48 = vcombine.low %v294_v40, %v308_v44  ;;  %v312_v14 = vrot.slane %v310_v3, 4  ;;  %v315_v17 = vrot.slane %v313_v4, 5 }
  0x27   : > { %v1101_v52 = vrot.slane %v1100_v49, 4  ;;  %v321_v18 = vrot.slane %v319_v5, 5  ;;  %v335_v22 = vrot.slane %v333_v8, 5  ;;  %v1108_v27 = vshrl.u32 %v2503_v23, 16  ;;  %v2507_v5 = vld [vmem:[%s3321_s16 + $0x38] sm:$0xf] }
  0x28   : > { %v1087_v50 = vrot.slane %v1086_v45, 4  ;;  %2835 = vmatmul.mubr.bf16.vlgmr.msra.gmra.mrb[0].mxu1 %v2400_v48  ;;  %v1111_v28 = vshll.u32 %v2503_v23, 16  ;;  %v1117_v33 = vshll.u32 %v3465_v24, 16  ;;  %v1122_v35 = vshrl.u32 %v2505_v25, 16 }
  0x29   : > { %2843 = vmatpush3.bf16.msra.mxu1 %v3155_v63  ;;  %v1106_v58 = vsel %vm3366_vm2, %v1101_v52, %v1105_v47  ;;  %v3442_v63 = vld [vmem:[%s3321_s16 + $0x28] sm:$0xf]  ;;  %v1125_v36 = vshll.u32 %v2505_v25, 16  ;;  %v1110_v39 = vrot.slane %v1108_v27, 4  ;;  %v1131_v41 = vshll.u32 %v3469_v26, 16 }
  0x2a   : > { %v1092_v53 = vsel %vm3366_vm2, %v1087_v50, %v1091_v46  ;;  %2844 = vmatprep.subr.bf16.mxu1 %v3157_v43  ;;  %v324_v6 = vshrl.u32 %v3442_v63, 16  ;;  %v327_v7 = vshll.u32 %v3442_v63, 16  ;;  %v1113_v40 = vrot.slane %v1111_v28, 5  ;;  %v3480_v46 = vld [vmem:[%s3321_s16 + $0x30] sm:$0xf] }
  0x2b   : > { %v2528_v61 = vcombine.low %v1092_v53, %v1106_v58  ;;  %v1124_v44 = vrot.slane %v1122_v35, 4  ;;  %v1127_v45 = vrot.slane %v1125_v36, 5  ;;  %v1133_v49 = vrot.slane %v1131_v41, 5  ;;  %v3485_v50 = vld [vmem:[%s3321_s16 + $0x38] sm:$0xf] }
  0x2c   : > { %v326_v19 = vrot.slane %v324_v6, 4  ;;  %v329_v20 = vrot.slane %v327_v7, 5  ;;  %v1114_v48 = vor.u32 %v1113_v40, %v1110_v39  ;;  %v3488_v52 = vld [vmem:[%s3321_s16 + $0x34] sm:$0x1]  ;;  %v338_v53 = vshrl.u32 %v3480_v46, 16  ;;  %v3165_v6 = vld [vmem:[%s3857_s1 + $0x28] sm:$0xff]  }
  0x2d   : > { %2931 = vmatmul.mubr.bf16.vlgmr.msra.gmra.mrb[0].mxu0 %v2528_v61  ;;  %2845 = vmatpush3.bf16.msra.mxu1 %v3157_v43  ;;  %v1119_v43 = vrot.slane %v1117_v33, 5  ;;  %v3497_v61 = vld [vmem:[%s3321_s16 + $0x3c] sm:$0x1]  ;;  %v341_v3 = vshll.u32 %v3480_v46, 16  ;;  %v347_v4 = vshll.u32 %v3488_v52, 16  ;;  %v1136_v28 = vshrl.u32 %v2507_v5, 16 }
  0x2e   : > { %2939 = vmatpush3.bf16.msra.mxu0 %v3398_v1  ;;  %2846 = vmatprep.subr.bf16.mxu1 %v3159_v59  ;;  %v316_v1 = vor.u32 %v315_v17, %v312_v14  ;;  %v330_v32 = vor.u32 %v329_v20, %v326_v19  ;;  %v1115_v8 = vrot.slane %v1114_v48, 4  ;;  %v352_v14 = vshrl.u32 %v3485_v50, 16  ;;  %v3507_v17 = vld [vmem:[%s3321_s16 + $0x3c] sm:$0x1]  ;;  %v3515_v27 = vld [vmem:[%s3321_s16 + $0x44] sm:$0x1] }
  0x2f   : > { %2940 = vmatprep.subr.bf16.mxu0 %v3158_v54  ;;  %v343_v19 = vrot.slane %v341_v3, 5  ;;  %v349_v20 = vrot.slane %v347_v4, 5  ;;  %v361_v25 = vshll.u32 %v3497_v61, 16  ;;  %v1139_v36 = vshll.u32 %v2507_v5, 16 }
  0x30   : > { %v317_v37 = vrot.slane %v316_v1, 4  ;;  %v331_v42 = vrot.slane %v330_v32, 4  ;;  %v1120_v23 = vsel %vm3366_vm2, %v1115_v8, %v1119_v43  ;;  %v354_v1 = vrot.slane %v352_v14, 4 }
  0x31   : > { %2847 = vmatpush3.bf16.msra.mxu1 %v3159_v59  ;;  %v1128_v59 = vor.u32 %v1127_v45, %v1124_v44  ;;  %v363_v40 = vrot.slane %v361_v25, 5  ;;  %v1138_v41 = vrot.slane %v1136_v28, 4  ;;  %v1141_v45 = vrot.slane %v1139_v36, 5  ;;  %v2541_v25 = vld [vmem:[%s3321_s16 + $0x18] sm:$0xe] }
  0x32   : > { %2941 = vmatpush3.bf16.msra.mxu0 %v3158_v54  ;;  %2848 = vmatprep.subr.bf16.mxu1 %v3161_v10  ;;  %v322_v47 = vsel %vm3366_vm2, %v317_v37, %v321_v18  ;;  %v3164_v54 = vld [vmem:[%s3857_s1 + $0x160] sm:$0xff]   ;;  %v336_v58 = vsel %vm3366_vm2, %v331_v42, %v335_v22  ;;  %v355_v22 = vshll.u32 %v3485_v50, 16  ;;  %v3167_v37 = vld [vmem:[%s3857_s1 + $0x30] sm:$0xff]   ;;  %v1145_v42 = vshll.u32 %v3507_v17, 16  ;;  %v3170_v28 = vld [vmem:[%s3857_s1 + $0x178] sm:$0xff]  }
  0x33   : > { %2942 = vmatprep.subr.bf16.mxu0 %v3160_v9  ;;  %v2401_v7 = vcombine.low %v322_v47, %v336_v58  ;;  %v1129_v18 = vrot.slane %v1128_v59, 4  ;;  %v1347_v47 = vrot.slane %v3359_v34, 5  ;;  %v1351_v48 = vrot.slane %v3409_v16, 5  ;;  %v3168_v58 = vld [vmem:[%s3857_s1 + $0x170] sm:$0xff]  }
  0x34   : > { %v357_v35 = vrot.slane %v355_v22, 5  ;;  %v1142_v4 = vor.u32 %v1141_v45, %v1138_v41  ;;  %v1147_v34 = vrot.slane %v1145_v42, 5  ;;  %v1355_v22 = vrot.slane %v3415_v21, 5  ;;  %v3173_v41 = vld [vmem:[%s3857_s1 + $0x180] sm:$0xff]  }
  0x35   : > { %2849 = vmatpush3.bf16.msra.mxu1 %v3161_v10  ;;  %v340_v10 = vrot.slane %v338_v53, 4  ;;  %2838 = vmatprep.mubr.bf16.mxu1 %v2401_v7  ;;  %v1134_v32 = vsel %vm3366_vm2, %v1129_v18, %v1133_v49  ;;  %v1159_v53 = vshll.u32 %v3515_v27, 16  ;;  %v2539_v7 = vld [vmem:[%s3321_s16 + $0x8] sm:$0xe]  ;;  %v2549_v36 = vrot.slane %v2541_v25, 9 }
  0x36   : > { %2943 = vmatpush3.bf16.msra.mxu0 %v3160_v9  ;;  %2850 = vmatprep.subr.bf16.mxu1 %v3163_v30  ;;  %v2509_v9 = vld [vmem:[%s3321_s16 + $0x40] sm:$0xf]  ;;  %v2529_v39 = vcombine.low %v1120_v23, %v1134_v32  ;;  %v358_v44 = vor.u32 %v357_v35, %v354_v1  ;;  %v2547_v14 = vrot.slane %v2539_v7, 9  ;;  %v1143_v18 = vrot.slane %v1142_v4, 4 }
  0x37   : > { %2944 = vmatprep.subr.bf16.mxu0 %v3162_v29  ;;  %v344_v33 = vor.u32 %v343_v19, %v340_v10  ;;  %v1153_v49 = vshll.u32 %v2509_v9, 16  ;;  %v2540_v10 = vld [vmem:[%s3321_s16 + $0x10] sm:$0xe]  ;;  %v2411_v19 = vcombine.low %v3327_v11, %v3330_v12  ;;  %v1161_v1 = vrot.slane %v1159_v53, 5  ;;  %v2542_v12 = vld [vmem:[%s3321_s16 + $0x20] sm:$0xe] }
  0x38   : > { %2934 = vmatprep.mubr.bf16.mxu0 %v2529_v39  ;;  %v359_v3 = vrot.slane %v358_v44, 4  ;;  %v1344_v32 = vsel %vm3540_vm5, %v2547_v14, %v1343_v57  ;;  %v1148_v21 = vsel %vm3366_vm2, %v1143_v18, %v1147_v34  ;;  %v3172_v35 = vld [vmem:[%s3857_s1 + $0x80] sm:$0xff]   ;;  %v1352_v42 = vsel %vm3540_vm5, %v2549_v36, %v1351_v48  ;;  %v3177_v44 = vld [vmem:[%s3857_s1 + $0x90] sm:$0xff]  }
  0x39   : > { %2851 = vmatpush3.bf16.msra.mxu1 %v3163_v30  ;;  %v3166_v30 = vld [vmem:[%s3857_s1 + $0x168] sm:$0xff]   ;;  %v345_v43 = vrot.slane %v344_v33, 4  ;;  %v1155_v16 = vrot.slane %v1153_v49, 5  ;;  %v1359_v45 = vrot.slane %v3465_v24, 5  ;;  %v1367_v53 = vrot.slane %v3507_v17, 5  ;;  %v3181_v18 = vld [vmem:[%s3857_s1 + $0xa0] sm:$0xff]  }
  0x3a   : > { %2945 = vmatpush3.bf16.msra.mxu0 %v3162_v29  ;;  %2852 = vmatprep.subr.bf16.mxu1 %v3165_v6  ;;  %v1150_v29 = vshrl.u32 %v2509_v9, 16  ;;  %v1371_v24 = vrot.slane %v3515_v27, 5  ;;  %v681_v34 = vrot.slane %v3339_v15, 5  ;;  %v685_v17 = vrot.slane %v3384_v56, 5  ;;  %v649_v15 = vld [vmem:[%s3321_s16 + $0x8] sm:$0xe] }
  0x3b   : > { %2946 = vmatprep.subr.bf16.mxu0 %v3164_v54  ;;  %v350_v59 = vsel %vm3366_vm2, %v345_v43, %v349_v20  ;;  %v2548_v20 = vrot.slane %v2540_v10, 9  ;;  %v3175_v43 = vld [vmem:[%s3857_s1 + $0x88] sm:$0xff]   ;;  %v3178_v10 = vld [vmem:[%s3857_s1 + $0x190] sm:$0xff]   ;;  %v2424_v14 = vrot.slane %v649_v15, 9  ;;  %v693_v36 = vrot.slane %v3445_v0, 5  ;;  %v3191_v0 = vld [vmem:[%s3857_s1 + $0xc0] sm:$0xff]  }
  0x3c   : > { %v1152_v5 = vrot.slane %v1150_v29, 4  ;;  %v1363_v29 = vrot.slane %v3469_v26, 5  ;;  %v2414_v26 = vcombine.low %v3480_v46, %v3485_v50  ;;  %v3179_v46 = vld [vmem:[%s3857_s1 + $0x98] sm:$0xff]   ;;  %v3196_v15 = vld [vmem:[%s3857_s1 + $0x1c8] sm:$0xff]  }
  0x3d   : > { %2853 = vmatpush3.bf16.msra.mxu1 %v3165_v6  ;;  %v3169_v6 = vld [vmem:[%s3857_s1 + $0x38] sm:$0xff]   ;;  %v1348_v11 = vsel %vm3540_vm5, %v2548_v20, %v1347_v47 }
  0x3e   : > { %2947 = vmatpush3.bf16.msra.mxu0 %v3164_v54  ;;  %2854 = vmatprep.subr.bf16.mxu1 %v3167_v37  ;;  %v364_v54 = vsel %vm3366_vm2, %v359_v3, %v363_v40  ;;  %v1156_v23 = vor.u32 %v1155_v16, %v1152_v5  ;;  %v2571_v57 = vcombine.low %v1344_v32, %v1348_v11  ;;  %v648_v16 = vld [vmem:[%s3321_s16] sm:$0xe]  ;;  %v3180_v20 = vld [vmem:[%s3857_s1 + $0x198] sm:$0xff]  }
  0x3f   : > { %2948 = vmatprep.subr.bf16.mxu0 %v3166_v30  ;;  %v2402_v9 = vcombine.low %v350_v59, %v364_v54  ;;  %v2412_v40 = vcombine.low %v3376_v51, %v3381_v55  ;;  %v2413_v51 = vcombine.low %v3439_v62, %v3442_v63  ;;  %v677_v55 = vrot.slane %v3333_v13, 5  ;;  %v3176_v62 = vld [vmem:[%s3857_s1 + $0x188] sm:$0xff]   ;;  %v2544_v63 = vld [vmem:[%s3321_s16 + $0x30] sm:$0xe]  ;;  %v2546_v59 = vld [vmem:[%s3321_s16 + $0x40] sm:$0xe] }
  0x40   : > { %v1157_v33 = vrot.slane %v1156_v23, 4  ;;  %v2543_v13 = vld [vmem:[%s3321_s16 + $0x28] sm:$0xe]  ;;  %v2552_v49 = vrot.slane %v2544_v63, 9  ;;  %v2554_v7 = vrot.slane %v2546_v59, 9  ;;  %v2423_v56 = vrot.slane %v648_v16, 9 }
  0x41   : > { %2855 = vmatpush3.bf16.msra.mxu1 %v3167_v37  ;;  %v2550_v37 = vrot.slane %v2542_v12, 9  ;;  %v2551_v48 = vrot.slane %v2543_v13, 9  ;;  %v689_v54 = vrot.slane %v3389_v60, 5  ;;  %v650_v23 = vld [vmem:[%s3321_s16 + $0x10] sm:$0xe] }
  0x42   : > { %2949 = vmatpush3.bf16.msra.mxu0 %v3166_v30  ;;  %2839 = vmatmul.mubr.bf16.gmra.mrb[4].mxu1 %v2402_v9  ;;  %v1162_v31 = vsel %vm3366_vm2, %v1157_v33, %v1161_v1  ;;  %v1364_v4 = vsel %vm3540_vm5, %v2552_v49, %v1363_v29  ;;  %v682_v9 = vsel %vm3540_vm5, %v2424_v14, %v681_v34  ;;  %v651_v60 = vld [vmem:[%s3321_s16 + $0x18] sm:$0xe]  ;;  %v2425_v25 = vrot.slane %v650_v23, 9  ;;  %v3183_v33 = vld [vmem:[%s3857_s1 + $0xa8] sm:$0xff]  }
  0x43   : > { %2950 = vmatprep.subr.bf16.mxu0 %v3168_v58  ;;  %2856 = vmatprep.subr.bf16.mxu1 %v3169_v6  ;;  %v2530_v39 = vcombine.low %v1148_v21, %v1162_v31  ;;  %v1356_v30 = vsel %vm3540_vm5, %v2550_v37, %v1355_v22  ;;  %v1360_v3 = vsel %vm3540_vm5, %v2551_v48, %v1359_v45  ;;  %v3192_v32 = vld [vmem:[%s3321_s16 + $0x10] ss:$8 sps:$4 sm:$0xff]   ;;  %v701_v29 = vrot.slane %v3488_v52, 5  ;;  %v3195_v49 = vld [vmem:[%s3857_s1 + $0xc8] sm:$0xff]  }
  0x44   : > { %2858 = vmatprep.mubr.bf16.mxu1 %v2411_v19  ;;  %v2572_v47 = vcombine.low %v1352_v42, %v1356_v30  ;;  %v2573_v27 = vcombine.low %v1360_v3, %v1364_v4  ;;  %v678_v19 = vsel %vm3540_vm5, %v2423_v56, %v677_v55  ;;  %v686_v11 = vsel %vm3540_vm5, %v2425_v25, %v685_v17  ;;  %v3186_v31 = vld [vmem:[%s3857_s1 + $0xb0] sm:$0xff]   ;;  %v3189_v37 = vld [vmem:[%s3857_s1 + $0xb8] sm:$0xff]   ;;  %v2625_v25 = vld [vmem:[%s3321_s16 + $0x28] sm:$0xf] }
  0x45   : > { %2857 = vmatpush3.bf16.msra.mxu1 %v3169_v6  ;;  %2935 = vmatmul.mubr.bf16.gmra.mrb[4].mxu0 %v2530_v39  ;;  %v1372_v6 = vsel %vm3540_vm5, %v2554_v7, %v1371_v24  ;;  %v2447_v1 = vcombine.low %v678_v19, %v682_v9  ;;  %v652_v39 = vld [vmem:[%s3321_s16 + $0x20] sm:$0xe]  ;;  %v3190_v45 = vld [vmem:[%s3857_s1 + $0x1b8] sm:$0xff]   ;;  %v3679_v24 = vld [vmem:[%s3321_s16 + $0x14] sm:$0x1] }
  0x46   : > { %2951 = vmatpush3.bf16.msra.mxu0 %v3168_v58  ;;  %2866 = vmatprep.subr.bf16.mxu1 %v3172_v35  ;;  %v2545_v58 = vld [vmem:[%s3321_s16 + $0x38] sm:$0xe]  ;;  %v2427_v42 = vrot.slane %v652_v39, 9  ;;  %v1727_v59 = vshll.u32 %v3679_v24, 16  ;;  %v3194_v7 = vld [vmem:[%s3321_s16 + $0x20] ss:$8 sps:$4 sm:$0xff]  }
  0x47   : > { %2952 = vmatprep.subr.bf16.mxu0 %v3170_v28  ;;  %2954 = vmatprep.mubr.bf16.mxu0 %v2571_v57  ;;  %v2553_v5 = vrot.slane %v2545_v58, 9  ;;  %v3184_v57 = vld [vmem:[%s3857_s1 + $0x1a8] sm:$0xff]   ;;  %v2621_v52 = vld [vmem:[%s3321_s16 + $0x18] sm:$0xf]  ;;  %v3198_v9 = vld [vmem:[%s3857_s1 + $0x1d0] sm:$0xff]  }
  0x48   : > { %v1732_v3 = vshrl.u32 %v2621_v52, 16  ;;  %v1735_v4 = vshll.u32 %v2621_v52, 16  ;;  %v3205_v56 = vld [vmem:[%s3321_s16 + $0x30] ss:$8 sps:$4 sm:$0xff]   ;;  %v3204_v52 = vld [vmem:[%s3857_s1 + $0x1e8] sm:$0xff]  }
  0x49   : > { %v1368_v50 = vsel %vm3540_vm5, %v2553_v5, %v1367_v53  ;;  %v2619_v53 = vld [vmem:[%s3321_s16 + $0x10] sm:$0xf]  ;;  %v3199_v23 = vld [vmem:[%s3857_s1 + $0xd8] sm:$0xff]  }
  0x4a   : > { %2953 = vmatpush3.bf16.msra.mxu0 %v3170_v28  ;;  %2859 = vmatmul.mubr.bf16.vlgmr.msra.gmra.mrb[0].mxu1 %v2412_v40  ;;  %v2574_v22 = vcombine.low %v1368_v50, %v1372_v6  ;;  %v2426_v28 = vrot.slane %v651_v60, 9  ;;  %v653_v40 = vld [vmem:[%s3321_s16 + $0x28] sm:$0xe]  ;;  %v1721_v58 = vshll.u32 %v2619_v53, 16  ;;  %v1734_v50 = vrot.slane %v1732_v3, 4 }
  0x4b   : > { %2962 = vmatprep.subr.bf16.mxu0 %v3173_v41  ;;  %2867 = vmatpush3.bf16.msra.mxu1 %v3172_v35  ;;  %v3182_v35 = vld [vmem:[%s3857_s1 + $0x1a0] sm:$0xff]   ;;  %v2428_v30 = vrot.slane %v653_v40, 9  ;;  %v1737_v6 = vrot.slane %v1735_v4, 5 }
  0x4c   : > { %2868 = vmatprep.subr.bf16.mxu1 %v3175_v43  ;;  %2862 = vmatprep.mubr.bf16.mxu1 %v2413_v51  ;;  %v690_v12 = vsel %vm3540_vm5, %v2426_v28, %v689_v54  ;;  %v654_v51 = vld [vmem:[%s3321_s16 + $0x30] sm:$0xe]  ;;  %v1723_v16 = vrot.slane %v1721_v58, 5  ;;  %v1729_v54 = vrot.slane %v1727_v59, 5 }
  0x4d   : > { %2955 = vmatmul.mubr.bf16.vlgmr.msra.gmra.mrb[0].mxu0 %v2572_v47  ;;  %v2448_v21 = vcombine.low %v686_v11, %v690_v12  ;;  %v705_v47 = vrot.slane %v3497_v61, 5  ;;  %v2429_v63 = vrot.slane %v654_v51, 9  ;;  %v3683_v61 = vld [vmem:[%s3321_s16 + $0x1c] sm:$0x1]  ;;  %v3207_v11 = vld [vmem:[%s3321_s16 + $0x40] ss:$8 sps:$4 sm:$0xff]  }
  0x4e   : > { %2963 = vmatpush3.bf16.msra.mxu0 %v3173_v41  ;;  %2958 = vmatprep.mubr.bf16.mxu0 %v2573_v27  ;;  %v697_v41 = vrot.slane %v3448_v2, 5  ;;  %v694_v2 = vsel %vm3540_vm5, %v2427_v42, %v693_v36  ;;  %v1741_v5 = vshll.u32 %v3683_v61, 16  ;;  %v2627_v12 = vld [vmem:[%s3321_s16 + $0x30] sm:$0xf]  ;;  %v1763_v36 = vshll.u32 %v2625_v25, 16 }
  0x4f   : > { %2869 = vmatpush3.bf16.msra.mxu1 %v3175_v43  ;;  %2964 = vmatprep.subr.bf16.mxu0 %v3176_v62  ;;  %v3187_v43 = vld [vmem:[%s3857_s1 + $0x1b0] sm:$0xff]   ;;  %v702_v34 = vsel %vm3540_vm5, %v2429_v63, %v701_v29  ;;  %v1774_v40 = vshrl.u32 %v2627_v12, 16  ;;  %v3728_v51 = vld [vmem:[%s3321_s16 + $0x24] sm:$0x1] }
  0x50   : > { %2870 = vmatprep.subr.bf16.mxu1 %v3177_v44  ;;  %v698_v55 = vsel %vm3540_vm5, %v2428_v30, %v697_v41  ;;  %v1743_v19 = vrot.slane %v1741_v5, 5  ;;  %v1777_v41 = vshll.u32 %v2627_v12, 16  ;;  %v1765_v29 = vrot.slane %v1763_v36, 5  ;;  %v2633_v5 = vld [vmem:[%s3321_s16 + $0x48] sm:$0xf]  ;;  %v3210_v12 = vld [vmem:[%s3857_s1 + $0x1f8] sm:$0xff]  }
  0x51   : > { %v2449_v13 = vcombine.low %v694_v2, %v698_v55  ;;  %v3731_v2 = vld [vmem:[%s3321_s16 + $0x2c] sm:$0x1]  ;;  %v1755_v58 = vshll.u32 %v3728_v51, 16 }
  0x52   : > { %2863 = vmatmul.mubr.bf16.gmra.mrb[4].mxu1 %v2414_v26  ;;  %2965 = vmatpush3.bf16.msra.mxu0 %v3176_v62  ;;  %v3193_v62 = vld [vmem:[%s3857_s1 + $0x1c0] sm:$0xff]   ;;  %v1718_v26 = vshrl.u32 %v2619_v53, 16  ;;  %v1779_v63 = vrot.slane %v1777_v41, 5  ;;  %v1769_v59 = vshll.u32 %v3731_v2, 16 }
  0x53   : > { %2871 = vmatpush3.bf16.msra.mxu1 %v3177_v44  ;;  %2966 = vmatprep.subr.bf16.mxu0 %v3178_v10  ;;  %v655_v44 = vld [vmem:[%s3321_s16 + $0x38] sm:$0xe]  ;;  %v2631_v53 = vld [vmem:[%s3321_s16 + $0x40] sm:$0xf] }
  0x54   : > { %2872 = vmatprep.subr.bf16.mxu1 %v3179_v46  ;;  %2882 = vmatprep.mubr.bf16.mxu1 %v2447_v1  ;;  %v2430_v48 = vrot.slane %v655_v44, 9  ;;  %v1720_v27 = vrot.slane %v1718_v26, 4  ;;  %v2623_v1 = vld [vmem:[%s3321_s16 + $0x20] sm:$0xf]  ;;  %v3206_v26 = vld [vmem:[%s3857_s1 + $0xf0] sm:$0xff]  }
  0x55   : > { %2959 = vmatmul.mubr.bf16.gmra.mrb[4].mxu0 %v2574_v22 }
  0x56   : > { %2967 = vmatpush3.bf16.msra.mxu0 %v3178_v10  ;;  %2978 = vmatprep.mubr.bf16.mxu0 %v3192_v32  ;;  %v706_v17 = vsel %vm3540_vm5, %v2430_v48, %v705_v47  ;;  %v1724_v10 = vor.u32 %v1723_v16, %v1720_v27  ;;  %v3734_v47 = vld [vmem:[%s3321_s16 + $0x34] sm:$0x1]  ;;  %v1805_v27 = vshll.u32 %v2631_v53, 16 }
  0x57   : > { %2873 = vmatpush3.bf16.msra.mxu1 %v3179_v46  ;;  %2968 = vmatprep.subr.bf16.mxu0 %v3180_v20  ;;  %v3197_v46 = vld [vmem:[%s3857_s1 + $0xd0] sm:$0xff]   ;;  %v2450_v14 = vcombine.low %v702_v34, %v706_v17  ;;  %v1783_v3 = vshll.u32 %v3734_v47, 16  ;;  %v1802_v17 = vshrl.u32 %v2631_v53, 16  ;;  %v2664_v53 = vld [vmem:[%s3321_s16 + $0x18] sm:$0xe] }
  0x58   : > { %2874 = vmatprep.subr.bf16.mxu1 %v3181_v18  ;;  %v1725_v22 = vrot.slane %v1724_v10, 4 }
  0x5a   : > { %2969 = vmatpush3.bf16.msra.mxu0 %v3180_v20  ;;  %v3211_v20 = vld [vmem:[%s3321_s16 + $0x8] ss:$8 sps:$4 sm:$0xff]   ;;  %v1730_v28 = vsel %vm3366_vm2, %v1725_v22, %v1729_v54 }
  0x5b   : > { %2875 = vmatpush3.bf16.msra.mxu1 %v3181_v18  ;;  %2970 = vmatprep.subr.bf16.mxu0 %v3182_v35  ;;  %v1738_v18 = vor.u32 %v1737_v6, %v1734_v50  ;;  %v1816_v50 = vshrl.u32 %v2633_v5, 16  ;;  %v1819_v6 = vshll.u32 %v2633_v5, 16  ;;  %v2672_v5 = vrot.slane %v2664_v53, 9 }
  0x5c   : > { %2876 = vmatprep.subr.bf16.mxu1 %v3183_v33 }
  0x5d   : > { %v1739_v60 = vrot.slane %v1738_v18, 4  ;;  %v1771_v18 = vrot.slane %v1769_v59, 5  ;;  %v3216_v59 = vld [vmem:[%s3321_s16 + $0x38] ss:$8 sps:$4 sm:$0xff]  }
  0x5e   : > { %2971 = vmatpush3.bf16.msra.mxu0 %v3182_v35  ;;  %v1746_v35 = vshrl.u32 %v2623_v1, 16 }
  0x5f   : > { %2877 = vmatpush3.bf16.msra.mxu1 %v3183_v33  ;;  %2972 = vmatprep.subr.bf16.mxu0 %v3184_v57  ;;  %v1744_v32 = vsel %vm3366_vm2, %v1739_v60, %v1743_v19  ;;  %v3201_v33 = vld [vmem:[%s3857_s1 + $0xe0] sm:$0xff]   ;;  %v3761_v60 = vld [vmem:[%s3321_s16 + $0x4c] sm:$0x1] }
  0x60   : > { %2878 = vmatprep.subr.bf16.mxu1 %v3186_v31  ;;  %v2651_v39 = vcombine.low %v1730_v28, %v1744_v32  ;;  %v1748_v55 = vrot.slane %v1746_v35, 4  ;;  %v1818_v28 = vrot.slane %v1816_v50, 4  ;;  %v1821_v32 = vrot.slane %v1819_v6, 5  ;;  %v3212_v35 = vld [vmem:[%s3321_s16 + $0x18] ss:$8 sps:$4 sm:$0xff]   ;;  %v3220_v6 = vld [vmem:[%s3857_s1 + $0x228] sm:$0xff]  }
  0x62   : > { %2973 = vmatpush3.bf16.msra.mxu0 %v3184_v57  ;;  %v1760_v57 = vshrl.u32 %v2625_v25, 16  ;;  %v1807_v25 = vrot.slane %v1805_v27, 5 }
  0x63   : > { %2879 = vmatpush3.bf16.msra.mxu1 %v3186_v31  ;;  %2974 = vmatprep.subr.bf16.mxu0 %v3187_v43  ;;  %v1749_v31 = vshll.u32 %v2623_v1, 16  ;;  %v1804_v1 = vrot.slane %v1802_v17, 4 }
  0x64   : > { %2880 = vmatprep.subr.bf16.mxu1 %v3189_v37 }
  0x65   : > { %v1751_v44 = vrot.slane %v1749_v31, 5 }
  0x66   : > { %2975 = vmatpush3.bf16.msra.mxu0 %v3187_v43  ;;  %v3202_v43 = vld [vmem:[%s3857_s1 + $0x1e0] sm:$0xff]  }
  0x67   : > { %2881 = vmatpush3.bf16.msra.mxu1 %v3189_v37  ;;  %2976 = vmatprep.subr.bf16.mxu0 %v3190_v45  ;;  %v3200_v37 = vld [vmem:[%s3857_s1 + $0x1d8] sm:$0xff]  }
  0x68   : > { %2890 = vmatprep.subr.bf16.mxu1 %v3191_v0 }
  0x6a   : > { %2883 = vmatmul.mubr.bf16.vlgmr.msra.gmra.mrb[0].mxu1 %v2448_v21  ;;  %2977 = vmatpush3.bf16.msra.mxu0 %v3190_v45  ;;  %v2629_v21 = vld [vmem:[%s3321_s16 + $0x38] sm:$0xf]  ;;  %v1762_v45 = vrot.slane %v1760_v57, 4 }
  0x6b   : > { %2891 = vmatpush3.bf16.msra.mxu1 %v3191_v0  ;;  %2886 = vmatprep.mubr.bf16.mxu1 %v2449_v13  ;;  %v1788_v42 = vshrl.u32 %v2629_v21, 16  ;;  %v1791_v30 = vshll.u32 %v2629_v21, 16  ;;  %v3203_v0 = vld [vmem:[%s3857_s1 + $0xe8] sm:$0xff]   ;;  %v1776_v13 = vrot.slane %v1774_v40, 4  ;;  %v2667_v21 = vld [vmem:[%s3321_s16 + $0x30] sm:$0xe] }
  0x6c   : > { %2892 = vmatprep.subr.bf16.mxu1 %v3195_v49  ;;  %2986 = vmatprep.subr.bf16.mxu0 %v3193_v62  ;;  %v1766_v34 = vor.u32 %v1765_v29, %v1762_v45 }
  0x6d   : > { %2979 = vmatmul.mubr.bf16.vlgmr.msra.gmra.mrb[0].mxu0 %v3194_v7  ;;  %v1790_v48 = vrot.slane %v1788_v42, 4  ;;  %v1752_v7 = vor.u32 %v1751_v44, %v1748_v55  ;;  %v1780_v16 = vor.u32 %v1779_v63, %v1776_v13  ;;  %v1808_v42 = vor.u32 %v1807_v25, %v1804_v1 }
  0x6e   : > { %2987 = vmatpush3.bf16.msra.mxu0 %v3193_v62  ;;  %2982 = vmatprep.mubr.bf16.mxu0 %v3205_v56  ;;  %v3737_v62 = vld [vmem:[%s3321_s16 + $0x3c] sm:$0x1]  ;;  %v3208_v56 = vld [vmem:[%s3857_s1 + $0x1f0] sm:$0xff]   ;;  %v1767_v54 = vrot.slane %v1766_v34, 4  ;;  %v2025_v55 = vrot.slane %v3734_v47, 5  ;;  %v2017_v25 = vrot.slane %v3728_v51, 5 }
  0x6f   : > { %2893 = vmatpush3.bf16.msra.mxu1 %v3195_v49  ;;  %2988 = vmatprep.subr.bf16.mxu0 %v3196_v15  ;;  %v1793_v49 = vrot.slane %v1791_v30, 5  ;;  %v1797_v4 = vshll.u32 %v3737_v62, 16  ;;  %v1753_v10 = vrot.slane %v1752_v7, 4  ;;  %v1781_v19 = vrot.slane %v1780_v16, 4  ;;  %v3218_v16 = vld [vmem:[%s3857_s1 + $0x218] sm:$0xff]  }
  0x70   : > { %2894 = vmatprep.subr.bf16.mxu1 %v3197_v46  ;;  %v1772_v57 = vsel %vm3366_vm2, %v1767_v54, %v1771_v18  ;;  %v1822_v30 = vor.u32 %v1821_v32, %v1818_v28  ;;  %v2029_v45 = vrot.slane %v3737_v62, 5  ;;  %v2013_v7 = vrot.slane %v3683_v61, 5 }
  0x71   : > { %v2037_v54 = vrot.slane %v3761_v60, 5  ;;  %v2021_v32 = vrot.slane %v3731_v2, 5 }
  0x72   : > { %2887 = vmatmul.mubr.bf16.gmra.mrb[4].mxu1 %v2450_v14  ;;  %2989 = vmatpush3.bf16.msra.mxu0 %v3196_v15  ;;  %v3209_v15 = vld [vmem:[%s3857_s1 + $0xf8] sm:$0xff]   ;;  %v1757_v14 = vrot.slane %v1755_v58, 5  ;;  %v3217_v58 = vld [vmem:[%s3857_s1 + $0x210] sm:$0xff]   ;;  %v2014_v61 = vsel %vm3540_vm5, %v2672_v5, %v2013_v7 }
  0x73   : > { %2895 = vmatpush3.bf16.msra.mxu1 %v3197_v46  ;;  %2906 = vmatprep.mubr.bf16.mxu1 %v3211_v20  ;;  %v1794_v46 = vor.u32 %v1793_v49, %v1790_v48  ;;  %v1785_v20 = vrot.slane %v1783_v3, 5  ;;  %v2663_v49 = vld [vmem:[%s3321_s16 + $0x10] sm:$0xe] }
  0x74   : > { %2896 = vmatprep.subr.bf16.mxu1 %v3199_v23  ;;  %2990 = vmatprep.subr.bf16.mxu0 %v3198_v9  ;;  %v1758_v31 = vsel %vm3366_vm2, %v1753_v10, %v1757_v14  ;;  %v2671_v3 = vrot.slane %v2663_v49, 9  ;;  %v2670_v10 = vld [vmem:[%s3321_s16 + $0x48] sm:$0xe] }
  0x75   : > { %2983 = vmatmul.mubr.bf16.gmra.mrb[4].mxu0 %v3207_v11  ;;  %v1795_v22 = vrot.slane %v1794_v46, 4  ;;  %v3213_v11 = vld [vmem:[%s3857_s1 + $0x200] sm:$0xff]   ;;  %v1786_v40 = vsel %vm3366_vm2, %v1781_v19, %v1785_v20  ;;  %v2652_v29 = vcombine.low %v1758_v31, %v1772_v57  ;;  %v2678_v19 = vrot.slane %v2670_v10, 9  ;;  %v3222_v20 = vld [vmem:[%s3857_s1 + $0x238] sm:$0xff]  }
  0x76   : > { %2991 = vmatpush3.bf16.msra.mxu0 %v3198_v9  ;;  %3002 = vmatprep.mubr.bf16.mxu0 %v2651_v39  ;;  %v1799_v9 = vrot.slane %v1797_v4, 5  ;;  %v3215_v39 = vld [vmem:[%s3321_s16 + $0x28] ss:$8 sps:$4 sm:$0xff]   ;;  %v2009_v4 = vrot.slane %v3679_v24, 5 }
  0x77   : > { %2897 = vmatpush3.bf16.msra.mxu1 %v3199_v23  ;;  %2992 = vmatprep.subr.bf16.mxu0 %v3200_v37  ;;  %v3758_v23 = vld [vmem:[%s3321_s16 + $0x44] sm:$0x1] }
  0x78   : > { %2898 = vmatprep.subr.bf16.mxu1 %v3201_v33  ;;  %v1811_v36 = vshll.u32 %v3758_v23, 16  ;;  %v1800_v41 = vsel %vm3366_vm2, %v1795_v22, %v1799_v9  ;;  %v2010_v24 = vsel %vm3540_vm5, %v2671_v3, %v2009_v4  ;;  %v2033_v14 = vrot.slane %v3758_v23, 5  ;;  %v2665_v22 = vld [vmem:[%s3321_s16 + $0x20] sm:$0xe]  ;;  %v2666_v9 = vld [vmem:[%s3321_s16 + $0x28] sm:$0xe] }
  0x79   : > { %v2653_v13 = vcombine.low %v1786_v40, %v1800_v41  ;;  %v2695_v50 = vcombine.low %v2010_v24, %v2014_v61  ;;  %v2038_v23 = vsel %vm3540_vm5, %v2678_v19, %v2037_v54  ;;  %v2674_v28 = vrot.slane %v2666_v9, 9 }
  0x7a   : > { %2993 = vmatpush3.bf16.msra.mxu0 %v3200_v37  ;;  %v1825_v37 = vshll.u32 %v3761_v60, 16  ;;  %v1813_v63 = vrot.slane %v1811_v36, 5  ;;  %v2673_v60 = vrot.slane %v2665_v22, 9 }
  0x7b   : > { %2899 = vmatpush3.bf16.msra.mxu1 %v3201_v33  ;;  %2994 = vmatprep.subr.bf16.mxu0 %v3202_v43  ;;  %v2668_v33 = vld [vmem:[%s3321_s16 + $0x38] sm:$0xe] }
  0x7c   : > { %2900 = vmatprep.subr.bf16.mxu1 %v3203_v0  ;;  %v2676_v44 = vrot.slane %v2668_v33, 9  ;;  %v1827_v48 = vrot.slane %v1825_v37, 5 }
  0x7e   : > { %2995 = vmatpush3.bf16.msra.mxu0 %v3202_v43  ;;  %v3214_v43 = vld [vmem:[%s3857_s1 + $0x208] sm:$0xff]   ;;  %v2030_v62 = vsel %vm3540_vm5, %v2676_v44, %v2029_v45 }
  0x7f   : > { %2901 = vmatpush3.bf16.msra.mxu1 %v3203_v0  ;;  %2996 = vmatprep.subr.bf16.mxu0 %v3204_v52  ;;  %v2675_v0 = vrot.slane %v2667_v21, 9  ;;  %v2022_v21 = vsel %vm3540_vm5, %v2674_v28, %v2021_v32 }
  0x80   : > { %2902 = vmatprep.subr.bf16.mxu1 %v3206_v26 }
  0x81   : > { %v2026_v47 = vsel %vm3540_vm5, %v2675_v0, %v2025_v55 }
  0x82   : > { %2997 = vmatpush3.bf16.msra.mxu0 %v3204_v52  ;;  %v1809_v52 = vrot.slane %v1808_v42, 4  ;;  %v2697_v34 = vcombine.low %v2026_v47, %v2030_v62 }
  0x83   : > { %2903 = vmatpush3.bf16.msra.mxu1 %v3206_v26  ;;  %2998 = vmatprep.subr.bf16.mxu0 %v3208_v56  ;;  %v1823_v26 = vrot.slane %v1822_v30, 4 }
  0x84   : > { %2904 = vmatprep.subr.bf16.mxu1 %v3209_v15  ;;  %v1814_v17 = vsel %vm3366_vm2, %v1809_v52, %v1813_v63 }
  0x85   : > { %v1828_v27 = vsel %vm3366_vm2, %v1823_v26, %v1827_v48 }
  0x86   : > { %2999 = vmatpush3.bf16.msra.mxu0 %v3208_v56  ;;  %v2654_v46 = vcombine.low %v1814_v17, %v1828_v27  ;;  %v2669_v56 = vld [vmem:[%s3321_s16 + $0x40] sm:$0xe]  ;;  %s2709_s16 = sshll.u32 %s3869_s12, 6 }
  0x87   : > { %2905 = vmatpush3.bf16.msra.mxu1 %v3209_v15  ;;  %3000 = vmatprep.subr.bf16.mxu0 %v3210_v12  ;;  %v3221_v15 = vld [vmem:[%s3857_s1 + $0x230] sm:$0xff]   ;;  %v2677_v18 = vrot.slane %v2669_v56, 9  ;;  %s204_s6 = scalar_lea.vmem %s3858_s2, %s2709_s16 }
  0x88   : > { %3034 = vmatprep.subr.bf16.mxu1 %v3213_v11 }
  0x89   : > { %v2034_v1 = vsel %vm3540_vm5, %v2677_v18, %v2033_v14 }
  0x8a   : > { %2907 = vmatmul.mubr.bf16.vlgmr.msra.gmra.mrb[0].mxu1 %v3212_v35  ;;  %3001 = vmatpush3.bf16.msra.mxu0 %v3210_v12  ;;  %v2018_v12 = vsel %vm3540_vm5, %v2673_v60, %v2017_v25  ;;  %v2235_v25 = vlaneseq }
  0x8b   : > { %3042 = vmatpush3.bf16.msra.mxu1 %v3213_v11  ;;  %2910 = vmatprep.mubr.bf16.mxu1 %v3215_v39  ;;  %v2696_v33 = vcombine.low %v2018_v12, %v2022_v21 }
  0x8c   : > { %3035 = vmatprep.subr.bf16.mxu1 %v3214_v43  ;;  %3010 = vmatprep.subr.bf16.mxu0 %v3213_v11  ;;  %v2236_v21 = vshrl.u32 %v2235_v25, 7 }
  0x8d   : > { %3003 = vmatmul.mubr.bf16.vlgmr.msra.gmra.mrb[0].mxu0 %v2652_v29 }
  0x8e   : > { %3011 = vmatpush3.bf16.msra.mxu0 %v3213_v11  ;;  %3006 = vmatprep.mubr.bf16.mxu0 %v2653_v13  ;;  %v2698_v11 = vcombine.low %v2034_v1, %v2038_v23  ;;  %vm2238_vm6 = vcmp.eq.s32.totalorder %v2236_v21, 1  ;;  %vm2237_vm7 = vcmp.eq.s32.totalorder %v2236_v21, 0 }
  0x8f   : > { %3043 = vmatpush3.bf16.msra.mxu1 %v3214_v43  ;;  %3012 = vmatprep.subr.bf16.mxu0 %v3214_v43 }
  0x90   : > { %3036 = vmatprep.subr.bf16.mxu1 %v3217_v58 }
  0x92   : > { %2911 = vmatmul.mubr.bf16.gmra.mrb[4].mxu1 %v3216_v59  ;;  %3013 = vmatpush3.bf16.msra.mxu0 %v3214_v43 }
  0x93   : > { %3044 = vmatpush3.bf16.msra.mxu1 %v3217_v58  ;;  %3030 = vmatprep.mubr.bf16.mxu1 %v2697_v34 }
  0x94   : > { %3037 = vmatprep.subr.bf16.mxu1 %v3218_v16  ;;  %3014 = vmatprep.subr.bf16.mxu0 %v3217_v58 }
  0x95   : > { %3007 = vmatmul.mubr.bf16.gmra.mrb[4].mxu0 %v2654_v46 }
  0x96   : > { %3015 = vmatpush3.bf16.msra.mxu0 %v3217_v58  ;;  %3026 = vmatprep.mubr.bf16.mxu0 %v2695_v50 }
  0x97   : > { %3045 = vmatpush3.bf16.msra.mxu1 %v3218_v16  ;;  %3016 = vmatprep.subr.bf16.mxu0 %v3218_v16 }
  0x98   : > { %3038 = vmatprep.subr.bf16.mxu1 %v3219_v38 }
  0x9a   : > { %3017 = vmatpush3.bf16.msra.mxu0 %v3218_v16 }
  0x9b   : > { %3046 = vmatpush3.bf16.msra.mxu1 %v3219_v38  ;;  %3018 = vmatprep.subr.bf16.mxu0 %v3219_v38 }
  0x9c   : > { %3039 = vmatprep.subr.bf16.mxu1 %v3220_v6 }
  0x9e   : > { %3019 = vmatpush3.bf16.msra.mxu0 %v3219_v38 }
  0x9f   : > { %3047 = vmatpush3.bf16.msra.mxu1 %v3220_v6  ;;  %3020 = vmatprep.subr.bf16.mxu0 %v3220_v6 }
  0xa0   : > { %3040 = vmatprep.subr.bf16.mxu1 %v3221_v15 }
  0xa2   : > { %3021 = vmatpush3.bf16.msra.mxu0 %v3220_v6 }
  0xa3   : > { %3048 = vmatpush3.bf16.msra.mxu1 %v3221_v15  ;;  %3022 = vmatprep.subr.bf16.mxu0 %v3221_v15 }
  0xa4   : > { %3041 = vmatprep.subr.bf16.mxu1 %v3222_v20 }
  0xa6   : > { %3023 = vmatpush3.bf16.msra.mxu0 %v3221_v15 }
  0xa7   : > { %3049 = vmatpush3.bf16.msra.mxu1 %v3222_v20  ;;  %3024 = vmatprep.subr.bf16.mxu0 %v3222_v20 }
  0xaa   : > { %3031 = vmatmul.mubr.bf16.vlgmr.msra.gmra.mrb[8].mxu1 %v2698_v11  ;;  %3025 = vmatpush3.bf16.msra.mxu0 %v3222_v20 }
  0xad   : > { %3027 = vmatmul.mubr.bf16.vlgmr.msra.gmra.mrb[0].mxu0 %v2696_v33 }
 0x15d   : > { %v2908_v35 = vpop.f32.mrb[0].mxu1 }
 0x15e   : > { %v996_v51 = vpop.f32.mrb[1].mxu1 }
 0x15f   : > { %v2909_v31 = vpop.f32.mrb[2].mxu1 }
 0x160   : > { %v999_v2 = vpop.f32.mrb[3].mxu1 }
 0x165   : > { %v2912_v57 = vpop.f32.mrb[4].mxu1 }
 0x166   : > { %v1012_v36 = vpop.f32.mrb[5].mxu1 }
 0x167   : > { %v2913_v37 = vpop.f32.mrb[6].mxu1 }
 0x168   : > { %v1015_v39 = vpop.f32.mrb[7].mxu1  ;;  %v3008_v40 = vpop.f32.mrb[4].mxu0 }
 0x169   : > { %v3054_v41 = vadd.f32 %v3008_v40, %v2912_v57  ;;  %v1960_v42 = vpop.f32.mrb[5].mxu0 }
 0x16a   : > { %v3056_v30 = vadd.f32 %v1960_v42, %v1012_v36  ;;  %v3009_v8 = vpop.f32.mrb[6].mxu0 }
 0x16b   : > { %v3058_v43 = vadd.f32 %v3009_v8, %v2913_v37  ;;  %v1963_v0 = vpop.f32.mrb[7].mxu0 }
 0x16c   : > { %v3060_v55 = vadd.f32 %v1963_v0, %v1015_v39 }
 0x17d   : > { %v3032_v44 = vpop.f32.mrb[8].mxu1 }
 0x17e   : > { %v3055_v45 = vadd.f32 %v3054_v41, %v3032_v44  ;;  %v2170_v29 = vpop.f32.mrb[9].mxu1 }
 0x17f   : > { %v3057_v13 = vadd.f32 %v3056_v30, %v2170_v29  ;;  %v3033_v63 = vpop.f32.mrb[10].mxu1 }
 0x180   : > { %2199 = vst [vmem:[%s204_s6 + $0x30] sm:$0xff] %v3055_v45  ;;  %v3059_v48 = vadd.f32 %v3058_v43, %v3033_v63  ;;  %v2173_v49 = vpop.f32.mrb[11].mxu1  ;;  %v3028_v52 = vpop.f32.mrb[0].mxu0  ;;  %v2220_v14 = vmul.f32 %v3055_v45, %v3055_v45 }
 0x181   : > { %2197 = vst [vmem:[%s204_s6 + $0x20] sm:$0xff] %v3057_v13  ;;  %v3061_v53 = vadd.f32 %v3060_v55, %v2173_v49  ;;  %v3050_v26 = vadd.f32 %v3028_v52, %v2908_v35  ;;  %v2154_v47 = vpop.f32.mrb[1].mxu0  ;;  %v2218_v38 = vmul.f32 %v3057_v13, %v3057_v13 }
 0x182   : > { %2200 = vst [vmem:[%s204_s6 + $0x38] sm:$0xff] %v3059_v48  ;;  %v3051_v62 = vadd.f32 %v2154_v47, %v996_v51  ;;  %v3029_v58 = vpop.f32.mrb[2].mxu0  ;;  %v2221_v19 = vmul.f32 %v3059_v48, %v3059_v48 }
 0x183   : > { %2198 = vst [vmem:[%s204_s6 + $0x28] sm:$0xff] %v3061_v53  ;;  %2195 = vst [vmem:[%s204_s6 + $0x10] sm:$0xff] %v3050_v26  ;;  %v3052_v59 = vadd.f32 %v3029_v58, %v2909_v31  ;;  %v2157_v3 = vpop.f32.mrb[3].mxu0  ;;  %v2216_v17 = vmul.f32 %v3050_v26, %v3050_v26  ;;  %v2219_v56 = vmul.f32 %v3061_v53, %v3061_v53 }
 0x184   : > { %2193 = vst [vmem:[%s204_s6] sm:$0xff] %v3051_v62  ;;  %v3053_v4 = vadd.f32 %v2157_v3, %v999_v2  ;;  %v2214_v5 = vmul.f32 %v3051_v62, %v3051_v62 }
 0x185   : > { %2196 = vst [vmem:[%s204_s6 + $0x18] sm:$0xff] %v3052_v59  ;;  %v2217_v24 = vmul.f32 %v3052_v59, %v3052_v59 }
 0x186   : > { %2194 = vst [vmem:[%s204_s6 + $0x8] sm:$0xff] %v3053_v4  ;;  %v2201_v7 = vadd.f32 %v3053_v4, %v3051_v62  ;;  %v2215_v34 = vmul.f32 %v3053_v4, %v3053_v4 }
 0x188   : > { %v2202_v27 = vadd.f32 %v3050_v26, %v2201_v7  ;;  %v2222_v16 = vadd.f32 %v2215_v34, %v2214_v5 }
 0x18a   : > { %v2223_v61 = vadd.f32 %v2222_v16, %v2216_v17  ;;  %v2203_v46 = vadd.f32 %v3052_v59, %v2202_v27 }
 0x18c   : > { %v2204_v50 = vadd.f32 %v3057_v13, %v2203_v46  ;;  %v2224_v6 = vadd.f32 %v2223_v61, %v2217_v24 }
 0x18e   : > { %v2205_v15 = vadd.f32 %v3061_v53, %v2204_v50  ;;  %v2225_v10 = vadd.f32 %v2224_v6, %v2218_v38 }
 0x190   : > { %v2206_v54 = vadd.f32 %v3055_v45, %v2205_v15  ;;  %v2226_v18 = vadd.f32 %v2225_v10, %v2219_v56 }
 0x192   : > { %v2207_v20 = vadd.f32 %v3059_v48, %v2206_v54  ;;  %v2227_v22 = vadd.f32 %v2226_v18, %v2220_v14 }
 0x194   : > { %v2208_v9 = vrot.slane %v2207_v20, 4  ;;  %v2228_v1 = vadd.f32 %v2227_v22, %v2221_v19 }
 0x196   : > { %v2209_v23 = vadd.f32 %v2208_v9, %v2207_v20  ;;  %v2229_v60 = vrot.slane %v2228_v1, 4 }
 0x198   : > { %v2210_v28 = vrot.slane %v2209_v23, 2  ;;  %v2230_v32 = vadd.f32 %v2229_v60, %v2228_v1 }
 0x19a   : > { %v2211_v11 = vadd.f32 %v2210_v28, %v2209_v23  ;;  %v2231_v12 = vrot.slane %v2230_v32, 2 }
 0x19c   : > { %v2232_v33 = vadd.f32 %v2231_v12, %v2230_v32  ;;  %v2212_v35 = vrot.slane %v2211_v11, 1 }
 0x19e   : > { %v2233_v51 = vrot.slane %v2232_v33, 1  ;;  %v2213_v2 = vadd.f32 %v2212_v35, %v2211_v11 }
 0x1a0   : > { %v2234_v31 = vadd.f32 %v2233_v51, %v2232_v33 }
 0x1a2   : > { %v2239_v57 = vsel %vm2238_vm6, %v2234_v31, 0.0 }
 0x1a3   : > { %v2240_v36 = vsel %vm2237_vm7, %v2213_v2, %v2239_v57 }
 0x1a4   : > { %2241 = vst [vmem:[%s212_s10] sm:$0xff] %v2240_v36 }
 0x1a5 PF: > { %s14_s14 = sadd.s32 1, %s3245_s14   ;;  %s3864_s12 = smov %s3241_s13 }
 0x1a6   : > { %p11_p5 = scmp.ge.s32.totalorder %s14_s14, 4   ;;  %s3865_s13 = smov %s3867_s15 }
 0x1a8   :  { %13 = sbr.rel (!%p11_p5) target bundleno = 2 (0x2), region = 81 }

</bundles_post_ra>
